<compile_context>
chip_gen: v7x
topology: tpu7x:2x2x1
jax: 0.10.0
libtpu: 0.0.40
codegen_flags: <defaults>
</compile_context>

<pallas_src>
import functools

import jax
import jax.numpy as jnp
from jax import lax
from jax.experimental import pallas as pl
from jax.experimental.pallas import tpu as pltpu


GATE_DTYPE = jnp.bfloat16      # storage dtype for precomputed gates / layer outputs
_PROJ_ROW_TILE = 512           # projection row tile
# TODO(synk): on v7x (64 MiB VMEM) drop _PROJ_ROW_TILE to 256 and set
#             pltpu.CompilerParams(vmem_limit_bytes=...) at production din/H.


def _round_up(x, m):
    return ((x + m - 1) // m) * m


def _pick_time_chunk(t):
    """Largest chunk in {32, 16, 8} that divides T exactly (else 8 + padding)."""
    for cand in (32, 16, 8):
        if t >= cand and t % cand == 0:
            return cand
    return 8


# --------------------------- input projection ------------------------------ #
# gx = x @ [W_ih_fwd^T | W_ih_bwd^T] + [b_ih_fwd | b_ih_bwd]  (one MXU stream),
# stored as two (N, 3H) bf16 slabs so the recurrence fetches exactly the half
# it needs per direction/time chunk.

def _proj_ln_kernel(x_ref, g_ref, b_ref, w_ref, bias_ref, gxf_ref, gxb_ref):
    """Layer 0: LayerNorm fused into the projection prologue."""
    x = x_ref[...]
    mu = jnp.mean(x, axis=-1, keepdims=True)
    var = jnp.mean((x - mu) ** 2, axis=-1, keepdims=True)
    xn = (x - mu) * lax.rsqrt(var + 1e-5) * g_ref[...] + b_ref[...]
    g = jnp.dot(xn, w_ref[...], preferred_element_type=jnp.float32) + bias_ref[...]
    g3 = gxf_ref.shape[-1]
    gxf_ref[...] = g[:, :g3].astype(gxf_ref.dtype)
    gxb_ref[...] = g[:, g3:].astype(gxb_ref.dtype)


def _proj_splitk_kernel(xf_ref, xb_ref, wt_ref, wb_ref, bias_ref, gxf_ref, gxb_ref):
    """Layers >= 1: split-K over (out_fwd, out_bwd) -> no HBM concat of (T,B,2H)."""
    g = (jnp.dot(xf_ref[...], wt_ref[...], preferred_element_type=jnp.float32)
         + jnp.dot(xb_ref[...], wb_ref[...], preferred_element_type=jnp.float32)
         + bias_ref[...])
    g3 = gxf_ref.shape[-1]
    gxf_ref[...] = g[:, :g3].astype(gxf_ref.dtype)
    gxb_ref[...] = g[:, g3:].astype(gxb_ref.dtype)


def _row_tiling(n):
    if n <= _PROJ_ROW_TILE:
        return n, n
    return _PROJ_ROW_TILE, _round_up(n, _PROJ_ROW_TILE)


def _project(kernel, row_inputs, const_inputs, g6, out_dtype):
    """row_inputs: (N, Din_i) arrays tiled over rows; const_inputs: grid-invariant 2-D."""
    n = row_inputs[0].shape[0]
    tile, n_pad = _row_tiling(n)
    if n_pad != n:
        row_inputs = [jnp.pad(x, ((0, n_pad - n), (0, 0))) for x in row_inputs]
    g3 = g6 // 2

    in_specs = [pl.BlockSpec((tile, x.shape[1]), lambda i: (i, 0)) for x in row_inputs]
    in_specs += [pl.BlockSpec(c.shape, lambda i: (0, 0)) for c in const_inputs]
    out_spec = pl.BlockSpec((tile, g3), lambda i: (i, 0))

    gxf, gxb = pl.pallas_call(
        kernel,
        out_shape=(jax.ShapeDtypeStruct((n_pad, g3), out_dtype),
                   jax.ShapeDtypeStruct((n_pad, g3), out_dtype)),
        grid=(n_pad // tile,),
        in_specs=in_specs,
        out_specs=(out_spec, out_spec),
        compiler_params=pltpu.CompilerParams(dimension_semantics=("parallel",)),
    )(*row_inputs, *const_inputs)

    if n_pad != n:
        gxf, gxb = gxf[:n], gxb[:n]
    return gxf, gxb


# ------------------------- chunked bidirectional GRU ------------------------ #

def _bigru_chunk_kernel(gxf_ref, gxb_ref, len_ref, whh_ref, bhh_ref,
                        of_ref, ob_ref, h_ref):
    """Tc timesteps of a bidirectional GRU layer per grid step.

    Grid = (batch_tiles, time_chunks); axis 1 is the serial time sweep.
      gxf_ref: (Tc, Bt, 3H) bf16  fwd input gates for time chunk c (bias included)
      gxb_ref: (Tc, Bt, 3H) bf16  bwd input gates for time chunk Nc-1-c
      len_ref: (Bt, 1) int32      sequence lengths
      whh_ref: (2H, 6H) f32       block-diag [[Whh_f, 0], [0, Whh_b]] (gate order r,z,n)
      bhh_ref: (1, 6H)  f32       [b_hh_f | b_hh_b]
      of_ref : (Tc, Bt, H) bf16   fwd outputs, written at chunk c
      ob_ref : (Tc, Bt, H) bf16   bwd outputs, written at chunk Nc-1-c
      h_ref  : (Bt, 2H) f32       carried hidden state [h_fwd | h_bwd]
    """
    c = pl.program_id(1)
    tc, _, g3 = gxf_ref.shape
    hdim = g3 // 3
    t_total = pl.num_programs(1) * tc
    t0 = c * tc

    @pl.when(c == 0)                      # time index restarts per batch tile
    def _():
        h_ref[...] = jnp.zeros_like(h_ref)

    lengths = len_ref[...]                # (Bt, 1) int32
    whh = whh_ref[...]
    bhh = bhh_ref[...]

    def gru_cell(gx, gh_d, h_d, t_idx):
        r = jax.nn.sigmoid(gx[:, :hdim] + gh_d[:, :hdim])
        z = jax.nn.sigmoid(gx[:, hdim:2 * hdim] + gh_d[:, hdim:2 * hdim])
        n = jnp.tanh(gx[:, 2 * hdim:] + r * gh_d[:, 2 * hdim:])
        h_new = (1.0 - z) * n + z * h_d
        valid = t_idx < lengths                       # (Bt, 1) bool
        h_new = jnp.where(valid, h_new, h_d)          # freeze past length
        return h_new, jnp.where(valid, h_new, 0.0)    # zero padded output

    # Fully unrolled static inner loop (Tc is small & static -> static slices).
    for i in range(tc):
        t_f = t0 + i
        t_b = t_total - 1 - t_f
        h_prev = h_ref[...]                           # (Bt, 2H) f32
        # One block-diagonal MXU push for both directions & all 3 gates.
        # TODO(synk): at production H (2H > MXU K tile) split into two H x 3H dots.
        gh = jnp.dot(h_prev, whh, preferred_element_type=jnp.float32) + bhh

        gxf = gxf_ref[i].astype(jnp.float32)          # (Bt, 3H)
        gxb = gxb_ref[tc - 1 - i].astype(jnp.float32)

        h_f, o_f = gru_cell(gxf, gh[:, :3 * hdim], h_prev[:, :hdim], t_f)
        h_b, o_b = gru_cell(gxb, gh[:, 3 * hdim:], h_prev[:, hdim:], t_b)

        h_ref[:, :hdim] = h_f                         # sliced stores (no concat)
        h_ref[:, hdim:] = h_b
        of_ref[i] = o_f.astype(of_ref.dtype)
        ob_ref[tc - 1 - i] = o_b.astype(ob_ref.dtype)


def bigru_recurrence(gxf, gxb, len_b1, whh_blk, bhh_blk, time_chunk, batch_tile=None):
    """Both directions of one GRU layer; gates & outputs time-major (T, B, *)."""
    t_pad, b_pad, g3 = gxf.shape
    h = g3 // 3
    h2, h6 = whh_blk.shape
    nc = t_pad // time_chunk
    bt = b_pad if batch_tile is None else batch_tile
    nb = b_pad // bt

    gate_f = pl.BlockSpec((time_chunk, bt, g3), lambda b, c: (c, b, 0))
    gate_b = pl.BlockSpec((time_chunk, bt, g3), lambda b, c: (nc - 1 - c, b, 0))
    out_f_spec = pl.BlockSpec((time_chunk, bt, h), lambda b, c: (c, b, 0))
    out_b_spec = pl.BlockSpec((time_chunk, bt, h), lambda b, c: (nc - 1 - c, b, 0))

    return pl.pallas_call(
        _bigru_chunk_kernel,
        out_shape=(jax.ShapeDtypeStruct((t_pad, b_pad, h), gxf.dtype),
                   jax.ShapeDtypeStruct((t_pad, b_pad, h), gxf.dtype)),
        grid=(nb, nc),
        in_specs=[
            gate_f, gate_b,
            pl.BlockSpec((bt, 1), lambda b, c: (b, 0)),       # lengths
            pl.BlockSpec((h2, h6), lambda b, c: (0, 0)),      # Whh block-diag
            pl.BlockSpec((1, h6), lambda b, c: (0, 0)),       # bhh
        ],
        out_specs=(out_f_spec, out_b_spec),
        scratch_shapes=[pltpu.VMEM((bt, 2 * h), jnp.float32)],
        compiler_params=pltpu.CompilerParams(
            dimension_semantics=("parallel", "arbitrary")),
    )(gxf, gxb, len_b1, whh_blk, bhh_blk)


# --------------------------- fwd/bwd averaging ------------------------------ #

def _avg_kernel(a_ref, b_ref, o_ref):
    o_ref[...] = (a_ref[...].astype(jnp.float32) +
                  b_ref[...].astype(jnp.float32)) * 0.5


def fwd_bwd_average(a, b, time_tile):
    t_pad, b_pad, h = a.shape
    spec = pl.BlockSpec((time_tile, b_pad, h), lambda t: (t, 0, 0))
    return pl.pallas_call(
        _avg_kernel,
        out_shape=jax.ShapeDtypeStruct((t_pad, b_pad, h), jnp.float32),
        grid=(t_pad // time_tile,),
        in_specs=[spec, spec],
        out_specs=spec,
        compiler_params=pltpu.CompilerParams(dimension_semantics=("parallel",)),
    )(a, b)


# ------------------------------ Parameters --------------------------------- #

def init_params(key, vocab_size, word_dim, embed_size, num_layers):
    """Deterministic synthetic parameters, repacked for the fused kernels.

    PyTorch layout: weight_ih (3H, Din), weight_hh (3H, H), biases (3H,),
    gate order (r, z, n).  We store per layer:
      wih      : (Din, 6H)   [fwd r|z|n  |  bwd r|z|n]     (layer 0)
      wih_top  : (H, 6H)     rows multiplying out_fwd       (layers >= 1)
      wih_bot  : (H, 6H)     rows multiplying out_bwd       (layers >= 1)
      bih      : (1, 6H)
      whh_blk  : (2H, 6H)    block-diag of the two transposed hidden weights
      bhh_blk  : (1, 6H)
    """
    h = embed_size
    keys = iter(jax.random.split(key, 1 + num_layers * 2 * 4))
    params = {
        "embed": jax.random.normal(next(keys), (vocab_size, word_dim), jnp.float32),
        "ln_gamma": jnp.ones((1, word_dim), jnp.float32),   # nn.LayerNorm default
        "ln_beta": jnp.zeros((1, word_dim), jnp.float32),
        "gru": [],
    }
    scale = 1.0 / (h ** 0.5)
    for layer in range(num_layers):
        din = word_dim if layer == 0 else 2 * h
        packed = {}
        for direction in ("fwd", "bwd"):
            w_ih = jax.random.uniform(next(keys), (3 * h, din), jnp.float32, -scale, scale)
            w_hh = jax.random.uniform(next(keys), (3 * h, h), jnp.float32, -scale, scale)
            b_ih = jax.random.uniform(next(keys), (3 * h,), jnp.float32, -scale, scale)
            b_hh = jax.random.uniform(next(keys), (3 * h,), jnp.float32, -scale, scale)
            packed[direction] = (w_ih.T, b_ih.reshape(1, 3 * h),
                                 w_hh.T, b_hh.reshape(1, 3 * h))
        wih_f, bih_f, whh_f, bhh_f = packed["fwd"]
        wih_b, bih_b, whh_b, bhh_b = packed["bwd"]

        wih = jnp.concatenate([wih_f, wih_b], axis=1)        # (din, 6H)
        bih = jnp.concatenate([bih_f, bih_b], axis=1)        # (1, 6H)
        whh_blk = jnp.zeros((2 * h, 6 * h), jnp.float32)
        whh_blk = whh_blk.at[:h, :3 * h].set(whh_f)
        whh_blk = whh_blk.at[h:, 3 * h:].set(whh_b)
        layer_p = {
            "bih": bih,
            "whh_blk": whh_blk,
            "bhh_blk": jnp.concatenate([bhh_f, bhh_b], axis=-1),
        }
        if layer == 0:
            layer_p["wih"] = wih
        else:
            layer_p["wih_top"] = wih[:h]                     # multiplies out_fwd
            layer_p["wih_bot"] = wih[h:]                     # multiplies out_bwd
        params["gru"].append(layer_p)
    return params


# ------------------------------ Forward pass -------------------------------- #

@functools.partial(jax.jit, static_argnames=("embed_size", "num_layers"))
def text_encoder_forward(tokens, lengths, params, *, embed_size, num_layers):
    """tokens: (B, T) int32; lengths: (B,) int32.  Returns (embedding, hidden)."""
    # TODO(synk): embedding lookup is a gather; kept as XLA jnp.take.
    emb = jnp.take(params["embed"], tokens, axis=0)           # (B, T, word_dim)
    b, t, d = emb.shape
    h = embed_size

    tc = _pick_time_chunk(t)
    t_pad = _round_up(t, tc)
    b_pad = _round_up(b, 8)                                   # full sublanes

    feats = jnp.transpose(emb, (1, 0, 2))                     # time-major (T, B, D)
    feats = jnp.pad(feats, ((0, t_pad - t), (0, b_pad - b), (0, 0)))
    len_b1 = jnp.pad(lengths.astype(jnp.int32), (0, b_pad - b))[:, None]

    n_rows = t_pad * b_pad
    out_f = out_b = None
    for layer in range(num_layers):
        p = params["gru"][layer]
        if layer == 0:
            gxf, gxb = _project(
                _proj_ln_kernel, [feats.reshape(n_rows, d)],
                [params["ln_gamma"], params["ln_beta"], p["wih"], p["bih"]],
                6 * h, GATE_DTYPE)
        else:
            gxf, gxb = _project(
                _proj_splitk_kernel,
                [out_f.reshape(n_rows, h), out_b.reshape(n_rows, h)],
                [p["wih_top"], p["wih_bot"], p["bih"]],
                6 * h, GATE_DTYPE)
        gxf = gxf.reshape(t_pad, b_pad, 3 * h)
        gxb = gxb.reshape(t_pad, b_pad, 3 * h)
        out_f, out_b = bigru_recurrence(gxf, gxb, len_b1,
                                        p["whh_blk"], p["bhh_blk"], tc)

    hidden_tbh = fwd_bwd_average(out_f, out_b, tc)            # (T_pad, B_pad, H) f32
    hidden = jnp.transpose(hidden_tbh, (1, 0, 2))[:b, :t]     # (B, T, H)
    return emb, hidden


# --------------------------------- main ------------------------------------ #

if __name__ == "__main__":
    vocab_size, word_dim, embed_size, num_layers = 50, 32, 32, 2
    B, T = 2, 8

    key = jax.random.PRNGKey(0)
    k_param, k_tok = jax.random.split(key)
    params = init_params(k_param, vocab_size, word_dim, embed_size, num_layers)

    tokens = jax.random.randint(k_tok, (B, T), 0, vocab_size, dtype=jnp.int32)
    lengths = jnp.array([8, 5], dtype=jnp.int32)              # variable-length captions

    embedding, hidden = text_encoder_forward(
        tokens, lengths, params, embed_size=embed_size, num_layers=num_layers)
    jax.block_until_ready((embedding, hidden))

    assert embedding.shape == (B, T, word_dim)
    assert hidden.shape == (B, T, embed_size)
    print("KERNEL_OK")
</pallas_src>

<mosaic_0001>
module attributes {stable_mosaic.version = 11 : i64} {
  func.func @_proj_ln_kernel(%arg0: i32, %arg1: memref<64x32xf32, #tpu.memory_space<vmem>>, %arg2: memref<1x32xf32, #tpu.memory_space<vmem>>, %arg3: memref<1x32xf32, #tpu.memory_space<vmem>>, %arg4: memref<32x192xf32, #tpu.memory_space<vmem>>, %arg5: memref<1x192xf32, #tpu.memory_space<vmem>>, %arg6: memref<64x96xbf16, #tpu.memory_space<vmem>>, %arg7: memref<64x96xbf16, #tpu.memory_space<vmem>>) attributes {dimension_semantics = [#tpu.dimension_semantics<parallel>], iteration_bounds = array<i64: 1>, scalar_prefetch = 0 : i64, scratch_operands = 0 : i64, tpu.core_type = #tpu.core_type<tc>, window_params = [{transform_indices = @transform_0, window_bounds = array<i64: 64, 32>}, {pipeline_mode = #tpu.pipeline_mode<synchronous>, transform_indices = @transform_1, window_bounds = array<i64: 1, 32>}, {pipeline_mode = #tpu.pipeline_mode<synchronous>, transform_indices = @transform_2, window_bounds = array<i64: 1, 32>}, {pipeline_mode = #tpu.pipeline_mode<synchronous>, transform_indices = @transform_3, window_bounds = array<i64: 32, 192>}, {pipeline_mode = #tpu.pipeline_mode<synchronous>, transform_indices = @transform_4, window_bounds = array<i64: 1, 192>}, {transform_indices = @transform_5, window_bounds = array<i64: 64, 96>}, {transform_indices = @transform_6, window_bounds = array<i64: 64, 96>}]} {
    %c0 = arith.constant 0 : index
    %c0_0 = arith.constant 0 : index
    %0 = vector.load %arg1[%c0, %c0_0] : memref<64x32xf32, #tpu.memory_space<vmem>>, vector<64x32xf32>
    %cst = arith.constant dense<0.000000e+00> : vector<64xf32>
    %1 = vector.multi_reduction <add>, %0, %cst [1] : vector<64x32xf32> to vector<64xf32>
    %2 = vector.shape_cast %1 : vector<64xf32> to vector<64x1xf32>
    %cst_1 = arith.constant 3.200000e+01 : f32
    %3 = vector.broadcast %cst_1 : f32 to vector<64x1xf32>
    %4 = arith.divf %2, %3 : vector<64x1xf32>
    %5 = vector.broadcast %4 : vector<64x1xf32> to vector<64x32xf32>
    %6 = arith.subf %0, %5 : vector<64x32xf32>
    %7 = arith.mulf %6, %6 : vector<64x32xf32>
    %cst_2 = arith.constant dense<0.000000e+00> : vector<64xf32>
    %8 = vector.multi_reduction <add>, %7, %cst_2 [1] : vector<64x32xf32> to vector<64xf32>
    %9 = vector.shape_cast %8 : vector<64xf32> to vector<64x1xf32>
    %cst_3 = arith.constant 3.200000e+01 : f32
    %10 = vector.broadcast %cst_3 : f32 to vector<64x1xf32>
    %11 = arith.divf %9, %10 : vector<64x1xf32>
    %12 = vector.broadcast %4 : vector<64x1xf32> to vector<64x32xf32>
    %13 = arith.subf %0, %12 : vector<64x32xf32>
    %cst_4 = arith.constant 9.99999974E-6 : f32
    %14 = vector.broadcast %cst_4 : f32 to vector<64x1xf32>
    %15 = arith.addf %11, %14 : vector<64x1xf32>
    %16 = math.rsqrt %15 : vector<64x1xf32>
    %17 = vector.broadcast %16 : vector<64x1xf32> to vector<64x32xf32>
    %18 = arith.mulf %13, %17 : vector<64x32xf32>
    %c0_5 = arith.constant 0 : index
    %c0_6 = arith.constant 0 : index
    %19 = vector.load %arg2[%c0_5, %c0_6] : memref<1x32xf32, #tpu.memory_space<vmem>>, vector<1x32xf32>
    %20 = vector.broadcast %19 : vector<1x32xf32> to vector<64x32xf32>
    %21 = arith.mulf %18, %20 : vector<64x32xf32>
    %c0_7 = arith.constant 0 : index
    %c0_8 = arith.constant 0 : index
    %22 = vector.load %arg3[%c0_7, %c0_8] : memref<1x32xf32, #tpu.memory_space<vmem>>, vector<1x32xf32>
    %23 = vector.broadcast %22 : vector<1x32xf32> to vector<64x32xf32>
    %24 = arith.addf %21, %23 : vector<64x32xf32>
    %c0_9 = arith.constant 0 : index
    %c0_10 = arith.constant 0 : index
    %25 = vector.load %arg4[%c0_9, %c0_10] : memref<32x192xf32, #tpu.memory_space<vmem>>, vector<32x192xf32>
    %cst_11 = arith.constant dense<0.000000e+00> : vector<64x192xf32>
    %26 = tpu.matmul %24, %25, %cst_11 {dimension_numbers = #tpu.dot_dimension_numbers<[1], [0], [0], [1], [0, 0, 1, 1], [], []>} : vector<64x32xf32>, vector<32x192xf32>, vector<64x192xf32> -> vector<64x192xf32>
    %c0_12 = arith.constant 0 : index
    %c0_13 = arith.constant 0 : index
    %27 = vector.load %arg5[%c0_12, %c0_13] : memref<1x192xf32, #tpu.memory_space<vmem>>, vector<1x192xf32>
    %28 = vector.broadcast %27 : vector<1x192xf32> to vector<64x192xf32>
    %29 = arith.addf %26, %28 : vector<64x192xf32>
    %30 = vector.extract_strided_slice %29 {offsets = [0, 0], sizes = [64, 96], strides = [1, 1]} : vector<64x192xf32> to vector<64x96xf32>
    %31 = arith.truncf %30 : vector<64x96xf32> to vector<64x96xbf16>
    %c0_14 = arith.constant 0 : index
    %c0_15 = arith.constant 0 : index
    %32 = vector.load %arg6[%c0_14, %c0_15] : memref<64x96xbf16, #tpu.memory_space<vmem>>, vector<64x96xbf16>
    tpu.vector_store %arg6[%c0_14, %c0_15], %31 {strides = array<i32>} : memref<64x96xbf16, #tpu.memory_space<vmem>>, vector<64x96xbf16>,
    %33 = vector.extract_strided_slice %29 {offsets = [0, 96], sizes = [64, 96], strides = [1, 1]} : vector<64x192xf32> to vector<64x96xf32>
    %34 = arith.truncf %33 : vector<64x96xf32> to vector<64x96xbf16>
    %c0_16 = arith.constant 0 : index
    %c0_17 = arith.constant 0 : index
    %35 = vector.load %arg7[%c0_16, %c0_17] : memref<64x96xbf16, #tpu.memory_space<vmem>>, vector<64x96xbf16>
    tpu.vector_store %arg7[%c0_16, %c0_17], %34 {strides = array<i32>} : memref<64x96xbf16, #tpu.memory_space<vmem>>, vector<64x96xbf16>,
    return
  }
  func.func @transform_0(%arg0: i32) -> (i32, i32) {
    %c0_i32 = arith.constant 0 : i32
    %c0_i32_0 = arith.constant 0 : i32
    return %arg0, %c0_i32 : i32, i32
  }
  func.func @transform_1(%arg0: i32) -> (i32, i32) {
    %c0_i32 = arith.constant 0 : i32
    %c0_i32_0 = arith.constant 0 : i32
    %c0_i32_1 = arith.constant 0 : i32
    return %c0_i32, %c0_i32_0 : i32, i32
  }
  func.func @transform_2(%arg0: i32) -> (i32, i32) {
    %c0_i32 = arith.constant 0 : i32
    %c0_i32_0 = arith.constant 0 : i32
    %c0_i32_1 = arith.constant 0 : i32
    return %c0_i32, %c0_i32_0 : i32, i32
  }
  func.func @transform_3(%arg0: i32) -> (i32, i32) {
    %c0_i32 = arith.constant 0 : i32
    %c0_i32_0 = arith.constant 0 : i32
    %c0_i32_1 = arith.constant 0 : i32
    return %c0_i32, %c0_i32_0 : i32, i32
  }
  func.func @transform_4(%arg0: i32) -> (i32, i32) {
    %c0_i32 = arith.constant 0 : i32
    %c0_i32_0 = arith.constant 0 : i32
    %c0_i32_1 = arith.constant 0 : i32
    return %c0_i32, %c0_i32_0 : i32, i32
  }
  func.func @transform_5(%arg0: i32) -> (i32, i32) {
    %c0_i32 = arith.constant 0 : i32
    %c0_i32_0 = arith.constant 0 : i32
    return %arg0, %c0_i32 : i32, i32
  }
  func.func @transform_6(%arg0: i32) -> (i32, i32) {
    %c0_i32 = arith.constant 0 : i32
    %c0_i32_0 = arith.constant 0 : i32
    return %arg0, %c0_i32 : i32, i32
  }
}

module attributes {stable_mosaic.version = 11 : i64} {
  func.func @_proj_splitk_kernel(%arg0: i32, %arg1: memref<64x32xbf16, #tpu.memory_space<vmem>>, %arg2: memref<64x32xbf16, #tpu.memory_space<vmem>>, %arg3: memref<32x192xf32, #tpu.memory_space<vmem>>, %arg4: memref<32x192xf32, #tpu.memory_space<vmem>>, %arg5: memref<1x192xf32, #tpu.memory_space<vmem>>, %arg6: memref<64x96xbf16, #tpu.memory_space<vmem>>, %arg7: memref<64x96xbf16, #tpu.memory_space<vmem>>) attributes {dimension_semantics = [#tpu.dimension_semantics<parallel>], iteration_bounds = array<i64: 1>, scalar_prefetch = 0 : i64, scratch_operands = 0 : i64, tpu.core_type = #tpu.core_type<tc>, window_params = [{transform_indices = @transform_0, window_bounds = array<i64: 64, 32>}, {transform_indices = @transform_1, window_bounds = array<i64: 64, 32>}, {pipeline_mode = #tpu.pipeline_mode<synchronous>, transform_indices = @transform_2, window_bounds = array<i64: 32, 192>}, {pipeline_mode = #tpu.pipeline_mode<synchronous>, transform_indices = @transform_3, window_bounds = array<i64: 32, 192>}, {pipeline_mode = #tpu.pipeline_mode<synchronous>, transform_indices = @transform_4, window_bounds = array<i64: 1, 192>}, {transform_indices = @transform_5, window_bounds = array<i64: 64, 96>}, {transform_indices = @transform_6, window_bounds = array<i64: 64, 96>}]} {
    %c0 = arith.constant 0 : index
    %c0_0 = arith.constant 0 : index
    %0 = vector.load %arg1[%c0, %c0_0] : memref<64x32xbf16, #tpu.memory_space<vmem>>, vector<64x32xbf16>
    %c0_1 = arith.constant 0 : index
    %c0_2 = arith.constant 0 : index
    %1 = vector.load %arg3[%c0_1, %c0_2] : memref<32x192xf32, #tpu.memory_space<vmem>>, vector<32x192xf32>
    %cst = arith.constant dense<0.000000e+00> : vector<64x192xf32>
    %2 = tpu.matmul %0, %1, %cst {dimension_numbers = #tpu.dot_dimension_numbers<[1], [0], [0], [1], [0, 0, 1, 1], [], []>} : vector<64x32xbf16>, vector<32x192xf32>, vector<64x192xf32> -> vector<64x192xf32>
    %c0_3 = arith.constant 0 : index
    %c0_4 = arith.constant 0 : index
    %3 = vector.load %arg2[%c0_3, %c0_4] : memref<64x32xbf16, #tpu.memory_space<vmem>>, vector<64x32xbf16>
    %c0_5 = arith.constant 0 : index
    %c0_6 = arith.constant 0 : index
    %4 = vector.load %arg4[%c0_5, %c0_6] : memref<32x192xf32, #tpu.memory_space<vmem>>, vector<32x192xf32>
    %cst_7 = arith.constant dense<0.000000e+00> : vector<64x192xf32>
    %5 = tpu.matmul %3, %4, %cst_7 {dimension_numbers = #tpu.dot_dimension_numbers<[1], [0], [0], [1], [0, 0, 1, 1], [], []>} : vector<64x32xbf16>, vector<32x192xf32>, vector<64x192xf32> -> vector<64x192xf32>
    %6 = arith.addf %2, %5 : vector<64x192xf32>
    %c0_8 = arith.constant 0 : index
    %c0_9 = arith.constant 0 : index
    %7 = vector.load %arg5[%c0_8, %c0_9] : memref<1x192xf32, #tpu.memory_space<vmem>>, vector<1x192xf32>
    %8 = vector.broadcast %7 : vector<1x192xf32> to vector<64x192xf32>
    %9 = arith.addf %6, %8 : vector<64x192xf32>
    %10 = vector.extract_strided_slice %9 {offsets = [0, 0], sizes = [64, 96], strides = [1, 1]} : vector<64x192xf32> to vector<64x96xf32>
    %11 = arith.truncf %10 : vector<64x96xf32> to vector<64x96xbf16>
    %c0_10 = arith.constant 0 : index
    %c0_11 = arith.constant 0 : index
    %12 = vector.load %arg6[%c0_10, %c0_11] : memref<64x96xbf16, #tpu.memory_space<vmem>>, vector<64x96xbf16>
    tpu.vector_store %arg6[%c0_10, %c0_11], %11 {strides = array<i32>} : memref<64x96xbf16, #tpu.memory_space<vmem>>, vector<64x96xbf16>,
    %13 = vector.extract_strided_slice %9 {offsets = [0, 96], sizes = [64, 96], strides = [1, 1]} : vector<64x192xf32> to vector<64x96xf32>
    %14 = arith.truncf %13 : vector<64x96xf32> to vector<64x96xbf16>
    %c0_12 = arith.constant 0 : index
    %c0_13 = arith.constant 0 : index
    %15 = vector.load %arg7[%c0_12, %c0_13] : memref<64x96xbf16, #tpu.memory_space<vmem>>, vector<64x96xbf16>
    tpu.vector_store %arg7[%c0_12, %c0_13], %14 {strides = array<i32>} : memref<64x96xbf16, #tpu.memory_space<vmem>>, vector<64x96xbf16>,
    return
  }
  func.func @transform_0(%arg0: i32) -> (i32, i32) {
    %c0_i32 = arith.constant 0 : i32
    %c0_i32_0 = arith.constant 0 : i32
    return %arg0, %c0_i32 : i32, i32
  }
  func.func @transform_1(%arg0: i32) -> (i32, i32) {
    %c0_i32 = arith.constant 0 : i32
    %c0_i32_0 = arith.constant 0 : i32
    return %arg0, %c0_i32 : i32, i32
  }
  func.func @transform_2(%arg0: i32) -> (i32, i32) {
    %c0_i32 = arith.constant 0 : i32
    %c0_i32_0 = arith.constant 0 : i32
    %c0_i32_1 = arith.constant 0 : i32
    return %c0_i32, %c0_i32_0 : i32, i32
  }
  func.func @transform_3(%arg0: i32) -> (i32, i32) {
    %c0_i32 = arith.constant 0 : i32
    %c0_i32_0 = arith.constant 0 : i32
    %c0_i32_1 = arith.constant 0 : i32
    return %c0_i32, %c0_i32_0 : i32, i32
  }
  func.func @transform_4(%arg0: i32) -> (i32, i32) {
    %c0_i32 = arith.constant 0 : i32
    %c0_i32_0 = arith.constant 0 : i32
    %c0_i32_1 = arith.constant 0 : i32
    return %c0_i32, %c0_i32_0 : i32, i32
  }
  func.func @transform_5(%arg0: i32) -> (i32, i32) {
    %c0_i32 = arith.constant 0 : i32
    %c0_i32_0 = arith.constant 0 : i32
    return %arg0, %c0_i32 : i32, i32
  }
  func.func @transform_6(%arg0: i32) -> (i32, i32) {
    %c0_i32 = arith.constant 0 : i32
    %c0_i32_0 = arith.constant 0 : i32
    return %arg0, %c0_i32 : i32, i32
  }
}

module attributes {stable_mosaic.version = 11 : i64} {
  func.func @_avg_kernel(%arg0: i32, %arg1: memref<8x8x32xbf16, #tpu.memory_space<vmem>>, %arg2: memref<8x8x32xbf16, #tpu.memory_space<vmem>>, %arg3: memref<8x8x32xf32, #tpu.memory_space<vmem>>) attributes {dimension_semantics = [#tpu.dimension_semantics<parallel>], iteration_bounds = array<i64: 1>, scalar_prefetch = 0 : i64, scratch_operands = 0 : i64, tpu.core_type = #tpu.core_type<tc>, window_params = [{transform_indices = @transform_0, window_bounds = array<i64: 8, 8, 32>}, {transform_indices = @transform_1, window_bounds = array<i64: 8, 8, 32>}, {transform_indices = @transform_2, window_bounds = array<i64: 8, 8, 32>}]} {
    %c0 = arith.constant 0 : index
    %c0_0 = arith.constant 0 : index
    %c0_1 = arith.constant 0 : index
    %0 = vector.load %arg1[%c0, %c0_0, %c0_1] : memref<8x8x32xbf16, #tpu.memory_space<vmem>>, vector<8x8x32xbf16>
    %1 = arith.extf %0 : vector<8x8x32xbf16> to vector<8x8x32xf32>
    %c0_2 = arith.constant 0 : index
    %c0_3 = arith.constant 0 : index
    %c0_4 = arith.constant 0 : index
    %2 = vector.load %arg2[%c0_2, %c0_3, %c0_4] : memref<8x8x32xbf16, #tpu.memory_space<vmem>>, vector<8x8x32xbf16>
    %3 = arith.extf %2 : vector<8x8x32xbf16> to vector<8x8x32xf32>
    %4 = arith.addf %1, %3 : vector<8x8x32xf32>
    %cst = arith.constant 5.000000e-01 : f32
    %5 = vector.broadcast %cst : f32 to vector<8x8x32xf32>
    %6 = arith.mulf %4, %5 : vector<8x8x32xf32>
    %c0_5 = arith.constant 0 : index
    %c0_6 = arith.constant 0 : index
    %c0_7 = arith.constant 0 : index
    %7 = vector.load %arg3[%c0_5, %c0_6, %c0_7] : memref<8x8x32xf32, #tpu.memory_space<vmem>>, vector<8x8x32xf32>
    tpu.vector_store %arg3[%c0_5, %c0_6, %c0_7], %6 {strides = array<i32>} : memref<8x8x32xf32, #tpu.memory_space<vmem>>, vector<8x8x32xf32>,
    return
  }
  func.func @transform_0(%arg0: i32) -> (i32, i32, i32) {
    %c0_i32 = arith.constant 0 : i32
    %c0_i32_0 = arith.constant 0 : i32
    %c0_i32_1 = arith.constant 0 : i32
    return %arg0, %c0_i32, %c0_i32_0 : i32, i32, i32
  }
  func.func @transform_1(%arg0: i32) -> (i32, i32, i32) {
    %c0_i32 = arith.constant 0 : i32
    %c0_i32_0 = arith.constant 0 : i32
    %c0_i32_1 = arith.constant 0 : i32
    return %arg0, %c0_i32, %c0_i32_0 : i32, i32, i32
  }
  func.func @transform_2(%arg0: i32) -> (i32, i32, i32) {
    %c0_i32 = arith.constant 0 : i32
    %c0_i32_0 = arith.constant 0 : i32
    %c0_i32_1 = arith.constant 0 : i32
    return %arg0, %c0_i32, %c0_i32_0 : i32, i32, i32
  }
}

module attributes {stable_mosaic.version = 11 : i64} {
  func.func @_bigru_chunk_kernel(%arg0: i32, %arg1: i32, %arg2: memref<8x8x96xbf16, #tpu.memory_space<vmem>>, %arg3: memref<8x8x96xbf16, #tpu.memory_space<vmem>>, %arg4: memref<8x1xi32, #tpu.memory_space<vmem>>, %arg5: memref<64x192xf32, #tpu.memory_space<vmem>>, %arg6: memref<1x192xf32, #tpu.memory_space<vmem>>, %arg7: memref<8x8x32xbf16, #tpu.memory_space<vmem>>, %arg8: memref<8x8x32xbf16, #tpu.memory_space<vmem>>, %arg9: memref<8x64xf32, #tpu.memory_space<vmem>>) attributes {dimension_semantics = [#tpu.dimension_semantics<parallel>, #tpu.dimension_semantics<arbitrary>], iteration_bounds = array<i64: 1, 1>, scalar_prefetch = 0 : i64, scratch_operands = 1 : i64, tpu.core_type = #tpu.core_type<tc>, window_params = [{transform_indices = @transform_0, window_bounds = array<i64: 8, 8, 96>}, {transform_indices = @transform_1, window_bounds = array<i64: 8, 8, 96>}, {transform_indices = @transform_2, window_bounds = array<i64: 8, 1>}, {pipeline_mode = #tpu.pipeline_mode<synchronous>, transform_indices = @transform_3, window_bounds = array<i64: 64, 192>}, {pipeline_mode = #tpu.pipeline_mode<synchronous>, transform_indices = @transform_4, window_bounds = array<i64: 1, 192>}, {transform_indices = @transform_5, window_bounds = array<i64: 8, 8, 32>}, {transform_indices = @transform_6, window_bounds = array<i64: 8, 8, 32>}]} {
    %c8_i32 = arith.constant 8 : i32
    %0 = arith.muli %arg1, %c8_i32 : i32
    %c0_i32 = arith.constant 0 : i32
    %1 = arith.cmpi eq, %arg1, %c0_i32 : i32
    %2 = arith.extui %1 : i1 to i32
    %c0_i32_0 = arith.constant 0 : i32
    %3 = arith.cmpi ne, %2, %c0_i32_0 : i32
    scf.if %3 {
      %cst_222 = arith.constant 0.000000e+00 : f32
      %775 = vector.broadcast %cst_222 : f32 to vector<8x64xf32>
      %c0_223 = arith.constant 0 : index
      %c0_224 = arith.constant 0 : index
      %776 = vector.load %arg9[%c0_223, %c0_224] : memref<8x64xf32, #tpu.memory_space<vmem>>, vector<8x64xf32>
      tpu.vector_store %arg9[%c0_223, %c0_224], %775 {strides = array<i32>} : memref<8x64xf32, #tpu.memory_space<vmem>>, vector<8x64xf32>,
    } else {
    }
    %c0 = arith.constant 0 : index
    %c0_1 = arith.constant 0 : index
    %4 = vector.load %arg4[%c0, %c0_1] : memref<8x1xi32, #tpu.memory_space<vmem>>, vector<8x1xi32>
    %c0_2 = arith.constant 0 : index
    %c0_3 = arith.constant 0 : index
    %5 = vector.load %arg5[%c0_2, %c0_3] : memref<64x192xf32, #tpu.memory_space<vmem>>, vector<64x192xf32>
    %c0_4 = arith.constant 0 : index
    %c0_5 = arith.constant 0 : index
    %6 = vector.load %arg6[%c0_4, %c0_5] : memref<1x192xf32, #tpu.memory_space<vmem>>, vector<1x192xf32>
    %c0_i32_6 = arith.constant 0 : i32
    %7 = arith.addi %0, %c0_i32_6 : i32
    %c7_i32 = arith.constant 7 : i32
    %8 = arith.subi %c7_i32, %7 : i32
    %c0_7 = arith.constant 0 : index
    %c0_8 = arith.constant 0 : index
    %9 = vector.load %arg9[%c0_7, %c0_8] : memref<8x64xf32, #tpu.memory_space<vmem>>, vector<8x64xf32>
    %cst = arith.constant dense<0.000000e+00> : vector<8x192xf32>
    %10 = tpu.matmul %9, %5, %cst {dimension_numbers = #tpu.dot_dimension_numbers<[1], [0], [0], [1], [0, 0, 1, 1], [], []>} : vector<8x64xf32>, vector<64x192xf32>, vector<8x192xf32> -> vector<8x192xf32>
    %11 = vector.broadcast %6 : vector<1x192xf32> to vector<8x192xf32>
    %12 = arith.addf %10, %11 : vector<8x192xf32>
    %c0_9 = arith.constant 0 : index
    %c0_10 = arith.constant 0 : index
    %c0_11 = arith.constant 0 : index
    %13 = vector.load %arg2[%c0_9, %c0_10, %c0_11] : memref<8x8x96xbf16, #tpu.memory_space<vmem>>, vector<1x8x96xbf16>
    %14 = vector.shape_cast %13 : vector<1x8x96xbf16> to vector<8x96xbf16>
    %15 = arith.extf %14 : vector<8x96xbf16> to vector<8x96xf32>
    %c7 = arith.constant 7 : index
    %c0_12 = arith.constant 0 : index
    %c0_13 = arith.constant 0 : index
    %16 = vector.load %arg3[%c7, %c0_12, %c0_13] : memref<8x8x96xbf16, #tpu.memory_space<vmem>>, vector<1x8x96xbf16>
    %17 = vector.shape_cast %16 : vector<1x8x96xbf16> to vector<8x96xbf16>
    %18 = arith.extf %17 : vector<8x96xbf16> to vector<8x96xf32>
    %19 = vector.extract_strided_slice %12 {offsets = [0, 0], sizes = [8, 96], strides = [1, 1]} : vector<8x192xf32> to vector<8x96xf32>
    %20 = vector.extract_strided_slice %9 {offsets = [0, 0], sizes = [8, 32], strides = [1, 1]} : vector<8x64xf32> to vector<8x32xf32>
    %21 = vector.extract_strided_slice %15 {offsets = [0, 0], sizes = [8, 32], strides = [1, 1]} : vector<8x96xf32> to vector<8x32xf32>
    %22 = vector.extract_strided_slice %19 {offsets = [0, 0], sizes = [8, 32], strides = [1, 1]} : vector<8x96xf32> to vector<8x32xf32>
    %23 = arith.addf %21, %22 : vector<8x32xf32>
    %24 = arith.negf %23 : vector<8x32xf32>
    %25 = math.exp %24 : vector<8x32xf32>
    %cst_14 = arith.constant 1.000000e+00 : f32
    %26 = vector.broadcast %cst_14 : f32 to vector<8x32xf32>
    %27 = arith.addf %26, %25 : vector<8x32xf32>
    %28 = arith.divf %26, %27 : vector<8x32xf32>
    %29 = vector.extract_strided_slice %15 {offsets = [0, 32], sizes = [8, 32], strides = [1, 1]} : vector<8x96xf32> to vector<8x32xf32>
    %30 = vector.extract_strided_slice %19 {offsets = [0, 32], sizes = [8, 32], strides = [1, 1]} : vector<8x96xf32> to vector<8x32xf32>
    %31 = arith.addf %29, %30 : vector<8x32xf32>
    %32 = arith.negf %31 : vector<8x32xf32>
    %33 = math.exp %32 : vector<8x32xf32>
    %cst_15 = arith.constant 1.000000e+00 : f32
    %34 = vector.broadcast %cst_15 : f32 to vector<8x32xf32>
    %35 = arith.addf %34, %33 : vector<8x32xf32>
    %36 = arith.divf %34, %35 : vector<8x32xf32>
    %37 = vector.extract_strided_slice %15 {offsets = [0, 64], sizes = [8, 32], strides = [1, 1]} : vector<8x96xf32> to vector<8x32xf32>
    %38 = vector.extract_strided_slice %19 {offsets = [0, 64], sizes = [8, 32], strides = [1, 1]} : vector<8x96xf32> to vector<8x32xf32>
    %39 = arith.mulf %28, %38 : vector<8x32xf32>
    %40 = arith.addf %37, %39 : vector<8x32xf32>
    %41 = math.tanh %40 : vector<8x32xf32>
    %cst_16 = arith.constant 1.000000e+00 : f32
    %42 = vector.broadcast %cst_16 : f32 to vector<8x32xf32>
    %43 = arith.subf %42, %36 : vector<8x32xf32>
    %44 = arith.mulf %43, %41 : vector<8x32xf32>
    %45 = arith.mulf %36, %20 : vector<8x32xf32>
    %46 = arith.addf %44, %45 : vector<8x32xf32>
    %47 = vector.broadcast %7 : i32 to vector<8x1xi32>
    %48 = arith.cmpi slt, %47, %4 : vector<8x1xi32>
    %49 = vector.shape_cast %48 : vector<8x1xi1> to vector<8x1xi1>
    %50 = vector.broadcast %49 : vector<8x1xi1> to vector<8x32xi1>
    %51 = arith.select %50, %46, %20 : vector<8x32xi1>, vector<8x32xf32>
    %cst_17 = arith.constant 0.000000e+00 : f32
    %52 = vector.shape_cast %48 : vector<8x1xi1> to vector<8x1xi1>
    %53 = vector.broadcast %52 : vector<8x1xi1> to vector<8x32xi1>
    %54 = vector.broadcast %cst_17 : f32 to vector<8x32xf32>
    %55 = arith.select %53, %51, %54 : vector<8x32xi1>, vector<8x32xf32>
    %56 = vector.extract_strided_slice %12 {offsets = [0, 96], sizes = [8, 96], strides = [1, 1]} : vector<8x192xf32> to vector<8x96xf32>
    %57 = vector.extract_strided_slice %9 {offsets = [0, 32], sizes = [8, 32], strides = [1, 1]} : vector<8x64xf32> to vector<8x32xf32>
    %58 = vector.extract_strided_slice %18 {offsets = [0, 0], sizes = [8, 32], strides = [1, 1]} : vector<8x96xf32> to vector<8x32xf32>
    %59 = vector.extract_strided_slice %56 {offsets = [0, 0], sizes = [8, 32], strides = [1, 1]} : vector<8x96xf32> to vector<8x32xf32>
    %60 = arith.addf %58, %59 : vector<8x32xf32>
    %61 = arith.negf %60 : vector<8x32xf32>
    %62 = math.exp %61 : vector<8x32xf32>
    %cst_18 = arith.constant 1.000000e+00 : f32
    %63 = vector.broadcast %cst_18 : f32 to vector<8x32xf32>
    %64 = arith.addf %63, %62 : vector<8x32xf32>
    %65 = arith.divf %63, %64 : vector<8x32xf32>
    %66 = vector.extract_strided_slice %18 {offsets = [0, 32], sizes = [8, 32], strides = [1, 1]} : vector<8x96xf32> to vector<8x32xf32>
    %67 = vector.extract_strided_slice %56 {offsets = [0, 32], sizes = [8, 32], strides = [1, 1]} : vector<8x96xf32> to vector<8x32xf32>
    %68 = arith.addf %66, %67 : vector<8x32xf32>
    %69 = arith.negf %68 : vector<8x32xf32>
    %70 = math.exp %69 : vector<8x32xf32>
    %cst_19 = arith.constant 1.000000e+00 : f32
    %71 = vector.broadcast %cst_19 : f32 to vector<8x32xf32>
    %72 = arith.addf %71, %70 : vector<8x32xf32>
    %73 = arith.divf %71, %72 : vector<8x32xf32>
    %74 = vector.extract_strided_slice %18 {offsets = [0, 64], sizes = [8, 32], strides = [1, 1]} : vector<8x96xf32> to vector<8x32xf32>
    %75 = vector.extract_strided_slice %56 {offsets = [0, 64], sizes = [8, 32], strides = [1, 1]} : vector<8x96xf32> to vector<8x32xf32>
    %76 = arith.mulf %65, %75 : vector<8x32xf32>
    %77 = arith.addf %74, %76 : vector<8x32xf32>
    %78 = math.tanh %77 : vector<8x32xf32>
    %cst_20 = arith.constant 1.000000e+00 : f32
    %79 = vector.broadcast %cst_20 : f32 to vector<8x32xf32>
    %80 = arith.subf %79, %73 : vector<8x32xf32>
    %81 = arith.mulf %80, %78 : vector<8x32xf32>
    %82 = arith.mulf %73, %57 : vector<8x32xf32>
    %83 = arith.addf %81, %82 : vector<8x32xf32>
    %84 = vector.broadcast %8 : i32 to vector<8x1xi32>
    %85 = arith.cmpi slt, %84, %4 : vector<8x1xi32>
    %86 = vector.shape_cast %85 : vector<8x1xi1> to vector<8x1xi1>
    %87 = vector.broadcast %86 : vector<8x1xi1> to vector<8x32xi1>
    %88 = arith.select %87, %83, %57 : vector<8x32xi1>, vector<8x32xf32>
    %cst_21 = arith.constant 0.000000e+00 : f32
    %89 = vector.shape_cast %85 : vector<8x1xi1> to vector<8x1xi1>
    %90 = vector.broadcast %89 : vector<8x1xi1> to vector<8x32xi1>
    %91 = vector.broadcast %cst_21 : f32 to vector<8x32xf32>
    %92 = arith.select %90, %88, %91 : vector<8x32xi1>, vector<8x32xf32>
    %c0_22 = arith.constant 0 : index
    %c0_23 = arith.constant 0 : index
    %93 = vector.load %arg9[%c0_22, %c0_23] : memref<8x64xf32, #tpu.memory_space<vmem>>, vector<8x32xf32>
    tpu.vector_store %arg9[%c0_22, %c0_23], %51 {strides = array<i32>} : memref<8x64xf32, #tpu.memory_space<vmem>>, vector<8x32xf32>,
    %c0_24 = arith.constant 0 : index
    %c32 = arith.constant 32 : index
    %94 = vector.load %arg9[%c0_24, %c32] : memref<8x64xf32, #tpu.memory_space<vmem>>, vector<8x32xf32>
    tpu.vector_store %arg9[%c0_24, %c32], %88 {strides = array<i32>} : memref<8x64xf32, #tpu.memory_space<vmem>>, vector<8x32xf32>,
    %95 = arith.truncf %55 : vector<8x32xf32> to vector<8x32xbf16>
    %c0_25 = arith.constant 0 : index
    %c0_26 = arith.constant 0 : index
    %c0_27 = arith.constant 0 : index
    %96 = vector.load %arg7[%c0_25, %c0_26, %c0_27] : memref<8x8x32xbf16, #tpu.memory_space<vmem>>, vector<1x8x32xbf16>
    %97 = vector.shape_cast %96 : vector<1x8x32xbf16> to vector<8x32xbf16>
    %98 = vector.shape_cast %95 : vector<8x32xbf16> to vector<1x8x32xbf16>
    tpu.vector_store %arg7[%c0_25, %c0_26, %c0_27], %98 {strides = array<i32>} : memref<8x8x32xbf16, #tpu.memory_space<vmem>>, vector<1x8x32xbf16>,
    %99 = arith.truncf %92 : vector<8x32xf32> to vector<8x32xbf16>
    %c7_28 = arith.constant 7 : index
    %c0_29 = arith.constant 0 : index
    %c0_30 = arith.constant 0 : index
    %100 = vector.load %arg8[%c7_28, %c0_29, %c0_30] : memref<8x8x32xbf16, #tpu.memory_space<vmem>>, vector<1x8x32xbf16>
    %101 = vector.shape_cast %100 : vector<1x8x32xbf16> to vector<8x32xbf16>
    %102 = vector.shape_cast %99 : vector<8x32xbf16> to vector<1x8x32xbf16>
    tpu.vector_store %arg8[%c7_28, %c0_29, %c0_30], %102 {strides = array<i32>} : memref<8x8x32xbf16, #tpu.memory_space<vmem>>, vector<1x8x32xbf16>,
    %c1_i32 = arith.constant 1 : i32
    %103 = arith.addi %0, %c1_i32 : i32
    %c7_i32_31 = arith.constant 7 : i32
    %104 = arith.subi %c7_i32_31, %103 : i32
    %c0_32 = arith.constant 0 : index
    %c0_33 = arith.constant 0 : index
    %105 = vector.load %arg9[%c0_32, %c0_33] : memref<8x64xf32, #tpu.memory_space<vmem>>, vector<8x64xf32>
    %cst_34 = arith.constant dense<0.000000e+00> : vector<8x192xf32>
    %106 = tpu.matmul %105, %5, %cst_34 {dimension_numbers = #tpu.dot_dimension_numbers<[1], [0], [0], [1], [0, 0, 1, 1], [], []>} : vector<8x64xf32>, vector<64x192xf32>, vector<8x192xf32> -> vector<8x192xf32>
    %107 = vector.broadcast %6 : vector<1x192xf32> to vector<8x192xf32>
    %108 = arith.addf %106, %107 : vector<8x192xf32>
    %c1 = arith.constant 1 : index
    %c0_35 = arith.constant 0 : index
    %c0_36 = arith.constant 0 : index
    %109 = vector.load %arg2[%c1, %c0_35, %c0_36] : memref<8x8x96xbf16, #tpu.memory_space<vmem>>, vector<1x8x96xbf16>
    %110 = vector.shape_cast %109 : vector<1x8x96xbf16> to vector<8x96xbf16>
    %111 = arith.extf %110 : vector<8x96xbf16> to vector<8x96xf32>
    %c6 = arith.constant 6 : index
    %c0_37 = arith.constant 0 : index
    %c0_38 = arith.constant 0 : index
    %112 = vector.load %arg3[%c6, %c0_37, %c0_38] : memref<8x8x96xbf16, #tpu.memory_space<vmem>>, vector<1x8x96xbf16>
    %113 = vector.shape_cast %112 : vector<1x8x96xbf16> to vector<8x96xbf16>
    %114 = arith.extf %113 : vector<8x96xbf16> to vector<8x96xf32>
    %115 = vector.extract_strided_slice %108 {offsets = [0, 0], sizes = [8, 96], strides = [1, 1]} : vector<8x192xf32> to vector<8x96xf32>
    %116 = vector.extract_strided_slice %105 {offsets = [0, 0], sizes = [8, 32], strides = [1, 1]} : vector<8x64xf32> to vector<8x32xf32>
    %117 = vector.extract_strided_slice %111 {offsets = [0, 0], sizes = [8, 32], strides = [1, 1]} : vector<8x96xf32> to vector<8x32xf32>
    %118 = vector.extract_strided_slice %115 {offsets = [0, 0], sizes = [8, 32], strides = [1, 1]} : vector<8x96xf32> to vector<8x32xf32>
    %119 = arith.addf %117, %118 : vector<8x32xf32>
    %120 = arith.negf %119 : vector<8x32xf32>
    %121 = math.exp %120 : vector<8x32xf32>
    %cst_39 = arith.constant 1.000000e+00 : f32
    %122 = vector.broadcast %cst_39 : f32 to vector<8x32xf32>
    %123 = arith.addf %122, %121 : vector<8x32xf32>
    %124 = arith.divf %122, %123 : vector<8x32xf32>
    %125 = vector.extract_strided_slice %111 {offsets = [0, 32], sizes = [8, 32], strides = [1, 1]} : vector<8x96xf32> to vector<8x32xf32>
    %126 = vector.extract_strided_slice %115 {offsets = [0, 32], sizes = [8, 32], strides = [1, 1]} : vector<8x96xf32> to vector<8x32xf32>
    %127 = arith.addf %125, %126 : vector<8x32xf32>
    %128 = arith.negf %127 : vector<8x32xf32>
    %129 = math.exp %128 : vector<8x32xf32>
    %cst_40 = arith.constant 1.000000e+00 : f32
    %130 = vector.broadcast %cst_40 : f32 to vector<8x32xf32>
    %131 = arith.addf %130, %129 : vector<8x32xf32>
    %132 = arith.divf %130, %131 : vector<8x32xf32>
    %133 = vector.extract_strided_slice %111 {offsets = [0, 64], sizes = [8, 32], strides = [1, 1]} : vector<8x96xf32> to vector<8x32xf32>
    %134 = vector.extract_strided_slice %115 {offsets = [0, 64], sizes = [8, 32], strides = [1, 1]} : vector<8x96xf32> to vector<8x32xf32>
    %135 = arith.mulf %124, %134 : vector<8x32xf32>
    %136 = arith.addf %133, %135 : vector<8x32xf32>
    %137 = math.tanh %136 : vector<8x32xf32>
    %cst_41 = arith.constant 1.000000e+00 : f32
    %138 = vector.broadcast %cst_41 : f32 to vector<8x32xf32>
    %139 = arith.subf %138, %132 : vector<8x32xf32>
    %140 = arith.mulf %139, %137 : vector<8x32xf32>
    %141 = arith.mulf %132, %116 : vector<8x32xf32>
    %142 = arith.addf %140, %141 : vector<8x32xf32>
    %143 = vector.broadcast %103 : i32 to vector<8x1xi32>
    %144 = arith.cmpi slt, %143, %4 : vector<8x1xi32>
    %145 = vector.shape_cast %144 : vector<8x1xi1> to vector<8x1xi1>
    %146 = vector.broadcast %145 : vector<8x1xi1> to vector<8x32xi1>
    %147 = arith.select %146, %142, %116 : vector<8x32xi1>, vector<8x32xf32>
    %cst_42 = arith.constant 0.000000e+00 : f32
    %148 = vector.shape_cast %144 : vector<8x1xi1> to vector<8x1xi1>
    %149 = vector.broadcast %148 : vector<8x1xi1> to vector<8x32xi1>
    %150 = vector.broadcast %cst_42 : f32 to vector<8x32xf32>
    %151 = arith.select %149, %147, %150 : vector<8x32xi1>, vector<8x32xf32>
    %152 = vector.extract_strided_slice %108 {offsets = [0, 96], sizes = [8, 96], strides = [1, 1]} : vector<8x192xf32> to vector<8x96xf32>
    %153 = vector.extract_strided_slice %105 {offsets = [0, 32], sizes = [8, 32], strides = [1, 1]} : vector<8x64xf32> to vector<8x32xf32>
    %154 = vector.extract_strided_slice %114 {offsets = [0, 0], sizes = [8, 32], strides = [1, 1]} : vector<8x96xf32> to vector<8x32xf32>
    %155 = vector.extract_strided_slice %152 {offsets = [0, 0], sizes = [8, 32], strides = [1, 1]} : vector<8x96xf32> to vector<8x32xf32>
    %156 = arith.addf %154, %155 : vector<8x32xf32>
    %157 = arith.negf %156 : vector<8x32xf32>
    %158 = math.exp %157 : vector<8x32xf32>
    %cst_43 = arith.constant 1.000000e+00 : f32
    %159 = vector.broadcast %cst_43 : f32 to vector<8x32xf32>
    %160 = arith.addf %159, %158 : vector<8x32xf32>
    %161 = arith.divf %159, %160 : vector<8x32xf32>
    %162 = vector.extract_strided_slice %114 {offsets = [0, 32], sizes = [8, 32], strides = [1, 1]} : vector<8x96xf32> to vector<8x32xf32>
    %163 = vector.extract_strided_slice %152 {offsets = [0, 32], sizes = [8, 32], strides = [1, 1]} : vector<8x96xf32> to vector<8x32xf32>
    %164 = arith.addf %162, %163 : vector<8x32xf32>
    %165 = arith.negf %164 : vector<8x32xf32>
    %166 = math.exp %165 : vector<8x32xf32>
    %cst_44 = arith.constant 1.000000e+00 : f32
    %167 = vector.broadcast %cst_44 : f32 to vector<8x32xf32>
    %168 = arith.addf %167, %166 : vector<8x32xf32>
    %169 = arith.divf %167, %168 : vector<8x32xf32>
    %170 = vector.extract_strided_slice %114 {offsets = [0, 64], sizes = [8, 32], strides = [1, 1]} : vector<8x96xf32> to vector<8x32xf32>
    %171 = vector.extract_strided_slice %152 {offsets = [0, 64], sizes = [8, 32], strides = [1, 1]} : vector<8x96xf32> to vector<8x32xf32>
    %172 = arith.mulf %161, %171 : vector<8x32xf32>
    %173 = arith.addf %170, %172 : vector<8x32xf32>
    %174 = math.tanh %173 : vector<8x32xf32>
    %cst_45 = arith.constant 1.000000e+00 : f32
    %175 = vector.broadcast %cst_45 : f32 to vector<8x32xf32>
    %176 = arith.subf %175, %169 : vector<8x32xf32>
    %177 = arith.mulf %176, %174 : vector<8x32xf32>
    %178 = arith.mulf %169, %153 : vector<8x32xf32>
    %179 = arith.addf %177, %178 : vector<8x32xf32>
    %180 = vector.broadcast %104 : i32 to vector<8x1xi32>
    %181 = arith.cmpi slt, %180, %4 : vector<8x1xi32>
    %182 = vector.shape_cast %181 : vector<8x1xi1> to vector<8x1xi1>
    %183 = vector.broadcast %182 : vector<8x1xi1> to vector<8x32xi1>
    %184 = arith.select %183, %179, %153 : vector<8x32xi1>, vector<8x32xf32>
    %cst_46 = arith.constant 0.000000e+00 : f32
    %185 = vector.shape_cast %181 : vector<8x1xi1> to vector<8x1xi1>
    %186 = vector.broadcast %185 : vector<8x1xi1> to vector<8x32xi1>
    %187 = vector.broadcast %cst_46 : f32 to vector<8x32xf32>
    %188 = arith.select %186, %184, %187 : vector<8x32xi1>, vector<8x32xf32>
    %c0_47 = arith.constant 0 : index
    %c0_48 = arith.constant 0 : index
    %189 = vector.load %arg9[%c0_47, %c0_48] : memref<8x64xf32, #tpu.memory_space<vmem>>, vector<8x32xf32>
    tpu.vector_store %arg9[%c0_47, %c0_48], %147 {strides = array<i32>} : memref<8x64xf32, #tpu.memory_space<vmem>>, vector<8x32xf32>,
    %c0_49 = arith.constant 0 : index
    %c32_50 = arith.constant 32 : index
    %190 = vector.load %arg9[%c0_49, %c32_50] : memref<8x64xf32, #tpu.memory_space<vmem>>, vector<8x32xf32>
    tpu.vector_store %arg9[%c0_49, %c32_50], %184 {strides = array<i32>} : memref<8x64xf32, #tpu.memory_space<vmem>>, vector<8x32xf32>,
    %191 = arith.truncf %151 : vector<8x32xf32> to vector<8x32xbf16>
    %c1_51 = arith.constant 1 : index
    %c0_52 = arith.constant 0 : index
    %c0_53 = arith.constant 0 : index
    %192 = vector.load %arg7[%c1_51, %c0_52, %c0_53] : memref<8x8x32xbf16, #tpu.memory_space<vmem>>, vector<1x8x32xbf16>
    %193 = vector.shape_cast %192 : vector<1x8x32xbf16> to vector<8x32xbf16>
    %194 = vector.shape_cast %191 : vector<8x32xbf16> to vector<1x8x32xbf16>
    tpu.vector_store %arg7[%c1_51, %c0_52, %c0_53], %194 {strides = array<i32>} : memref<8x8x32xbf16, #tpu.memory_space<vmem>>, vector<1x8x32xbf16>,
    %195 = arith.truncf %188 : vector<8x32xf32> to vector<8x32xbf16>
    %c6_54 = arith.constant 6 : index
    %c0_55 = arith.constant 0 : index
    %c0_56 = arith.constant 0 : index
    %196 = vector.load %arg8[%c6_54, %c0_55, %c0_56] : memref<8x8x32xbf16, #tpu.memory_space<vmem>>, vector<1x8x32xbf16>
    %197 = vector.shape_cast %196 : vector<1x8x32xbf16> to vector<8x32xbf16>
    %198 = vector.shape_cast %195 : vector<8x32xbf16> to vector<1x8x32xbf16>
    tpu.vector_store %arg8[%c6_54, %c0_55, %c0_56], %198 {strides = array<i32>} : memref<8x8x32xbf16, #tpu.memory_space<vmem>>, vector<1x8x32xbf16>,
    %c2_i32 = arith.constant 2 : i32
    %199 = arith.addi %0, %c2_i32 : i32
    %c7_i32_57 = arith.constant 7 : i32
    %200 = arith.subi %c7_i32_57, %199 : i32
    %c0_58 = arith.constant 0 : index
    %c0_59 = arith.constant 0 : index
    %201 = vector.load %arg9[%c0_58, %c0_59] : memref<8x64xf32, #tpu.memory_space<vmem>>, vector<8x64xf32>
    %cst_60 = arith.constant dense<0.000000e+00> : vector<8x192xf32>
    %202 = tpu.matmul %201, %5, %cst_60 {dimension_numbers = #tpu.dot_dimension_numbers<[1], [0], [0], [1], [0, 0, 1, 1], [], []>} : vector<8x64xf32>, vector<64x192xf32>, vector<8x192xf32> -> vector<8x192xf32>
    %203 = vector.broadcast %6 : vector<1x192xf32> to vector<8x192xf32>
    %204 = arith.addf %202, %203 : vector<8x192xf32>
    %c2 = arith.constant 2 : index
    %c0_61 = arith.constant 0 : index
    %c0_62 = arith.constant 0 : index
    %205 = vector.load %arg2[%c2, %c0_61, %c0_62] : memref<8x8x96xbf16, #tpu.memory_space<vmem>>, vector<1x8x96xbf16>
    %206 = vector.shape_cast %205 : vector<1x8x96xbf16> to vector<8x96xbf16>
    %207 = arith.extf %206 : vector<8x96xbf16> to vector<8x96xf32>
    %c5 = arith.constant 5 : index
    %c0_63 = arith.constant 0 : index
    %c0_64 = arith.constant 0 : index
    %208 = vector.load %arg3[%c5, %c0_63, %c0_64] : memref<8x8x96xbf16, #tpu.memory_space<vmem>>, vector<1x8x96xbf16>
    %209 = vector.shape_cast %208 : vector<1x8x96xbf16> to vector<8x96xbf16>
    %210 = arith.extf %209 : vector<8x96xbf16> to vector<8x96xf32>
    %211 = vector.extract_strided_slice %204 {offsets = [0, 0], sizes = [8, 96], strides = [1, 1]} : vector<8x192xf32> to vector<8x96xf32>
    %212 = vector.extract_strided_slice %201 {offsets = [0, 0], sizes = [8, 32], strides = [1, 1]} : vector<8x64xf32> to vector<8x32xf32>
    %213 = vector.extract_strided_slice %207 {offsets = [0, 0], sizes = [8, 32], strides = [1, 1]} : vector<8x96xf32> to vector<8x32xf32>
    %214 = vector.extract_strided_slice %211 {offsets = [0, 0], sizes = [8, 32], strides = [1, 1]} : vector<8x96xf32> to vector<8x32xf32>
    %215 = arith.addf %213, %214 : vector<8x32xf32>
    %216 = arith.negf %215 : vector<8x32xf32>
    %217 = math.exp %216 : vector<8x32xf32>
    %cst_65 = arith.constant 1.000000e+00 : f32
    %218 = vector.broadcast %cst_65 : f32 to vector<8x32xf32>
    %219 = arith.addf %218, %217 : vector<8x32xf32>
    %220 = arith.divf %218, %219 : vector<8x32xf32>
    %221 = vector.extract_strided_slice %207 {offsets = [0, 32], sizes = [8, 32], strides = [1, 1]} : vector<8x96xf32> to vector<8x32xf32>
    %222 = vector.extract_strided_slice %211 {offsets = [0, 32], sizes = [8, 32], strides = [1, 1]} : vector<8x96xf32> to vector<8x32xf32>
    %223 = arith.addf %221, %222 : vector<8x32xf32>
    %224 = arith.negf %223 : vector<8x32xf32>
    %225 = math.exp %224 : vector<8x32xf32>
    %cst_66 = arith.constant 1.000000e+00 : f32
    %226 = vector.broadcast %cst_66 : f32 to vector<8x32xf32>
    %227 = arith.addf %226, %225 : vector<8x32xf32>
    %228 = arith.divf %226, %227 : vector<8x32xf32>
    %229 = vector.extract_strided_slice %207 {offsets = [0, 64], sizes = [8, 32], strides = [1, 1]} : vector<8x96xf32> to vector<8x32xf32>
    %230 = vector.extract_strided_slice %211 {offsets = [0, 64], sizes = [8, 32], strides = [1, 1]} : vector<8x96xf32> to vector<8x32xf32>
    %231 = arith.mulf %220, %230 : vector<8x32xf32>
    %232 = arith.addf %229, %231 : vector<8x32xf32>
    %233 = math.tanh %232 : vector<8x32xf32>
    %cst_67 = arith.constant 1.000000e+00 : f32
    %234 = vector.broadcast %cst_67 : f32 to vector<8x32xf32>
    %235 = arith.subf %234, %228 : vector<8x32xf32>
    %236 = arith.mulf %235, %233 : vector<8x32xf32>
    %237 = arith.mulf %228, %212 : vector<8x32xf32>
    %238 = arith.addf %236, %237 : vector<8x32xf32>
    %239 = vector.broadcast %199 : i32 to vector<8x1xi32>
    %240 = arith.cmpi slt, %239, %4 : vector<8x1xi32>
    %241 = vector.shape_cast %240 : vector<8x1xi1> to vector<8x1xi1>
    %242 = vector.broadcast %241 : vector<8x1xi1> to vector<8x32xi1>
    %243 = arith.select %242, %238, %212 : vector<8x32xi1>, vector<8x32xf32>
    %cst_68 = arith.constant 0.000000e+00 : f32
    %244 = vector.shape_cast %240 : vector<8x1xi1> to vector<8x1xi1>
    %245 = vector.broadcast %244 : vector<8x1xi1> to vector<8x32xi1>
    %246 = vector.broadcast %cst_68 : f32 to vector<8x32xf32>
    %247 = arith.select %245, %243, %246 : vector<8x32xi1>, vector<8x32xf32>
    %248 = vector.extract_strided_slice %204 {offsets = [0, 96], sizes = [8, 96], strides = [1, 1]} : vector<8x192xf32> to vector<8x96xf32>
    %249 = vector.extract_strided_slice %201 {offsets = [0, 32], sizes = [8, 32], strides = [1, 1]} : vector<8x64xf32> to vector<8x32xf32>
    %250 = vector.extract_strided_slice %210 {offsets = [0, 0], sizes = [8, 32], strides = [1, 1]} : vector<8x96xf32> to vector<8x32xf32>
    %251 = vector.extract_strided_slice %248 {offsets = [0, 0], sizes = [8, 32], strides = [1, 1]} : vector<8x96xf32> to vector<8x32xf32>
    %252 = arith.addf %250, %251 : vector<8x32xf32>
    %253 = arith.negf %252 : vector<8x32xf32>
    %254 = math.exp %253 : vector<8x32xf32>
    %cst_69 = arith.constant 1.000000e+00 : f32
    %255 = vector.broadcast %cst_69 : f32 to vector<8x32xf32>
    %256 = arith.addf %255, %254 : vector<8x32xf32>
    %257 = arith.divf %255, %256 : vector<8x32xf32>
    %258 = vector.extract_strided_slice %210 {offsets = [0, 32], sizes = [8, 32], strides = [1, 1]} : vector<8x96xf32> to vector<8x32xf32>
    %259 = vector.extract_strided_slice %248 {offsets = [0, 32], sizes = [8, 32], strides = [1, 1]} : vector<8x96xf32> to vector<8x32xf32>
    %260 = arith.addf %258, %259 : vector<8x32xf32>
    %261 = arith.negf %260 : vector<8x32xf32>
    %262 = math.exp %261 : vector<8x32xf32>
    %cst_70 = arith.constant 1.000000e+00 : f32
    %263 = vector.broadcast %cst_70 : f32 to vector<8x32xf32>
    %264 = arith.addf %263, %262 : vector<8x32xf32>
    %265 = arith.divf %263, %264 : vector<8x32xf32>
    %266 = vector.extract_strided_slice %210 {offsets = [0, 64], sizes = [8, 32], strides = [1, 1]} : vector<8x96xf32> to vector<8x32xf32>
    %267 = vector.extract_strided_slice %248 {offsets = [0, 64], sizes = [8, 32], strides = [1, 1]} : vector<8x96xf32> to vector<8x32xf32>
    %268 = arith.mulf %257, %267 : vector<8x32xf32>
    %269 = arith.addf %266, %268 : vector<8x32xf32>
    %270 = math.tanh %269 : vector<8x32xf32>
    %cst_71 = arith.constant 1.000000e+00 : f32
    %271 = vector.broadcast %cst_71 : f32 to vector<8x32xf32>
    %272 = arith.subf %271, %265 : vector<8x32xf32>
    %273 = arith.mulf %272, %270 : vector<8x32xf32>
    %274 = arith.mulf %265, %249 : vector<8x32xf32>
    %275 = arith.addf %273, %274 : vector<8x32xf32>
    %276 = vector.broadcast %200 : i32 to vector<8x1xi32>
    %277 = arith.cmpi slt, %276, %4 : vector<8x1xi32>
    %278 = vector.shape_cast %277 : vector<8x1xi1> to vector<8x1xi1>
    %279 = vector.broadcast %278 : vector<8x1xi1> to vector<8x32xi1>
    %280 = arith.select %279, %275, %249 : vector<8x32xi1>, vector<8x32xf32>
    %cst_72 = arith.constant 0.000000e+00 : f32
    %281 = vector.shape_cast %277 : vector<8x1xi1> to vector<8x1xi1>
    %282 = vector.broadcast %281 : vector<8x1xi1> to vector<8x32xi1>
    %283 = vector.broadcast %cst_72 : f32 to vector<8x32xf32>
    %284 = arith.select %282, %280, %283 : vector<8x32xi1>, vector<8x32xf32>
    %c0_73 = arith.constant 0 : index
    %c0_74 = arith.constant 0 : index
    %285 = vector.load %arg9[%c0_73, %c0_74] : memref<8x64xf32, #tpu.memory_space<vmem>>, vector<8x32xf32>
    tpu.vector_store %arg9[%c0_73, %c0_74], %243 {strides = array<i32>} : memref<8x64xf32, #tpu.memory_space<vmem>>, vector<8x32xf32>,
    %c0_75 = arith.constant 0 : index
    %c32_76 = arith.constant 32 : index
    %286 = vector.load %arg9[%c0_75, %c32_76] : memref<8x64xf32, #tpu.memory_space<vmem>>, vector<8x32xf32>
    tpu.vector_store %arg9[%c0_75, %c32_76], %280 {strides = array<i32>} : memref<8x64xf32, #tpu.memory_space<vmem>>, vector<8x32xf32>,
    %287 = arith.truncf %247 : vector<8x32xf32> to vector<8x32xbf16>
    %c2_77 = arith.constant 2 : index
    %c0_78 = arith.constant 0 : index
    %c0_79 = arith.constant 0 : index
    %288 = vector.load %arg7[%c2_77, %c0_78, %c0_79] : memref<8x8x32xbf16, #tpu.memory_space<vmem>>, vector<1x8x32xbf16>
    %289 = vector.shape_cast %288 : vector<1x8x32xbf16> to vector<8x32xbf16>
    %290 = vector.shape_cast %287 : vector<8x32xbf16> to vector<1x8x32xbf16>
    tpu.vector_store %arg7[%c2_77, %c0_78, %c0_79], %290 {strides = array<i32>} : memref<8x8x32xbf16, #tpu.memory_space<vmem>>, vector<1x8x32xbf16>,
    %291 = arith.truncf %284 : vector<8x32xf32> to vector<8x32xbf16>
    %c5_80 = arith.constant 5 : index
    %c0_81 = arith.constant 0 : index
    %c0_82 = arith.constant 0 : index
    %292 = vector.load %arg8[%c5_80, %c0_81, %c0_82] : memref<8x8x32xbf16, #tpu.memory_space<vmem>>, vector<1x8x32xbf16>
    %293 = vector.shape_cast %292 : vector<1x8x32xbf16> to vector<8x32xbf16>
    %294 = vector.shape_cast %291 : vector<8x32xbf16> to vector<1x8x32xbf16>
    tpu.vector_store %arg8[%c5_80, %c0_81, %c0_82], %294 {strides = array<i32>} : memref<8x8x32xbf16, #tpu.memory_space<vmem>>, vector<1x8x32xbf16>,
    %c3_i32 = arith.constant 3 : i32
    %295 = arith.addi %0, %c3_i32 : i32
    %c7_i32_83 = arith.constant 7 : i32
    %296 = arith.subi %c7_i32_83, %295 : i32
    %c0_84 = arith.constant 0 : index
    %c0_85 = arith.constant 0 : index
    %297 = vector.load %arg9[%c0_84, %c0_85] : memref<8x64xf32, #tpu.memory_space<vmem>>, vector<8x64xf32>
    %cst_86 = arith.constant dense<0.000000e+00> : vector<8x192xf32>
    %298 = tpu.matmul %297, %5, %cst_86 {dimension_numbers = #tpu.dot_dimension_numbers<[1], [0], [0], [1], [0, 0, 1, 1], [], []>} : vector<8x64xf32>, vector<64x192xf32>, vector<8x192xf32> -> vector<8x192xf32>
    %299 = vector.broadcast %6 : vector<1x192xf32> to vector<8x192xf32>
    %300 = arith.addf %298, %299 : vector<8x192xf32>
    %c3 = arith.constant 3 : index
    %c0_87 = arith.constant 0 : index
    %c0_88 = arith.constant 0 : index
    %301 = vector.load %arg2[%c3, %c0_87, %c0_88] : memref<8x8x96xbf16, #tpu.memory_space<vmem>>, vector<1x8x96xbf16>
    %302 = vector.shape_cast %301 : vector<1x8x96xbf16> to vector<8x96xbf16>
    %303 = arith.extf %302 : vector<8x96xbf16> to vector<8x96xf32>
    %c4 = arith.constant 4 : index
    %c0_89 = arith.constant 0 : index
    %c0_90 = arith.constant 0 : index
    %304 = vector.load %arg3[%c4, %c0_89, %c0_90] : memref<8x8x96xbf16, #tpu.memory_space<vmem>>, vector<1x8x96xbf16>
    %305 = vector.shape_cast %304 : vector<1x8x96xbf16> to vector<8x96xbf16>
    %306 = arith.extf %305 : vector<8x96xbf16> to vector<8x96xf32>
    %307 = vector.extract_strided_slice %300 {offsets = [0, 0], sizes = [8, 96], strides = [1, 1]} : vector<8x192xf32> to vector<8x96xf32>
    %308 = vector.extract_strided_slice %297 {offsets = [0, 0], sizes = [8, 32], strides = [1, 1]} : vector<8x64xf32> to vector<8x32xf32>
    %309 = vector.extract_strided_slice %303 {offsets = [0, 0], sizes = [8, 32], strides = [1, 1]} : vector<8x96xf32> to vector<8x32xf32>
    %310 = vector.extract_strided_slice %307 {offsets = [0, 0], sizes = [8, 32], strides = [1, 1]} : vector<8x96xf32> to vector<8x32xf32>
    %311 = arith.addf %309, %310 : vector<8x32xf32>
    %312 = arith.negf %311 : vector<8x32xf32>
    %313 = math.exp %312 : vector<8x32xf32>
    %cst_91 = arith.constant 1.000000e+00 : f32
    %314 = vector.broadcast %cst_91 : f32 to vector<8x32xf32>
    %315 = arith.addf %314, %313 : vector<8x32xf32>
    %316 = arith.divf %314, %315 : vector<8x32xf32>
    %317 = vector.extract_strided_slice %303 {offsets = [0, 32], sizes = [8, 32], strides = [1, 1]} : vector<8x96xf32> to vector<8x32xf32>
    %318 = vector.extract_strided_slice %307 {offsets = [0, 32], sizes = [8, 32], strides = [1, 1]} : vector<8x96xf32> to vector<8x32xf32>
    %319 = arith.addf %317, %318 : vector<8x32xf32>
    %320 = arith.negf %319 : vector<8x32xf32>
    %321 = math.exp %320 : vector<8x32xf32>
    %cst_92 = arith.constant 1.000000e+00 : f32
    %322 = vector.broadcast %cst_92 : f32 to vector<8x32xf32>
    %323 = arith.addf %322, %321 : vector<8x32xf32>
    %324 = arith.divf %322, %323 : vector<8x32xf32>
    %325 = vector.extract_strided_slice %303 {offsets = [0, 64], sizes = [8, 32], strides = [1, 1]} : vector<8x96xf32> to vector<8x32xf32>
    %326 = vector.extract_strided_slice %307 {offsets = [0, 64], sizes = [8, 32], strides = [1, 1]} : vector<8x96xf32> to vector<8x32xf32>
    %327 = arith.mulf %316, %326 : vector<8x32xf32>
    %328 = arith.addf %325, %327 : vector<8x32xf32>
    %329 = math.tanh %328 : vector<8x32xf32>
    %cst_93 = arith.constant 1.000000e+00 : f32
    %330 = vector.broadcast %cst_93 : f32 to vector<8x32xf32>
    %331 = arith.subf %330, %324 : vector<8x32xf32>
    %332 = arith.mulf %331, %329 : vector<8x32xf32>
    %333 = arith.mulf %324, %308 : vector<8x32xf32>
    %334 = arith.addf %332, %333 : vector<8x32xf32>
    %335 = vector.broadcast %295 : i32 to vector<8x1xi32>
    %336 = arith.cmpi slt, %335, %4 : vector<8x1xi32>
    %337 = vector.shape_cast %336 : vector<8x1xi1> to vector<8x1xi1>
    %338 = vector.broadcast %337 : vector<8x1xi1> to vector<8x32xi1>
    %339 = arith.select %338, %334, %308 : vector<8x32xi1>, vector<8x32xf32>
    %cst_94 = arith.constant 0.000000e+00 : f32
    %340 = vector.shape_cast %336 : vector<8x1xi1> to vector<8x1xi1>
    %341 = vector.broadcast %340 : vector<8x1xi1> to vector<8x32xi1>
    %342 = vector.broadcast %cst_94 : f32 to vector<8x32xf32>
    %343 = arith.select %341, %339, %342 : vector<8x32xi1>, vector<8x32xf32>
    %344 = vector.extract_strided_slice %300 {offsets = [0, 96], sizes = [8, 96], strides = [1, 1]} : vector<8x192xf32> to vector<8x96xf32>
    %345 = vector.extract_strided_slice %297 {offsets = [0, 32], sizes = [8, 32], strides = [1, 1]} : vector<8x64xf32> to vector<8x32xf32>
    %346 = vector.extract_strided_slice %306 {offsets = [0, 0], sizes = [8, 32], strides = [1, 1]} : vector<8x96xf32> to vector<8x32xf32>
    %347 = vector.extract_strided_slice %344 {offsets = [0, 0], sizes = [8, 32], strides = [1, 1]} : vector<8x96xf32> to vector<8x32xf32>
    %348 = arith.addf %346, %347 : vector<8x32xf32>
    %349 = arith.negf %348 : vector<8x32xf32>
    %350 = math.exp %349 : vector<8x32xf32>
    %cst_95 = arith.constant 1.000000e+00 : f32
    %351 = vector.broadcast %cst_95 : f32 to vector<8x32xf32>
    %352 = arith.addf %351, %350 : vector<8x32xf32>
    %353 = arith.divf %351, %352 : vector<8x32xf32>
    %354 = vector.extract_strided_slice %306 {offsets = [0, 32], sizes = [8, 32], strides = [1, 1]} : vector<8x96xf32> to vector<8x32xf32>
    %355 = vector.extract_strided_slice %344 {offsets = [0, 32], sizes = [8, 32], strides = [1, 1]} : vector<8x96xf32> to vector<8x32xf32>
    %356 = arith.addf %354, %355 : vector<8x32xf32>
    %357 = arith.negf %356 : vector<8x32xf32>
    %358 = math.exp %357 : vector<8x32xf32>
    %cst_96 = arith.constant 1.000000e+00 : f32
    %359 = vector.broadcast %cst_96 : f32 to vector<8x32xf32>
    %360 = arith.addf %359, %358 : vector<8x32xf32>
    %361 = arith.divf %359, %360 : vector<8x32xf32>
    %362 = vector.extract_strided_slice %306 {offsets = [0, 64], sizes = [8, 32], strides = [1, 1]} : vector<8x96xf32> to vector<8x32xf32>
    %363 = vector.extract_strided_slice %344 {offsets = [0, 64], sizes = [8, 32], strides = [1, 1]} : vector<8x96xf32> to vector<8x32xf32>
    %364 = arith.mulf %353, %363 : vector<8x32xf32>
    %365 = arith.addf %362, %364 : vector<8x32xf32>
    %366 = math.tanh %365 : vector<8x32xf32>
    %cst_97 = arith.constant 1.000000e+00 : f32
    %367 = vector.broadcast %cst_97 : f32 to vector<8x32xf32>
    %368 = arith.subf %367, %361 : vector<8x32xf32>
    %369 = arith.mulf %368, %366 : vector<8x32xf32>
    %370 = arith.mulf %361, %345 : vector<8x32xf32>
    %371 = arith.addf %369, %370 : vector<8x32xf32>
    %372 = vector.broadcast %296 : i32 to vector<8x1xi32>
    %373 = arith.cmpi slt, %372, %4 : vector<8x1xi32>
    %374 = vector.shape_cast %373 : vector<8x1xi1> to vector<8x1xi1>
    %375 = vector.broadcast %374 : vector<8x1xi1> to vector<8x32xi1>
    %376 = arith.select %375, %371, %345 : vector<8x32xi1>, vector<8x32xf32>
    %cst_98 = arith.constant 0.000000e+00 : f32
    %377 = vector.shape_cast %373 : vector<8x1xi1> to vector<8x1xi1>
    %378 = vector.broadcast %377 : vector<8x1xi1> to vector<8x32xi1>
    %379 = vector.broadcast %cst_98 : f32 to vector<8x32xf32>
    %380 = arith.select %378, %376, %379 : vector<8x32xi1>, vector<8x32xf32>
    %c0_99 = arith.constant 0 : index
    %c0_100 = arith.constant 0 : index
    %381 = vector.load %arg9[%c0_99, %c0_100] : memref<8x64xf32, #tpu.memory_space<vmem>>, vector<8x32xf32>
    tpu.vector_store %arg9[%c0_99, %c0_100], %339 {strides = array<i32>} : memref<8x64xf32, #tpu.memory_space<vmem>>, vector<8x32xf32>,
    %c0_101 = arith.constant 0 : index
    %c32_102 = arith.constant 32 : index
    %382 = vector.load %arg9[%c0_101, %c32_102] : memref<8x64xf32, #tpu.memory_space<vmem>>, vector<8x32xf32>
    tpu.vector_store %arg9[%c0_101, %c32_102], %376 {strides = array<i32>} : memref<8x64xf32, #tpu.memory_space<vmem>>, vector<8x32xf32>,
    %383 = arith.truncf %343 : vector<8x32xf32> to vector<8x32xbf16>
    %c3_103 = arith.constant 3 : index
    %c0_104 = arith.constant 0 : index
    %c0_105 = arith.constant 0 : index
    %384 = vector.load %arg7[%c3_103, %c0_104, %c0_105] : memref<8x8x32xbf16, #tpu.memory_space<vmem>>, vector<1x8x32xbf16>
    %385 = vector.shape_cast %384 : vector<1x8x32xbf16> to vector<8x32xbf16>
    %386 = vector.shape_cast %383 : vector<8x32xbf16> to vector<1x8x32xbf16>
    tpu.vector_store %arg7[%c3_103, %c0_104, %c0_105], %386 {strides = array<i32>} : memref<8x8x32xbf16, #tpu.memory_space<vmem>>, vector<1x8x32xbf16>,
    %387 = arith.truncf %380 : vector<8x32xf32> to vector<8x32xbf16>
    %c4_106 = arith.constant 4 : index
    %c0_107 = arith.constant 0 : index
    %c0_108 = arith.constant 0 : index
    %388 = vector.load %arg8[%c4_106, %c0_107, %c0_108] : memref<8x8x32xbf16, #tpu.memory_space<vmem>>, vector<1x8x32xbf16>
    %389 = vector.shape_cast %388 : vector<1x8x32xbf16> to vector<8x32xbf16>
    %390 = vector.shape_cast %387 : vector<8x32xbf16> to vector<1x8x32xbf16>
    tpu.vector_store %arg8[%c4_106, %c0_107, %c0_108], %390 {strides = array<i32>} : memref<8x8x32xbf16, #tpu.memory_space<vmem>>, vector<1x8x32xbf16>,
    %c4_i32 = arith.constant 4 : i32
    %391 = arith.addi %0, %c4_i32 : i32
    %c7_i32_109 = arith.constant 7 : i32
    %392 = arith.subi %c7_i32_109, %391 : i32
    %c0_110 = arith.constant 0 : index
    %c0_111 = arith.constant 0 : index
    %393 = vector.load %arg9[%c0_110, %c0_111] : memref<8x64xf32, #tpu.memory_space<vmem>>, vector<8x64xf32>
    %cst_112 = arith.constant dense<0.000000e+00> : vector<8x192xf32>
    %394 = tpu.matmul %393, %5, %cst_112 {dimension_numbers = #tpu.dot_dimension_numbers<[1], [0], [0], [1], [0, 0, 1, 1], [], []>} : vector<8x64xf32>, vector<64x192xf32>, vector<8x192xf32> -> vector<8x192xf32>
    %395 = vector.broadcast %6 : vector<1x192xf32> to vector<8x192xf32>
    %396 = arith.addf %394, %395 : vector<8x192xf32>
    %c4_113 = arith.constant 4 : index
    %c0_114 = arith.constant 0 : index
    %c0_115 = arith.constant 0 : index
    %397 = vector.load %arg2[%c4_113, %c0_114, %c0_115] : memref<8x8x96xbf16, #tpu.memory_space<vmem>>, vector<1x8x96xbf16>
    %398 = vector.shape_cast %397 : vector<1x8x96xbf16> to vector<8x96xbf16>
    %399 = arith.extf %398 : vector<8x96xbf16> to vector<8x96xf32>
    %c3_116 = arith.constant 3 : index
    %c0_117 = arith.constant 0 : index
    %c0_118 = arith.constant 0 : index
    %400 = vector.load %arg3[%c3_116, %c0_117, %c0_118] : memref<8x8x96xbf16, #tpu.memory_space<vmem>>, vector<1x8x96xbf16>
    %401 = vector.shape_cast %400 : vector<1x8x96xbf16> to vector<8x96xbf16>
    %402 = arith.extf %401 : vector<8x96xbf16> to vector<8x96xf32>
    %403 = vector.extract_strided_slice %396 {offsets = [0, 0], sizes = [8, 96], strides = [1, 1]} : vector<8x192xf32> to vector<8x96xf32>
    %404 = vector.extract_strided_slice %393 {offsets = [0, 0], sizes = [8, 32], strides = [1, 1]} : vector<8x64xf32> to vector<8x32xf32>
    %405 = vector.extract_strided_slice %399 {offsets = [0, 0], sizes = [8, 32], strides = [1, 1]} : vector<8x96xf32> to vector<8x32xf32>
    %406 = vector.extract_strided_slice %403 {offsets = [0, 0], sizes = [8, 32], strides = [1, 1]} : vector<8x96xf32> to vector<8x32xf32>
    %407 = arith.addf %405, %406 : vector<8x32xf32>
    %408 = arith.negf %407 : vector<8x32xf32>
    %409 = math.exp %408 : vector<8x32xf32>
    %cst_119 = arith.constant 1.000000e+00 : f32
    %410 = vector.broadcast %cst_119 : f32 to vector<8x32xf32>
    %411 = arith.addf %410, %409 : vector<8x32xf32>
    %412 = arith.divf %410, %411 : vector<8x32xf32>
    %413 = vector.extract_strided_slice %399 {offsets = [0, 32], sizes = [8, 32], strides = [1, 1]} : vector<8x96xf32> to vector<8x32xf32>
    %414 = vector.extract_strided_slice %403 {offsets = [0, 32], sizes = [8, 32], strides = [1, 1]} : vector<8x96xf32> to vector<8x32xf32>
    %415 = arith.addf %413, %414 : vector<8x32xf32>
    %416 = arith.negf %415 : vector<8x32xf32>
    %417 = math.exp %416 : vector<8x32xf32>
    %cst_120 = arith.constant 1.000000e+00 : f32
    %418 = vector.broadcast %cst_120 : f32 to vector<8x32xf32>
    %419 = arith.addf %418, %417 : vector<8x32xf32>
    %420 = arith.divf %418, %419 : vector<8x32xf32>
    %421 = vector.extract_strided_slice %399 {offsets = [0, 64], sizes = [8, 32], strides = [1, 1]} : vector<8x96xf32> to vector<8x32xf32>
    %422 = vector.extract_strided_slice %403 {offsets = [0, 64], sizes = [8, 32], strides = [1, 1]} : vector<8x96xf32> to vector<8x32xf32>
    %423 = arith.mulf %412, %422 : vector<8x32xf32>
    %424 = arith.addf %421, %423 : vector<8x32xf32>
    %425 = math.tanh %424 : vector<8x32xf32>
    %cst_121 = arith.constant 1.000000e+00 : f32
    %426 = vector.broadcast %cst_121 : f32 to vector<8x32xf32>
    %427 = arith.subf %426, %420 : vector<8x32xf32>
    %428 = arith.mulf %427, %425 : vector<8x32xf32>
    %429 = arith.mulf %420, %404 : vector<8x32xf32>
    %430 = arith.addf %428, %429 : vector<8x32xf32>
    %431 = vector.broadcast %391 : i32 to vector<8x1xi32>
    %432 = arith.cmpi slt, %431, %4 : vector<8x1xi32>
    %433 = vector.shape_cast %432 : vector<8x1xi1> to vector<8x1xi1>
    %434 = vector.broadcast %433 : vector<8x1xi1> to vector<8x32xi1>
    %435 = arith.select %434, %430, %404 : vector<8x32xi1>, vector<8x32xf32>
    %cst_122 = arith.constant 0.000000e+00 : f32
    %436 = vector.shape_cast %432 : vector<8x1xi1> to vector<8x1xi1>
    %437 = vector.broadcast %436 : vector<8x1xi1> to vector<8x32xi1>
    %438 = vector.broadcast %cst_122 : f32 to vector<8x32xf32>
    %439 = arith.select %437, %435, %438 : vector<8x32xi1>, vector<8x32xf32>
    %440 = vector.extract_strided_slice %396 {offsets = [0, 96], sizes = [8, 96], strides = [1, 1]} : vector<8x192xf32> to vector<8x96xf32>
    %441 = vector.extract_strided_slice %393 {offsets = [0, 32], sizes = [8, 32], strides = [1, 1]} : vector<8x64xf32> to vector<8x32xf32>
    %442 = vector.extract_strided_slice %402 {offsets = [0, 0], sizes = [8, 32], strides = [1, 1]} : vector<8x96xf32> to vector<8x32xf32>
    %443 = vector.extract_strided_slice %440 {offsets = [0, 0], sizes = [8, 32], strides = [1, 1]} : vector<8x96xf32> to vector<8x32xf32>
    %444 = arith.addf %442, %443 : vector<8x32xf32>
    %445 = arith.negf %444 : vector<8x32xf32>
    %446 = math.exp %445 : vector<8x32xf32>
    %cst_123 = arith.constant 1.000000e+00 : f32
    %447 = vector.broadcast %cst_123 : f32 to vector<8x32xf32>
    %448 = arith.addf %447, %446 : vector<8x32xf32>
    %449 = arith.divf %447, %448 : vector<8x32xf32>
    %450 = vector.extract_strided_slice %402 {offsets = [0, 32], sizes = [8, 32], strides = [1, 1]} : vector<8x96xf32> to vector<8x32xf32>
    %451 = vector.extract_strided_slice %440 {offsets = [0, 32], sizes = [8, 32], strides = [1, 1]} : vector<8x96xf32> to vector<8x32xf32>
    %452 = arith.addf %450, %451 : vector<8x32xf32>
    %453 = arith.negf %452 : vector<8x32xf32>
    %454 = math.exp %453 : vector<8x32xf32>
    %cst_124 = arith.constant 1.000000e+00 : f32
    %455 = vector.broadcast %cst_124 : f32 to vector<8x32xf32>
    %456 = arith.addf %455, %454 : vector<8x32xf32>
    %457 = arith.divf %455, %456 : vector<8x32xf32>
    %458 = vector.extract_strided_slice %402 {offsets = [0, 64], sizes = [8, 32], strides = [1, 1]} : vector<8x96xf32> to vector<8x32xf32>
    %459 = vector.extract_strided_slice %440 {offsets = [0, 64], sizes = [8, 32], strides = [1, 1]} : vector<8x96xf32> to vector<8x32xf32>
    %460 = arith.mulf %449, %459 : vector<8x32xf32>
    %461 = arith.addf %458, %460 : vector<8x32xf32>
    %462 = math.tanh %461 : vector<8x32xf32>
    %cst_125 = arith.constant 1.000000e+00 : f32
    %463 = vector.broadcast %cst_125 : f32 to vector<8x32xf32>
    %464 = arith.subf %463, %457 : vector<8x32xf32>
    %465 = arith.mulf %464, %462 : vector<8x32xf32>
    %466 = arith.mulf %457, %441 : vector<8x32xf32>
    %467 = arith.addf %465, %466 : vector<8x32xf32>
    %468 = vector.broadcast %392 : i32 to vector<8x1xi32>
    %469 = arith.cmpi slt, %468, %4 : vector<8x1xi32>
    %470 = vector.shape_cast %469 : vector<8x1xi1> to vector<8x1xi1>
    %471 = vector.broadcast %470 : vector<8x1xi1> to vector<8x32xi1>
    %472 = arith.select %471, %467, %441 : vector<8x32xi1>, vector<8x32xf32>
    %cst_126 = arith.constant 0.000000e+00 : f32
    %473 = vector.shape_cast %469 : vector<8x1xi1> to vector<8x1xi1>
    %474 = vector.broadcast %473 : vector<8x1xi1> to vector<8x32xi1>
    %475 = vector.broadcast %cst_126 : f32 to vector<8x32xf32>
    %476 = arith.select %474, %472, %475 : vector<8x32xi1>, vector<8x32xf32>
    %c0_127 = arith.constant 0 : index
    %c0_128 = arith.constant 0 : index
    %477 = vector.load %arg9[%c0_127, %c0_128] : memref<8x64xf32, #tpu.memory_space<vmem>>, vector<8x32xf32>
    tpu.vector_store %arg9[%c0_127, %c0_128], %435 {strides = array<i32>} : memref<8x64xf32, #tpu.memory_space<vmem>>, vector<8x32xf32>,
    %c0_129 = arith.constant 0 : index
    %c32_130 = arith.constant 32 : index
    %478 = vector.load %arg9[%c0_129, %c32_130] : memref<8x64xf32, #tpu.memory_space<vmem>>, vector<8x32xf32>
    tpu.vector_store %arg9[%c0_129, %c32_130], %472 {strides = array<i32>} : memref<8x64xf32, #tpu.memory_space<vmem>>, vector<8x32xf32>,
    %479 = arith.truncf %439 : vector<8x32xf32> to vector<8x32xbf16>
    %c4_131 = arith.constant 4 : index
    %c0_132 = arith.constant 0 : index
    %c0_133 = arith.constant 0 : index
    %480 = vector.load %arg7[%c4_131, %c0_132, %c0_133] : memref<8x8x32xbf16, #tpu.memory_space<vmem>>, vector<1x8x32xbf16>
    %481 = vector.shape_cast %480 : vector<1x8x32xbf16> to vector<8x32xbf16>
    %482 = vector.shape_cast %479 : vector<8x32xbf16> to vector<1x8x32xbf16>
    tpu.vector_store %arg7[%c4_131, %c0_132, %c0_133], %482 {strides = array<i32>} : memref<8x8x32xbf16, #tpu.memory_space<vmem>>, vector<1x8x32xbf16>,
    %483 = arith.truncf %476 : vector<8x32xf32> to vector<8x32xbf16>
    %c3_134 = arith.constant 3 : index
    %c0_135 = arith.constant 0 : index
    %c0_136 = arith.constant 0 : index
    %484 = vector.load %arg8[%c3_134, %c0_135, %c0_136] : memref<8x8x32xbf16, #tpu.memory_space<vmem>>, vector<1x8x32xbf16>
    %485 = vector.shape_cast %484 : vector<1x8x32xbf16> to vector<8x32xbf16>
    %486 = vector.shape_cast %483 : vector<8x32xbf16> to vector<1x8x32xbf16>
    tpu.vector_store %arg8[%c3_134, %c0_135, %c0_136], %486 {strides = array<i32>} : memref<8x8x32xbf16, #tpu.memory_space<vmem>>, vector<1x8x32xbf16>,
    %c5_i32 = arith.constant 5 : i32
    %487 = arith.addi %0, %c5_i32 : i32
    %c7_i32_137 = arith.constant 7 : i32
    %488 = arith.subi %c7_i32_137, %487 : i32
    %c0_138 = arith.constant 0 : index
    %c0_139 = arith.constant 0 : index
    %489 = vector.load %arg9[%c0_138, %c0_139] : memref<8x64xf32, #tpu.memory_space<vmem>>, vector<8x64xf32>
    %cst_140 = arith.constant dense<0.000000e+00> : vector<8x192xf32>
    %490 = tpu.matmul %489, %5, %cst_140 {dimension_numbers = #tpu.dot_dimension_numbers<[1], [0], [0], [1], [0, 0, 1, 1], [], []>} : vector<8x64xf32>, vector<64x192xf32>, vector<8x192xf32> -> vector<8x192xf32>
    %491 = vector.broadcast %6 : vector<1x192xf32> to vector<8x192xf32>
    %492 = arith.addf %490, %491 : vector<8x192xf32>
    %c5_141 = arith.constant 5 : index
    %c0_142 = arith.constant 0 : index
    %c0_143 = arith.constant 0 : index
    %493 = vector.load %arg2[%c5_141, %c0_142, %c0_143] : memref<8x8x96xbf16, #tpu.memory_space<vmem>>, vector<1x8x96xbf16>
    %494 = vector.shape_cast %493 : vector<1x8x96xbf16> to vector<8x96xbf16>
    %495 = arith.extf %494 : vector<8x96xbf16> to vector<8x96xf32>
    %c2_144 = arith.constant 2 : index
    %c0_145 = arith.constant 0 : index
    %c0_146 = arith.constant 0 : index
    %496 = vector.load %arg3[%c2_144, %c0_145, %c0_146] : memref<8x8x96xbf16, #tpu.memory_space<vmem>>, vector<1x8x96xbf16>
    %497 = vector.shape_cast %496 : vector<1x8x96xbf16> to vector<8x96xbf16>
    %498 = arith.extf %497 : vector<8x96xbf16> to vector<8x96xf32>
    %499 = vector.extract_strided_slice %492 {offsets = [0, 0], sizes = [8, 96], strides = [1, 1]} : vector<8x192xf32> to vector<8x96xf32>
    %500 = vector.extract_strided_slice %489 {offsets = [0, 0], sizes = [8, 32], strides = [1, 1]} : vector<8x64xf32> to vector<8x32xf32>
    %501 = vector.extract_strided_slice %495 {offsets = [0, 0], sizes = [8, 32], strides = [1, 1]} : vector<8x96xf32> to vector<8x32xf32>
    %502 = vector.extract_strided_slice %499 {offsets = [0, 0], sizes = [8, 32], strides = [1, 1]} : vector<8x96xf32> to vector<8x32xf32>
    %503 = arith.addf %501, %502 : vector<8x32xf32>
    %504 = arith.negf %503 : vector<8x32xf32>
    %505 = math.exp %504 : vector<8x32xf32>
    %cst_147 = arith.constant 1.000000e+00 : f32
    %506 = vector.broadcast %cst_147 : f32 to vector<8x32xf32>
    %507 = arith.addf %506, %505 : vector<8x32xf32>
    %508 = arith.divf %506, %507 : vector<8x32xf32>
    %509 = vector.extract_strided_slice %495 {offsets = [0, 32], sizes = [8, 32], strides = [1, 1]} : vector<8x96xf32> to vector<8x32xf32>
    %510 = vector.extract_strided_slice %499 {offsets = [0, 32], sizes = [8, 32], strides = [1, 1]} : vector<8x96xf32> to vector<8x32xf32>
    %511 = arith.addf %509, %510 : vector<8x32xf32>
    %512 = arith.negf %511 : vector<8x32xf32>
    %513 = math.exp %512 : vector<8x32xf32>
    %cst_148 = arith.constant 1.000000e+00 : f32
    %514 = vector.broadcast %cst_148 : f32 to vector<8x32xf32>
    %515 = arith.addf %514, %513 : vector<8x32xf32>
    %516 = arith.divf %514, %515 : vector<8x32xf32>
    %517 = vector.extract_strided_slice %495 {offsets = [0, 64], sizes = [8, 32], strides = [1, 1]} : vector<8x96xf32> to vector<8x32xf32>
    %518 = vector.extract_strided_slice %499 {offsets = [0, 64], sizes = [8, 32], strides = [1, 1]} : vector<8x96xf32> to vector<8x32xf32>
    %519 = arith.mulf %508, %518 : vector<8x32xf32>
    %520 = arith.addf %517, %519 : vector<8x32xf32>
    %521 = math.tanh %520 : vector<8x32xf32>
    %cst_149 = arith.constant 1.000000e+00 : f32
    %522 = vector.broadcast %cst_149 : f32 to vector<8x32xf32>
    %523 = arith.subf %522, %516 : vector<8x32xf32>
    %524 = arith.mulf %523, %521 : vector<8x32xf32>
    %525 = arith.mulf %516, %500 : vector<8x32xf32>
    %526 = arith.addf %524, %525 : vector<8x32xf32>
    %527 = vector.broadcast %487 : i32 to vector<8x1xi32>
    %528 = arith.cmpi slt, %527, %4 : vector<8x1xi32>
    %529 = vector.shape_cast %528 : vector<8x1xi1> to vector<8x1xi1>
    %530 = vector.broadcast %529 : vector<8x1xi1> to vector<8x32xi1>
    %531 = arith.select %530, %526, %500 : vector<8x32xi1>, vector<8x32xf32>
    %cst_150 = arith.constant 0.000000e+00 : f32
    %532 = vector.shape_cast %528 : vector<8x1xi1> to vector<8x1xi1>
    %533 = vector.broadcast %532 : vector<8x1xi1> to vector<8x32xi1>
    %534 = vector.broadcast %cst_150 : f32 to vector<8x32xf32>
    %535 = arith.select %533, %531, %534 : vector<8x32xi1>, vector<8x32xf32>
    %536 = vector.extract_strided_slice %492 {offsets = [0, 96], sizes = [8, 96], strides = [1, 1]} : vector<8x192xf32> to vector<8x96xf32>
    %537 = vector.extract_strided_slice %489 {offsets = [0, 32], sizes = [8, 32], strides = [1, 1]} : vector<8x64xf32> to vector<8x32xf32>
    %538 = vector.extract_strided_slice %498 {offsets = [0, 0], sizes = [8, 32], strides = [1, 1]} : vector<8x96xf32> to vector<8x32xf32>
    %539 = vector.extract_strided_slice %536 {offsets = [0, 0], sizes = [8, 32], strides = [1, 1]} : vector<8x96xf32> to vector<8x32xf32>
    %540 = arith.addf %538, %539 : vector<8x32xf32>
    %541 = arith.negf %540 : vector<8x32xf32>
    %542 = math.exp %541 : vector<8x32xf32>
    %cst_151 = arith.constant 1.000000e+00 : f32
    %543 = vector.broadcast %cst_151 : f32 to vector<8x32xf32>
    %544 = arith.addf %543, %542 : vector<8x32xf32>
    %545 = arith.divf %543, %544 : vector<8x32xf32>
    %546 = vector.extract_strided_slice %498 {offsets = [0, 32], sizes = [8, 32], strides = [1, 1]} : vector<8x96xf32> to vector<8x32xf32>
    %547 = vector.extract_strided_slice %536 {offsets = [0, 32], sizes = [8, 32], strides = [1, 1]} : vector<8x96xf32> to vector<8x32xf32>
    %548 = arith.addf %546, %547 : vector<8x32xf32>
    %549 = arith.negf %548 : vector<8x32xf32>
    %550 = math.exp %549 : vector<8x32xf32>
    %cst_152 = arith.constant 1.000000e+00 : f32
    %551 = vector.broadcast %cst_152 : f32 to vector<8x32xf32>
    %552 = arith.addf %551, %550 : vector<8x32xf32>
    %553 = arith.divf %551, %552 : vector<8x32xf32>
    %554 = vector.extract_strided_slice %498 {offsets = [0, 64], sizes = [8, 32], strides = [1, 1]} : vector<8x96xf32> to vector<8x32xf32>
    %555 = vector.extract_strided_slice %536 {offsets = [0, 64], sizes = [8, 32], strides = [1, 1]} : vector<8x96xf32> to vector<8x32xf32>
    %556 = arith.mulf %545, %555 : vector<8x32xf32>
    %557 = arith.addf %554, %556 : vector<8x32xf32>
    %558 = math.tanh %557 : vector<8x32xf32>
    %cst_153 = arith.constant 1.000000e+00 : f32
    %559 = vector.broadcast %cst_153 : f32 to vector<8x32xf32>
    %560 = arith.subf %559, %553 : vector<8x32xf32>
    %561 = arith.mulf %560, %558 : vector<8x32xf32>
    %562 = arith.mulf %553, %537 : vector<8x32xf32>
    %563 = arith.addf %561, %562 : vector<8x32xf32>
    %564 = vector.broadcast %488 : i32 to vector<8x1xi32>
    %565 = arith.cmpi slt, %564, %4 : vector<8x1xi32>
    %566 = vector.shape_cast %565 : vector<8x1xi1> to vector<8x1xi1>
    %567 = vector.broadcast %566 : vector<8x1xi1> to vector<8x32xi1>
    %568 = arith.select %567, %563, %537 : vector<8x32xi1>, vector<8x32xf32>
    %cst_154 = arith.constant 0.000000e+00 : f32
    %569 = vector.shape_cast %565 : vector<8x1xi1> to vector<8x1xi1>
    %570 = vector.broadcast %569 : vector<8x1xi1> to vector<8x32xi1>
    %571 = vector.broadcast %cst_154 : f32 to vector<8x32xf32>
    %572 = arith.select %570, %568, %571 : vector<8x32xi1>, vector<8x32xf32>
    %c0_155 = arith.constant 0 : index
    %c0_156 = arith.constant 0 : index
    %573 = vector.load %arg9[%c0_155, %c0_156] : memref<8x64xf32, #tpu.memory_space<vmem>>, vector<8x32xf32>
    tpu.vector_store %arg9[%c0_155, %c0_156], %531 {strides = array<i32>} : memref<8x64xf32, #tpu.memory_space<vmem>>, vector<8x32xf32>,
    %c0_157 = arith.constant 0 : index
    %c32_158 = arith.constant 32 : index
    %574 = vector.load %arg9[%c0_157, %c32_158] : memref<8x64xf32, #tpu.memory_space<vmem>>, vector<8x32xf32>
    tpu.vector_store %arg9[%c0_157, %c32_158], %568 {strides = array<i32>} : memref<8x64xf32, #tpu.memory_space<vmem>>, vector<8x32xf32>,
    %575 = arith.truncf %535 : vector<8x32xf32> to vector<8x32xbf16>
    %c5_159 = arith.constant 5 : index
    %c0_160 = arith.constant 0 : index
    %c0_161 = arith.constant 0 : index
    %576 = vector.load %arg7[%c5_159, %c0_160, %c0_161] : memref<8x8x32xbf16, #tpu.memory_space<vmem>>, vector<1x8x32xbf16>
    %577 = vector.shape_cast %576 : vector<1x8x32xbf16> to vector<8x32xbf16>
    %578 = vector.shape_cast %575 : vector<8x32xbf16> to vector<1x8x32xbf16>
    tpu.vector_store %arg7[%c5_159, %c0_160, %c0_161], %578 {strides = array<i32>} : memref<8x8x32xbf16, #tpu.memory_space<vmem>>, vector<1x8x32xbf16>,
    %579 = arith.truncf %572 : vector<8x32xf32> to vector<8x32xbf16>
    %c2_162 = arith.constant 2 : index
    %c0_163 = arith.constant 0 : index
    %c0_164 = arith.constant 0 : index
    %580 = vector.load %arg8[%c2_162, %c0_163, %c0_164] : memref<8x8x32xbf16, #tpu.memory_space<vmem>>, vector<1x8x32xbf16>
    %581 = vector.shape_cast %580 : vector<1x8x32xbf16> to vector<8x32xbf16>
    %582 = vector.shape_cast %579 : vector<8x32xbf16> to vector<1x8x32xbf16>
    tpu.vector_store %arg8[%c2_162, %c0_163, %c0_164], %582 {strides = array<i32>} : memref<8x8x32xbf16, #tpu.memory_space<vmem>>, vector<1x8x32xbf16>,
    %c6_i32 = arith.constant 6 : i32
    %583 = arith.addi %0, %c6_i32 : i32
    %c7_i32_165 = arith.constant 7 : i32
    %584 = arith.subi %c7_i32_165, %583 : i32
    %c0_166 = arith.constant 0 : index
    %c0_167 = arith.constant 0 : index
    %585 = vector.load %arg9[%c0_166, %c0_167] : memref<8x64xf32, #tpu.memory_space<vmem>>, vector<8x64xf32>
    %cst_168 = arith.constant dense<0.000000e+00> : vector<8x192xf32>
    %586 = tpu.matmul %585, %5, %cst_168 {dimension_numbers = #tpu.dot_dimension_numbers<[1], [0], [0], [1], [0, 0, 1, 1], [], []>} : vector<8x64xf32>, vector<64x192xf32>, vector<8x192xf32> -> vector<8x192xf32>
    %587 = vector.broadcast %6 : vector<1x192xf32> to vector<8x192xf32>
    %588 = arith.addf %586, %587 : vector<8x192xf32>
    %c6_169 = arith.constant 6 : index
    %c0_170 = arith.constant 0 : index
    %c0_171 = arith.constant 0 : index
    %589 = vector.load %arg2[%c6_169, %c0_170, %c0_171] : memref<8x8x96xbf16, #tpu.memory_space<vmem>>, vector<1x8x96xbf16>
    %590 = vector.shape_cast %589 : vector<1x8x96xbf16> to vector<8x96xbf16>
    %591 = arith.extf %590 : vector<8x96xbf16> to vector<8x96xf32>
    %c1_172 = arith.constant 1 : index
    %c0_173 = arith.constant 0 : index
    %c0_174 = arith.constant 0 : index
    %592 = vector.load %arg3[%c1_172, %c0_173, %c0_174] : memref<8x8x96xbf16, #tpu.memory_space<vmem>>, vector<1x8x96xbf16>
    %593 = vector.shape_cast %592 : vector<1x8x96xbf16> to vector<8x96xbf16>
    %594 = arith.extf %593 : vector<8x96xbf16> to vector<8x96xf32>
    %595 = vector.extract_strided_slice %588 {offsets = [0, 0], sizes = [8, 96], strides = [1, 1]} : vector<8x192xf32> to vector<8x96xf32>
    %596 = vector.extract_strided_slice %585 {offsets = [0, 0], sizes = [8, 32], strides = [1, 1]} : vector<8x64xf32> to vector<8x32xf32>
    %597 = vector.extract_strided_slice %591 {offsets = [0, 0], sizes = [8, 32], strides = [1, 1]} : vector<8x96xf32> to vector<8x32xf32>
    %598 = vector.extract_strided_slice %595 {offsets = [0, 0], sizes = [8, 32], strides = [1, 1]} : vector<8x96xf32> to vector<8x32xf32>
    %599 = arith.addf %597, %598 : vector<8x32xf32>
    %600 = arith.negf %599 : vector<8x32xf32>
    %601 = math.exp %600 : vector<8x32xf32>
    %cst_175 = arith.constant 1.000000e+00 : f32
    %602 = vector.broadcast %cst_175 : f32 to vector<8x32xf32>
    %603 = arith.addf %602, %601 : vector<8x32xf32>
    %604 = arith.divf %602, %603 : vector<8x32xf32>
    %605 = vector.extract_strided_slice %591 {offsets = [0, 32], sizes = [8, 32], strides = [1, 1]} : vector<8x96xf32> to vector<8x32xf32>
    %606 = vector.extract_strided_slice %595 {offsets = [0, 32], sizes = [8, 32], strides = [1, 1]} : vector<8x96xf32> to vector<8x32xf32>
    %607 = arith.addf %605, %606 : vector<8x32xf32>
    %608 = arith.negf %607 : vector<8x32xf32>
    %609 = math.exp %608 : vector<8x32xf32>
    %cst_176 = arith.constant 1.000000e+00 : f32
    %610 = vector.broadcast %cst_176 : f32 to vector<8x32xf32>
    %611 = arith.addf %610, %609 : vector<8x32xf32>
    %612 = arith.divf %610, %611 : vector<8x32xf32>
    %613 = vector.extract_strided_slice %591 {offsets = [0, 64], sizes = [8, 32], strides = [1, 1]} : vector<8x96xf32> to vector<8x32xf32>
    %614 = vector.extract_strided_slice %595 {offsets = [0, 64], sizes = [8, 32], strides = [1, 1]} : vector<8x96xf32> to vector<8x32xf32>
    %615 = arith.mulf %604, %614 : vector<8x32xf32>
    %616 = arith.addf %613, %615 : vector<8x32xf32>
    %617 = math.tanh %616 : vector<8x32xf32>
    %cst_177 = arith.constant 1.000000e+00 : f32
    %618 = vector.broadcast %cst_177 : f32 to vector<8x32xf32>
    %619 = arith.subf %618, %612 : vector<8x32xf32>
    %620 = arith.mulf %619, %617 : vector<8x32xf32>
    %621 = arith.mulf %612, %596 : vector<8x32xf32>
    %622 = arith.addf %620, %621 : vector<8x32xf32>
    %623 = vector.broadcast %583 : i32 to vector<8x1xi32>
    %624 = arith.cmpi slt, %623, %4 : vector<8x1xi32>
    %625 = vector.shape_cast %624 : vector<8x1xi1> to vector<8x1xi1>
    %626 = vector.broadcast %625 : vector<8x1xi1> to vector<8x32xi1>
    %627 = arith.select %626, %622, %596 : vector<8x32xi1>, vector<8x32xf32>
    %cst_178 = arith.constant 0.000000e+00 : f32
    %628 = vector.shape_cast %624 : vector<8x1xi1> to vector<8x1xi1>
    %629 = vector.broadcast %628 : vector<8x1xi1> to vector<8x32xi1>
    %630 = vector.broadcast %cst_178 : f32 to vector<8x32xf32>
    %631 = arith.select %629, %627, %630 : vector<8x32xi1>, vector<8x32xf32>
    %632 = vector.extract_strided_slice %588 {offsets = [0, 96], sizes = [8, 96], strides = [1, 1]} : vector<8x192xf32> to vector<8x96xf32>
    %633 = vector.extract_strided_slice %585 {offsets = [0, 32], sizes = [8, 32], strides = [1, 1]} : vector<8x64xf32> to vector<8x32xf32>
    %634 = vector.extract_strided_slice %594 {offsets = [0, 0], sizes = [8, 32], strides = [1, 1]} : vector<8x96xf32> to vector<8x32xf32>
    %635 = vector.extract_strided_slice %632 {offsets = [0, 0], sizes = [8, 32], strides = [1, 1]} : vector<8x96xf32> to vector<8x32xf32>
    %636 = arith.addf %634, %635 : vector<8x32xf32>
    %637 = arith.negf %636 : vector<8x32xf32>
    %638 = math.exp %637 : vector<8x32xf32>
    %cst_179 = arith.constant 1.000000e+00 : f32
    %639 = vector.broadcast %cst_179 : f32 to vector<8x32xf32>
    %640 = arith.addf %639, %638 : vector<8x32xf32>
    %641 = arith.divf %639, %640 : vector<8x32xf32>
    %642 = vector.extract_strided_slice %594 {offsets = [0, 32], sizes = [8, 32], strides = [1, 1]} : vector<8x96xf32> to vector<8x32xf32>
    %643 = vector.extract_strided_slice %632 {offsets = [0, 32], sizes = [8, 32], strides = [1, 1]} : vector<8x96xf32> to vector<8x32xf32>
    %644 = arith.addf %642, %643 : vector<8x32xf32>
    %645 = arith.negf %644 : vector<8x32xf32>
    %646 = math.exp %645 : vector<8x32xf32>
    %cst_180 = arith.constant 1.000000e+00 : f32
    %647 = vector.broadcast %cst_180 : f32 to vector<8x32xf32>
    %648 = arith.addf %647, %646 : vector<8x32xf32>
    %649 = arith.divf %647, %648 : vector<8x32xf32>
    %650 = vector.extract_strided_slice %594 {offsets = [0, 64], sizes = [8, 32], strides = [1, 1]} : vector<8x96xf32> to vector<8x32xf32>
    %651 = vector.extract_strided_slice %632 {offsets = [0, 64], sizes = [8, 32], strides = [1, 1]} : vector<8x96xf32> to vector<8x32xf32>
    %652 = arith.mulf %641, %651 : vector<8x32xf32>
    %653 = arith.addf %650, %652 : vector<8x32xf32>
    %654 = math.tanh %653 : vector<8x32xf32>
    %cst_181 = arith.constant 1.000000e+00 : f32
    %655 = vector.broadcast %cst_181 : f32 to vector<8x32xf32>
    %656 = arith.subf %655, %649 : vector<8x32xf32>
    %657 = arith.mulf %656, %654 : vector<8x32xf32>
    %658 = arith.mulf %649, %633 : vector<8x32xf32>
    %659 = arith.addf %657, %658 : vector<8x32xf32>
    %660 = vector.broadcast %584 : i32 to vector<8x1xi32>
    %661 = arith.cmpi slt, %660, %4 : vector<8x1xi32>
    %662 = vector.shape_cast %661 : vector<8x1xi1> to vector<8x1xi1>
    %663 = vector.broadcast %662 : vector<8x1xi1> to vector<8x32xi1>
    %664 = arith.select %663, %659, %633 : vector<8x32xi1>, vector<8x32xf32>
    %cst_182 = arith.constant 0.000000e+00 : f32
    %665 = vector.shape_cast %661 : vector<8x1xi1> to vector<8x1xi1>
    %666 = vector.broadcast %665 : vector<8x1xi1> to vector<8x32xi1>
    %667 = vector.broadcast %cst_182 : f32 to vector<8x32xf32>
    %668 = arith.select %666, %664, %667 : vector<8x32xi1>, vector<8x32xf32>
    %c0_183 = arith.constant 0 : index
    %c0_184 = arith.constant 0 : index
    %669 = vector.load %arg9[%c0_183, %c0_184] : memref<8x64xf32, #tpu.memory_space<vmem>>, vector<8x32xf32>
    tpu.vector_store %arg9[%c0_183, %c0_184], %627 {strides = array<i32>} : memref<8x64xf32, #tpu.memory_space<vmem>>, vector<8x32xf32>,
    %c0_185 = arith.constant 0 : index
    %c32_186 = arith.constant 32 : index
    %670 = vector.load %arg9[%c0_185, %c32_186] : memref<8x64xf32, #tpu.memory_space<vmem>>, vector<8x32xf32>
    tpu.vector_store %arg9[%c0_185, %c32_186], %664 {strides = array<i32>} : memref<8x64xf32, #tpu.memory_space<vmem>>, vector<8x32xf32>,
    %671 = arith.truncf %631 : vector<8x32xf32> to vector<8x32xbf16>
    %c6_187 = arith.constant 6 : index
    %c0_188 = arith.constant 0 : index
    %c0_189 = arith.constant 0 : index
    %672 = vector.load %arg7[%c6_187, %c0_188, %c0_189] : memref<8x8x32xbf16, #tpu.memory_space<vmem>>, vector<1x8x32xbf16>
    %673 = vector.shape_cast %672 : vector<1x8x32xbf16> to vector<8x32xbf16>
    %674 = vector.shape_cast %671 : vector<8x32xbf16> to vector<1x8x32xbf16>
    tpu.vector_store %arg7[%c6_187, %c0_188, %c0_189], %674 {strides = array<i32>} : memref<8x8x32xbf16, #tpu.memory_space<vmem>>, vector<1x8x32xbf16>,
    %675 = arith.truncf %668 : vector<8x32xf32> to vector<8x32xbf16>
    %c1_190 = arith.constant 1 : index
    %c0_191 = arith.constant 0 : index
    %c0_192 = arith.constant 0 : index
    %676 = vector.load %arg8[%c1_190, %c0_191, %c0_192] : memref<8x8x32xbf16, #tpu.memory_space<vmem>>, vector<1x8x32xbf16>
    %677 = vector.shape_cast %676 : vector<1x8x32xbf16> to vector<8x32xbf16>
    %678 = vector.shape_cast %675 : vector<8x32xbf16> to vector<1x8x32xbf16>
    tpu.vector_store %arg8[%c1_190, %c0_191, %c0_192], %678 {strides = array<i32>} : memref<8x8x32xbf16, #tpu.memory_space<vmem>>, vector<1x8x32xbf16>,
    %c7_i32_193 = arith.constant 7 : i32
    %679 = arith.addi %0, %c7_i32_193 : i32
    %c7_i32_194 = arith.constant 7 : i32
    %680 = arith.subi %c7_i32_194, %679 : i32
    %c0_195 = arith.constant 0 : index
    %c0_196 = arith.constant 0 : index
    %681 = vector.load %arg9[%c0_195, %c0_196] : memref<8x64xf32, #tpu.memory_space<vmem>>, vector<8x64xf32>
    %cst_197 = arith.constant dense<0.000000e+00> : vector<8x192xf32>
    %682 = tpu.matmul %681, %5, %cst_197 {dimension_numbers = #tpu.dot_dimension_numbers<[1], [0], [0], [1], [0, 0, 1, 1], [], []>} : vector<8x64xf32>, vector<64x192xf32>, vector<8x192xf32> -> vector<8x192xf32>
    %683 = vector.broadcast %6 : vector<1x192xf32> to vector<8x192xf32>
    %684 = arith.addf %682, %683 : vector<8x192xf32>
    %c7_198 = arith.constant 7 : index
    %c0_199 = arith.constant 0 : index
    %c0_200 = arith.constant 0 : index
    %685 = vector.load %arg2[%c7_198, %c0_199, %c0_200] : memref<8x8x96xbf16, #tpu.memory_space<vmem>>, vector<1x8x96xbf16>
    %686 = vector.shape_cast %685 : vector<1x8x96xbf16> to vector<8x96xbf16>
    %687 = arith.extf %686 : vector<8x96xbf16> to vector<8x96xf32>
    %c0_201 = arith.constant 0 : index
    %c0_202 = arith.constant 0 : index
    %c0_203 = arith.constant 0 : index
    %688 = vector.load %arg3[%c0_201, %c0_202, %c0_203] : memref<8x8x96xbf16, #tpu.memory_space<vmem>>, vector<1x8x96xbf16>
    %689 = vector.shape_cast %688 : vector<1x8x96xbf16> to vector<8x96xbf16>
    %690 = arith.extf %689 : vector<8x96xbf16> to vector<8x96xf32>
    %691 = vector.extract_strided_slice %684 {offsets = [0, 0], sizes = [8, 96], strides = [1, 1]} : vector<8x192xf32> to vector<8x96xf32>
    %692 = vector.extract_strided_slice %681 {offsets = [0, 0], sizes = [8, 32], strides = [1, 1]} : vector<8x64xf32> to vector<8x32xf32>
    %693 = vector.extract_strided_slice %687 {offsets = [0, 0], sizes = [8, 32], strides = [1, 1]} : vector<8x96xf32> to vector<8x32xf32>
    %694 = vector.extract_strided_slice %691 {offsets = [0, 0], sizes = [8, 32], strides = [1, 1]} : vector<8x96xf32> to vector<8x32xf32>
    %695 = arith.addf %693, %694 : vector<8x32xf32>
    %696 = arith.negf %695 : vector<8x32xf32>
    %697 = math.exp %696 : vector<8x32xf32>
    %cst_204 = arith.constant 1.000000e+00 : f32
    %698 = vector.broadcast %cst_204 : f32 to vector<8x32xf32>
    %699 = arith.addf %698, %697 : vector<8x32xf32>
    %700 = arith.divf %698, %699 : vector<8x32xf32>
    %701 = vector.extract_strided_slice %687 {offsets = [0, 32], sizes = [8, 32], strides = [1, 1]} : vector<8x96xf32> to vector<8x32xf32>
    %702 = vector.extract_strided_slice %691 {offsets = [0, 32], sizes = [8, 32], strides = [1, 1]} : vector<8x96xf32> to vector<8x32xf32>
    %703 = arith.addf %701, %702 : vector<8x32xf32>
    %704 = arith.negf %703 : vector<8x32xf32>
    %705 = math.exp %704 : vector<8x32xf32>
    %cst_205 = arith.constant 1.000000e+00 : f32
    %706 = vector.broadcast %cst_205 : f32 to vector<8x32xf32>
    %707 = arith.addf %706, %705 : vector<8x32xf32>
    %708 = arith.divf %706, %707 : vector<8x32xf32>
    %709 = vector.extract_strided_slice %687 {offsets = [0, 64], sizes = [8, 32], strides = [1, 1]} : vector<8x96xf32> to vector<8x32xf32>
    %710 = vector.extract_strided_slice %691 {offsets = [0, 64], sizes = [8, 32], strides = [1, 1]} : vector<8x96xf32> to vector<8x32xf32>
    %711 = arith.mulf %700, %710 : vector<8x32xf32>
    %712 = arith.addf %709, %711 : vector<8x32xf32>
    %713 = math.tanh %712 : vector<8x32xf32>
    %cst_206 = arith.constant 1.000000e+00 : f32
    %714 = vector.broadcast %cst_206 : f32 to vector<8x32xf32>
    %715 = arith.subf %714, %708 : vector<8x32xf32>
    %716 = arith.mulf %715, %713 : vector<8x32xf32>
    %717 = arith.mulf %708, %692 : vector<8x32xf32>
    %718 = arith.addf %716, %717 : vector<8x32xf32>
    %719 = vector.broadcast %679 : i32 to vector<8x1xi32>
    %720 = arith.cmpi slt, %719, %4 : vector<8x1xi32>
    %721 = vector.shape_cast %720 : vector<8x1xi1> to vector<8x1xi1>
    %722 = vector.broadcast %721 : vector<8x1xi1> to vector<8x32xi1>
    %723 = arith.select %722, %718, %692 : vector<8x32xi1>, vector<8x32xf32>
    %cst_207 = arith.constant 0.000000e+00 : f32
    %724 = vector.shape_cast %720 : vector<8x1xi1> to vector<8x1xi1>
    %725 = vector.broadcast %724 : vector<8x1xi1> to vector<8x32xi1>
    %726 = vector.broadcast %cst_207 : f32 to vector<8x32xf32>
    %727 = arith.select %725, %723, %726 : vector<8x32xi1>, vector<8x32xf32>
    %728 = vector.extract_strided_slice %684 {offsets = [0, 96], sizes = [8, 96], strides = [1, 1]} : vector<8x192xf32> to vector<8x96xf32>
    %729 = vector.extract_strided_slice %681 {offsets = [0, 32], sizes = [8, 32], strides = [1, 1]} : vector<8x64xf32> to vector<8x32xf32>
    %730 = vector.extract_strided_slice %690 {offsets = [0, 0], sizes = [8, 32], strides = [1, 1]} : vector<8x96xf32> to vector<8x32xf32>
    %731 = vector.extract_strided_slice %728 {offsets = [0, 0], sizes = [8, 32], strides = [1, 1]} : vector<8x96xf32> to vector<8x32xf32>
    %732 = arith.addf %730, %731 : vector<8x32xf32>
    %733 = arith.negf %732 : vector<8x32xf32>
    %734 = math.exp %733 : vector<8x32xf32>
    %cst_208 = arith.constant 1.000000e+00 : f32
    %735 = vector.broadcast %cst_208 : f32 to vector<8x32xf32>
    %736 = arith.addf %735, %734 : vector<8x32xf32>
    %737 = arith.divf %735, %736 : vector<8x32xf32>
    %738 = vector.extract_strided_slice %690 {offsets = [0, 32], sizes = [8, 32], strides = [1, 1]} : vector<8x96xf32> to vector<8x32xf32>
    %739 = vector.extract_strided_slice %728 {offsets = [0, 32], sizes = [8, 32], strides = [1, 1]} : vector<8x96xf32> to vector<8x32xf32>
    %740 = arith.addf %738, %739 : vector<8x32xf32>
    %741 = arith.negf %740 : vector<8x32xf32>
    %742 = math.exp %741 : vector<8x32xf32>
    %cst_209 = arith.constant 1.000000e+00 : f32
    %743 = vector.broadcast %cst_209 : f32 to vector<8x32xf32>
    %744 = arith.addf %743, %742 : vector<8x32xf32>
    %745 = arith.divf %743, %744 : vector<8x32xf32>
    %746 = vector.extract_strided_slice %690 {offsets = [0, 64], sizes = [8, 32], strides = [1, 1]} : vector<8x96xf32> to vector<8x32xf32>
    %747 = vector.extract_strided_slice %728 {offsets = [0, 64], sizes = [8, 32], strides = [1, 1]} : vector<8x96xf32> to vector<8x32xf32>
    %748 = arith.mulf %737, %747 : vector<8x32xf32>
    %749 = arith.addf %746, %748 : vector<8x32xf32>
    %750 = math.tanh %749 : vector<8x32xf32>
    %cst_210 = arith.constant 1.000000e+00 : f32
    %751 = vector.broadcast %cst_210 : f32 to vector<8x32xf32>
    %752 = arith.subf %751, %745 : vector<8x32xf32>
    %753 = arith.mulf %752, %750 : vector<8x32xf32>
    %754 = arith.mulf %745, %729 : vector<8x32xf32>
    %755 = arith.addf %753, %754 : vector<8x32xf32>
    %756 = vector.broadcast %680 : i32 to vector<8x1xi32>
    %757 = arith.cmpi slt, %756, %4 : vector<8x1xi32>
    %758 = vector.shape_cast %757 : vector<8x1xi1> to vector<8x1xi1>
    %759 = vector.broadcast %758 : vector<8x1xi1> to vector<8x32xi1>
    %760 = arith.select %759, %755, %729 : vector<8x32xi1>, vector<8x32xf32>
    %cst_211 = arith.constant 0.000000e+00 : f32
    %761 = vector.shape_cast %757 : vector<8x1xi1> to vector<8x1xi1>
    %762 = vector.broadcast %761 : vector<8x1xi1> to vector<8x32xi1>
    %763 = vector.broadcast %cst_211 : f32 to vector<8x32xf32>
    %764 = arith.select %762, %760, %763 : vector<8x32xi1>, vector<8x32xf32>
    %c0_212 = arith.constant 0 : index
    %c0_213 = arith.constant 0 : index
    %765 = vector.load %arg9[%c0_212, %c0_213] : memref<8x64xf32, #tpu.memory_space<vmem>>, vector<8x32xf32>
    tpu.vector_store %arg9[%c0_212, %c0_213], %723 {strides = array<i32>} : memref<8x64xf32, #tpu.memory_space<vmem>>, vector<8x32xf32>,
    %c0_214 = arith.constant 0 : index
    %c32_215 = arith.constant 32 : index
    %766 = vector.load %arg9[%c0_214, %c32_215] : memref<8x64xf32, #tpu.memory_space<vmem>>, vector<8x32xf32>
    tpu.vector_store %arg9[%c0_214, %c32_215], %760 {strides = array<i32>} : memref<8x64xf32, #tpu.memory_space<vmem>>, vector<8x32xf32>,
    %767 = arith.truncf %727 : vector<8x32xf32> to vector<8x32xbf16>
    %c7_216 = arith.constant 7 : index
    %c0_217 = arith.constant 0 : index
    %c0_218 = arith.constant 0 : index
    %768 = vector.load %arg7[%c7_216, %c0_217, %c0_218] : memref<8x8x32xbf16, #tpu.memory_space<vmem>>, vector<1x8x32xbf16>
    %769 = vector.shape_cast %768 : vector<1x8x32xbf16> to vector<8x32xbf16>
    %770 = vector.shape_cast %767 : vector<8x32xbf16> to vector<1x8x32xbf16>
    tpu.vector_store %arg7[%c7_216, %c0_217, %c0_218], %770 {strides = array<i32>} : memref<8x8x32xbf16, #tpu.memory_space<vmem>>, vector<1x8x32xbf16>,
    %771 = arith.truncf %764 : vector<8x32xf32> to vector<8x32xbf16>
    %c0_219 = arith.constant 0 : index
    %c0_220 = arith.constant 0 : index
    %c0_221 = arith.constant 0 : index
    %772 = vector.load %arg8[%c0_219, %c0_220, %c0_221] : memref<8x8x32xbf16, #tpu.memory_space<vmem>>, vector<1x8x32xbf16>
    %773 = vector.shape_cast %772 : vector<1x8x32xbf16> to vector<8x32xbf16>
    %774 = vector.shape_cast %771 : vector<8x32xbf16> to vector<1x8x32xbf16>
    tpu.vector_store %arg8[%c0_219, %c0_220, %c0_221], %774 {strides = array<i32>} : memref<8x8x32xbf16, #tpu.memory_space<vmem>>, vector<1x8x32xbf16>,
    return
  }
  func.func @transform_0(%arg0: i32, %arg1: i32) -> (i32, i32, i32) {
    %c0_i32 = arith.constant 0 : i32
    %c0_i32_0 = arith.constant 0 : i32
    return %arg1, %arg0, %c0_i32 : i32, i32, i32
  }
  func.func @transform_1(%arg0: i32, %arg1: i32) -> (i32, i32, i32) {
    %c0_i32 = arith.constant 0 : i32
    %0 = arith.subi %c0_i32, %arg1 : i32
    %c0_i32_0 = arith.constant 0 : i32
    %c0_i32_1 = arith.constant 0 : i32
    return %0, %arg0, %c0_i32_0 : i32, i32, i32
  }
  func.func @transform_2(%arg0: i32, %arg1: i32) -> (i32, i32) {
    %c0_i32 = arith.constant 0 : i32
    %c0_i32_0 = arith.constant 0 : i32
    return %arg0, %c0_i32 : i32, i32
  }
  func.func @transform_3(%arg0: i32, %arg1: i32) -> (i32, i32) {
    %c0_i32 = arith.constant 0 : i32
    %c0_i32_0 = arith.constant 0 : i32
    %c0_i32_1 = arith.constant 0 : i32
    return %c0_i32, %c0_i32_0 : i32, i32
  }
  func.func @transform_4(%arg0: i32, %arg1: i32) -> (i32, i32) {
    %c0_i32 = arith.constant 0 : i32
    %c0_i32_0 = arith.constant 0 : i32
    %c0_i32_1 = arith.constant 0 : i32
    return %c0_i32, %c0_i32_0 : i32, i32
  }
  func.func @transform_5(%arg0: i32, %arg1: i32) -> (i32, i32, i32) {
    %c0_i32 = arith.constant 0 : i32
    %c0_i32_0 = arith.constant 0 : i32
    return %arg1, %arg0, %c0_i32 : i32, i32, i32
  }
  func.func @transform_6(%arg0: i32, %arg1: i32) -> (i32, i32, i32) {
    %c0_i32 = arith.constant 0 : i32
    %0 = arith.subi %c0_i32, %arg1 : i32
    %c0_i32_0 = arith.constant 0 : i32
    %c0_i32_1 = arith.constant 0 : i32
    return %0, %arg0, %c0_i32_0 : i32, i32, i32
  }
}

</mosaic_0001>

<bundles_post_ra>
// kernel: text_encoder_forward.9
= control target key start
LH: loop header
LB: loop body
LE: loop exit
PB: predicated region body
PF: predicated region fallthrough
CT: control target
= control target key end

     0   :  { %vm59_vm0 = vcmask 261120   ;;  %s181_s0 = inlined_call_operand.vmem [shape: bf16[8,8,32], index: 0, kind: input, shape index: {}]   ;;  %s182_s1 = inlined_call_operand.vmem [shape: bf16[8,8,32], index: 1, kind: input, shape index: {}]   ;;  %s183_s2 = inlined_call_operand.vmem [shape: f32[8,8,32], index: 2, kind: output, shape index: {}]  }
   0x1   :  { %v73_v0 = vld [vmem:[%s181_s0] sm:$0xff]   ;;  %v104_v2 = vld [vmem:[%s181_s0 + $0x8] sm:$0xff]   ;;  %v105_v8 = vld [vmem:[%s181_s0 + $0x10] sm:$0xff]  }
   0x2   :  { %v89_v1 = vld [vmem:[%s182_s1] sm:$0xff]   ;;  %v74_v3 = vunpack.c.l.bf16 %v73_v0  ;;  %v75_v5 = vunpack.c.h.bf16 %v73_v0  ;;  %v107_v7 = vld [vmem:[%s182_s1 + $0x8] sm:$0xff]   ;;  %v108_v9 = vld [vmem:[%s182_s1 + $0x10] sm:$0xff]   ;;  %v78_v10 = vunpack.c.l.bf16 %v104_v2  ;;  %v79_v12 = vunpack.c.h.bf16 %v104_v2 }
   0x3   :  { %v90_v4 = vunpack.c.l.bf16 %v89_v1  ;;  %v91_v6 = vunpack.c.h.bf16 %v89_v1  ;;  %v94_v11 = vunpack.c.l.bf16 %v107_v7  ;;  %v95_v13 = vunpack.c.h.bf16 %v107_v7  ;;  %v106_v14 = vld [vmem:[%s181_s0 + $0x18] sm:$0xff]  }
   0x4   :  { %v82_v17 = vunpack.c.l.bf16 %v105_v8  ;;  %v98_v18 = vunpack.c.l.bf16 %v108_v9  ;;  %v109_v19 = vld [vmem:[%s182_s1 + $0x18] sm:$0xff]   ;;  %v83_v22 = vunpack.c.h.bf16 %v105_v8  ;;  %v99_v23 = vunpack.c.h.bf16 %v108_v9 }
   0x5   :  { %v43_v15 = vadd.f32 %v90_v4, %v74_v3  ;;  %v44_v16 = vadd.f32 %v91_v6, %v75_v5  ;;  %v45_v20 = vadd.f32 %v94_v11, %v78_v10  ;;  %v46_v21 = vadd.f32 %v95_v13, %v79_v12 }
   0x6   :  { %v47_v26 = vadd.f32 %v98_v18, %v82_v17  ;;  %v86_v27 = vunpack.c.l.bf16 %v106_v14  ;;  %v48_v30 = vadd.f32 %v99_v23, %v83_v22  ;;  %v102_v31 = vunpack.c.l.bf16 %v109_v19 }
   0x7   :  { %v51_v24 = vmul.f32 0.5, %v43_v15  ;;  %v52_v25 = vmul.f32 0.5, %v44_v16  ;;  %v53_v28 = vmul.f32 0.5, %v45_v20  ;;  %v54_v29 = vmul.f32 0.5, %v46_v21 }
   0x8   :  { %v55_v32 = vmul.f32 0.5, %v47_v26  ;;  %v87_v33 = vunpack.c.h.bf16 %v106_v14  ;;  %v103_v34 = vunpack.c.h.bf16 %v109_v19  ;;  %v56_v35 = vmul.f32 0.5, %v48_v30 }
   0x9   :  { %60 = vst.msk [vmem:[%s183_s2] sm:$0xff] %vm59_vm0, %v51_v24  ;;  %61 = vst.msk [vmem:[%s183_s2 + $0x8] sm:$0xff] %vm59_vm0, %v52_v25  ;;  %v49_v36 = vadd.f32 %v102_v31, %v86_v27 }
   0xa   :  { %62 = vst.msk [vmem:[%s183_s2 + $0x10] sm:$0xff] %vm59_vm0, %v53_v28  ;;  %63 = vst.msk [vmem:[%s183_s2 + $0x18] sm:$0xff] %vm59_vm0, %v54_v29  ;;  %v50_v37 = vadd.f32 %v103_v34, %v87_v33 }
   0xb   :  { %64 = vst.msk [vmem:[%s183_s2 + $0x20] sm:$0xff] %vm59_vm0, %v55_v32  ;;  %65 = vst.msk [vmem:[%s183_s2 + $0x28] sm:$0xff] %vm59_vm0, %v56_v35  ;;  %v57_v38 = vmul.f32 0.5, %v49_v36 }
   0xc   :  { %v58_v39 = vmul.f32 0.5, %v50_v37 }
   0xd   :  { %66 = vst.msk [vmem:[%s183_s2 + $0x30] sm:$0xff] %vm59_vm0, %v57_v38 }
   0xe   :  { %67 = vst.msk [vmem:[%s183_s2 + $0x38] sm:$0xff] %vm59_vm0, %v58_v39 }

// kernel: text_encoder_forward.5
= control target key start
LH: loop header
LB: loop body
LE: loop exit
PB: predicated region body
PF: predicated region fallthrough
CT: control target
= control target key end

     0   :  { %vm30_vm0 = vcmask 261120   ;;  %vm355_vm1 = vcmask 781312   ;;  %s763_s0 = inlined_call_operand.vmem [shape: f32[64,32], index: 0, kind: input, shape index: {}]   ;;  %s764_s3 = inlined_call_operand.vmem [shape: f32[32,192], index: 3, kind: input, shape index: {}]   ;;  %s765_s1 = inlined_call_operand.vmem [shape: f32[1,32], index: 1, kind: input, shape index: {}]   ;;  %s766_s2 = inlined_call_operand.vmem [shape: f32[1,32], index: 2, kind: input, shape index: {}]   ;;  %s767_s4 = inlined_call_operand.vmem [shape: f32[1,192], index: 4, kind: input, shape index: {}]   ;;  %s768_s5 = inlined_call_operand.vmem [shape: bf16[64,96], index: 5, kind: output, shape index: {0}]   ;;  %s769_s6 = inlined_call_operand.vmem [shape: bf16[64,96], index: 6, kind: output, shape index: {1}]  }
   0x1   :  { %v22_v0 = vld [vmem:[%s763_s0] sm:$0xff]  ;;  %v23_v1 = vld [vmem:[%s763_s0 + $0x8] sm:$0xff]  ;;  %v24_v8 = vld [vmem:[%s763_s0 + $0x10] sm:$0xff] }
   0x2   :  { %v26_v2 = vld [vmem:[%s763_s0 + $0x20] sm:$0xff]  ;;  %v31_v3 = vsel %vm30_vm0, %v22_v0, 0.0  ;;  %v34_v4 = vsel %vm30_vm0, %v23_v1, 0.0  ;;  %v27_v5 = vld [vmem:[%s763_s0 + $0x28] sm:$0xff]  ;;  %v28_v9 = vld [vmem:[%s763_s0 + $0x30] sm:$0xff]  ;;  %v37_v10 = vsel %vm30_vm0, %v24_v8, 0.0 }
   0x3   :  { %32 = vadd.xlane.f32.xlu0 %v31_v3  ;;  %35 = vadd.xlane.f32.xlu1 %v34_v4  ;;  %v43_v6 = vsel %vm30_vm0, %v26_v2, 0.0  ;;  %v46_v7 = vsel %vm30_vm0, %v27_v5, 0.0  ;;  %v49_v11 = vsel %vm30_vm0, %v28_v9, 0.0  ;;  %v25_v12 = vld [vmem:[%s763_s0 + $0x18] sm:$0xff]  ;;  %v167_v56 = vld [vmem:[%s764_s3 + $0x8] sm:$0xff]  ;;  %v166_v59 = vld [vmem:[%s764_s3] sm:$0xff] }
   0x4   :  { %v29_v13 = vld [vmem:[%s763_s0 + $0x38] sm:$0xff]  ;;  %v40_v14 = vsel %vm30_vm0, %v25_v12, 0.0  ;;  %v168_v60 = vld [vmem:[%s764_s3 + $0x10] sm:$0xff]  ;;  %v171_v62 = vld [vmem:[%s764_s3 + $0x28] sm:$0xff]  ;;  %v517_v4 = vmov 0.0  }
   0x5   :  { %v52_v15 = vsel %vm30_vm0, %v29_v13, 0.0  ;;  %v169_v57 = vld [vmem:[%s764_s3 + $0x18] sm:$0xff]  ;;  %v489_v61 = vpack.c.bf16 %v168_v60, %v166_v59  ;;  %274 = vmatprep.mubr.f32.mxu0 %v517_v4  ;;  %298 = vmatprep.mubr.f32.mxu1 %v517_v4 }
   0x6   :  { %v487_v58 = vpack.c.bf16 %v169_v57, %v167_v56  ;;  %v173_v63 = vld [vmem:[%s764_s3 + $0x38] sm:$0xff] }
   0x7   :  { %44 = vadd.xlane.f32.xlu0 %v43_v6  ;;  %47 = vadd.xlane.f32.xlu1 %v46_v7 }
   0x8   :  { %488 = vmatprep.subr.bf16.mxu0 %v487_v58  ;;  %495 = vmatprep.subr.bf16.mxu1 %v487_v58 }
   0x9   :  { %490 = vmatpush1.bf16.msra.mxu0 %v489_v61  ;;  %497 = vmatpush1.bf16.msra.mxu1 %v489_v61 }
   0xb   :  { %38 = vadd.xlane.f32.xlu0 %v37_v10  ;;  %50 = vadd.xlane.f32.xlu1 %v49_v11 }
   0xf   :  { %41 = vadd.xlane.f32.xlu0 %v40_v14  ;;  %53 = vadd.xlane.f32.xlu1 %v52_v15 }
  0x90   :  { %v33_v16 = vpop.xlane.xlu0 %32  ;;  %v36_v17 = vpop.xlane.xlu1 %35 }
  0x91   :  { %v56_v18 = vmul.f32 0.03125, %v33_v16  ;;  %v57_v19 = vmul.f32 0.03125, %v36_v17 }
  0x93   :  { %v586_v20 = vsub.f32 %v22_v0, %v56_v18  ;;  %v588_v21 = vsub.f32 %v23_v1, %v57_v19  ;;  %v491_v0 = vpack.c.bf16 %v173_v63, %v171_v62  ;;  %v170_v1 = vld [vmem:[%s764_s3 + $0x20] sm:$0xff] }
  0x94   :  { %v45_v22 = vpop.xlane.xlu0 %44  ;;  %v48_v23 = vpop.xlane.xlu1 %47 }
  0x95   :  { %v60_v24 = vmul.f32 0.03125, %v45_v22  ;;  %v61_v25 = vmul.f32 0.03125, %v48_v23  ;;  %v72_v26 = vmul.f32 %v586_v20, %v586_v20  ;;  %v73_v27 = vmul.f32 %v588_v21, %v588_v21  ;;  %492 = vmatprep.subr.bf16.mxu0 %v491_v0  ;;  %496 = vmatprep.subr.bf16.mxu1 %v491_v0 }
  0x96   :  { %v176_v0 = vlaneseq }
  0x97   :  { %v594_v28 = vsub.f32 %v26_v2, %v60_v24  ;;  %v596_v29 = vsub.f32 %v27_v5, %v61_v25  ;;  %v80_v30 = vsel %vm30_vm0, %v72_v26, 0.0  ;;  %v83_v33 = vsel %vm30_vm0, %v73_v27, 0.0  ;;  %v172_v2 = vld [vmem:[%s764_s3 + $0x30] sm:$0xff] }
  0x98   :  { %81 = vadd.xlane.f32.xlu0 %v80_v30  ;;  %v39_v31 = vpop.xlane.xlu0 %38  ;;  %v51_v32 = vpop.xlane.xlu1 %50  ;;  %v493_v3 = vpack.c.bf16 %v172_v2, %v170_v1  ;;  %v177_v1 = vshrl.u32 %v176_v0, 7 }
  0x99   :  { %v58_v34 = vmul.f32 0.03125, %v39_v31  ;;  %v62_v35 = vmul.f32 0.03125, %v51_v32  ;;  %v76_v36 = vmul.f32 %v594_v28, %v594_v28  ;;  %v77_v37 = vmul.f32 %v596_v29, %v596_v29  ;;  %v445_v31 = vld [vmem:[%s765_s1] ss:$0 sm:$0xff] }
  0x9a   :  { %494 = vmatpush1.bf16.msra.mxu0 %v493_v3  ;;  %498 = vmatpush1.bf16.msra.mxu1 %v493_v3  ;;  %v178_v2 = vsub.s32 0, %v177_v1  ;;  %v174_v3 = vld [vmem:[%s767_s4] sm:$0x3]  ;;  %s518_s4 = smov 32  }
  0x9b   :  { %v604_v38 = vsub.f32 %v24_v8, %v58_v34  ;;  %v606_v39 = vsub.f32 %v28_v9, %v62_v35  ;;  %v92_v40 = vsel %vm30_vm0, %v76_v36, 0.0  ;;  %v95_v43 = vsel %vm30_vm0, %v77_v37, 0.0  ;;  %v446_v35 = vld [vmem:[%s766_s2] ss:$0 sm:$0xff] }
  0x9c   :  { %84 = vadd.xlane.f32.xlu0 %v83_v33  ;;  %93 = vadd.xlane.f32.xlu1 %v92_v40  ;;  %v42_v41 = vpop.xlane.xlu0 %41  ;;  %v54_v42 = vpop.xlane.xlu1 %53 }
  0x9d   :  { %v59_v44 = vmul.f32 0.03125, %v42_v41  ;;  %v63_v45 = vmul.f32 0.03125, %v54_v42  ;;  %v74_v46 = vmul.f32 %v604_v38, %v604_v38  ;;  %v78_v47 = vmul.f32 %v606_v39, %v606_v39 }
  0x9f   :  { %v614_v48 = vsub.f32 %v25_v12, %v59_v44  ;;  %v616_v49 = vsub.f32 %v29_v13, %v63_v45  ;;  %v86_v50 = vsel %vm30_vm0, %v74_v46, 0.0  ;;  %v98_v51 = vsel %vm30_vm0, %v78_v47, 0.0 }
  0xa0   :  { %96 = vadd.xlane.f32.xlu1 %v95_v43  ;;  %87 = vadd.xlane.f32.xlu0 %v86_v50 }
  0xa1   :  { %v75_v52 = vmul.f32 %v614_v48, %v614_v48  ;;  %v79_v53 = vmul.f32 %v616_v49, %v616_v49 }
  0xa3   :  { %v89_v54 = vsel %vm30_vm0, %v75_v52, 0.0  ;;  %v101_v55 = vsel %vm30_vm0, %v79_v53, 0.0 }
  0xa4   :  { %99 = vadd.xlane.f32.xlu1 %v98_v51  ;;  %90 = vadd.xlane.f32.xlu0 %v89_v54 }
  0xa8   :  { %102 = vadd.xlane.f32.xlu1 %v101_v55 }
 0x125   :  { %v82_v5 = vpop.xlane.xlu0 %81 }
 0x126   :  { %v104_v6 = vmul.f32 0.03125, %v82_v5  ;;  %v182_v5 = vsub.s32 1, %v177_v1 }
 0x128   :  { %v112_v7 = vadd.f32 1e-05, %v104_v6  ;;  %v183_v6 = vrot.slane %v174_v3, %v182_v5 }
 0x129   :  { %v94_v8 = vpop.xlane.xlu1 %93  ;;  %v85_v9 = vpop.xlane.xlu0 %84 }
 0x12a   :  { %501 = vrsqrt.f32 %v112_v7  ;;  %v108_v10 = vmul.f32 0.03125, %v94_v8  ;;  %v105_v11 = vmul.f32 0.03125, %v85_v9 }
 0x12c   :  { %v116_v12 = vadd.f32 1e-05, %v108_v10  ;;  %v113_v13 = vadd.f32 1e-05, %v105_v11 }
 0x12d   :  { %v97_v14 = vpop.xlane.xlu1 %96  ;;  %v88_v15 = vpop.xlane.xlu0 %87 }
 0x12e   :  { %503 = vrsqrt.f32 %v116_v12  ;;  %v109_v16 = vmul.f32 0.03125, %v97_v14  ;;  %v106_v17 = vmul.f32 0.03125, %v88_v15 }
 0x12f   :  { %505 = vrsqrt.f32 %v113_v13 }
 0x130   :  { %v117_v18 = vadd.f32 1e-05, %v109_v16  ;;  %v114_v19 = vadd.f32 1e-05, %v106_v17 }
 0x131   :  { %v100_v22 = vpop.xlane.xlu1 %99  ;;  %v91_v23 = vpop.xlane.xlu0 %90 }
 0x132   :  { %507 = vrsqrt.f32 %v117_v18  ;;  %v110_v24 = vmul.f32 0.03125, %v100_v22  ;;  %v107_v25 = vmul.f32 0.03125, %v91_v23 }
 0x133   :  { %509 = vrsqrt.f32 %v114_v19 }
 0x134   :  { %v502_v26 = vpop.eup %501  ;;  %v118_v27 = vadd.f32 1e-05, %v110_v24  ;;  %v115_v30 = vadd.f32 1e-05, %v107_v25 }
 0x135   :  { %v103_v32 = vpop.xlane.xlu1 %102  ;;  %v128_v33 = vmul.f32 %v502_v26, %v586_v20 }
 0x136   :  { %511 = vrsqrt.f32 %v118_v27  ;;  %v111_v34 = vmul.f32 0.03125, %v103_v32 }
 0x137   :  { %513 = vrsqrt.f32 %v115_v30  ;;  %v143_v36 = vmul.f32 %v445_v31, %v128_v33 }
 0x138   :  { %v504_v37 = vpop.eup %503  ;;  %v119_v40 = vadd.f32 1e-05, %v111_v34 }
 0x139   :  { %v506_v41 = vpop.eup %505  ;;  %v158_v42 = vadd.f32 %v446_v35, %v143_v36  ;;  %v132_v43 = vmul.f32 %v504_v37, %v594_v28 }
 0x13a   :  { %515 = vrsqrt.f32 %v119_v40  ;;  %v129_v44 = vmul.f32 %v506_v41, %v588_v21 }
 0x13b   :  { %447 = vmatmul.mubr.msk.f32.vlgmr.msra.gmra.mrb[0].mxu0 %vm30_vm0, %v158_v42  ;;  %v147_v20 = vmul.f32 %v445_v31, %v132_v43 }
 0x13c   :  { %v508_v45 = vpop.eup %507  ;;  %280 = vmatprep.mubr.f32.mxu0 %v517_v4  ;;  %v144_v46 = vmul.f32 %v445_v31, %v129_v44 }
 0x13d   :  { %v510_v47 = vpop.eup %509  ;;  %v162_v50 = vadd.f32 %v446_v35, %v147_v20  ;;  %v133_v51 = vmul.f32 %v508_v45, %v596_v29 }
 0x13e   :  { %v159_v52 = vadd.f32 %v446_v35, %v144_v46  ;;  %v130_v53 = vmul.f32 %v510_v47, %v604_v38 }
 0x13f   :  { %451 = vmatmul.mubr.msk.f32.vlgmr.msra.gmra.mrb[0].mxu1 %vm30_vm0, %v162_v50  ;;  %v148_v28 = vmul.f32 %v445_v31, %v133_v51 }
 0x140   :  { %v512_v54 = vpop.eup %511  ;;  %448 = vmatmul.mubr.msk.f32.gmra.mrb[2].mxu0 %vm30_vm0, %v159_v52  ;;  %304 = vmatprep.mubr.f32.mxu1 %v517_v4  ;;  %v145_v21 = vmul.f32 %v445_v31, %v130_v53 }
 0x141   :  { %v514_v55 = vpop.eup %513  ;;  %286 = vmatprep.mubr.f32.mxu0 %v517_v4  ;;  %v163_v56 = vadd.f32 %v446_v35, %v148_v28  ;;  %v134_v57 = vmul.f32 %v512_v54, %v606_v39 }
 0x142   :  { %v160_v58 = vadd.f32 %v446_v35, %v145_v21  ;;  %v131_v29 = vmul.f32 %v514_v55, %v614_v48 }
 0x143   :  { %452 = vmatmul.mubr.msk.f32.gmra.mrb[2].mxu1 %vm30_vm0, %v163_v56  ;;  %v149_v38 = vmul.f32 %v445_v31, %v134_v57 }
 0x144   :  { %v516_v59 = vpop.eup %515  ;;  %449 = vmatmul.mubr.msk.f32.gmra.mrb[4].mxu0 %vm30_vm0, %v160_v58  ;;  %310 = vmatprep.mubr.f32.mxu1 %v517_v4  ;;  %v146_v60 = vmul.f32 %v445_v31, %v131_v29 }
 0x145   :  { %292 = vmatprep.mubr.f32.mxu0 %v517_v4  ;;  %v164_v61 = vadd.f32 %v446_v35, %v149_v38  ;;  %v135_v62 = vmul.f32 %v516_v59, %v616_v49  ;;  %v179_v49 = vrot.slane %v174_v3, %v178_v2 }
 0x146   :  { %v161_v63 = vadd.f32 %v446_v35, %v146_v60 }
 0x147   :  { %453 = vmatmul.mubr.msk.f32.gmra.mrb[4].mxu1 %vm30_vm0, %v164_v61  ;;  %v150_v39 = vmul.f32 %v445_v31, %v135_v62 }
 0x148   :  { %450 = vmatmul.mubr.msk.f32.gmra.mrb[6].mxu0 %vm30_vm0, %v161_v63  ;;  %316 = vmatprep.mubr.f32.mxu1 %v517_v4 }
 0x149   :  { %v165_v48 = vadd.f32 %v446_v35, %v150_v39 }
 0x14b   :  { %454 = vmatmul.mubr.msk.f32.gmra.mrb[6].mxu1 %vm30_vm0, %v165_v48 }
 0x20e   :  { %v276_v7 = vpop.f32.mrb[0].mxu0 }
 0x20f   :  { %v277_v8 = vadd.f32 %v276_v7, %v179_v49  ;;  %v278_v9 = vpop.f32.mrb[1].mxu0 }
 0x210   :  { %v279_v10 = vadd.f32 %v278_v9, %v183_v6 }
 0x211   :  { %v471_v11 = vpack.c.bf16 %v277_v8, %v277_v8 }
 0x212   :  { %v479_v4 = vpack.c.bf16 %v279_v10, %v277_v8  ;;  %v300_v12 = vpop.f32.mrb[0].mxu1 }
 0x213   :  { %356 = vst.msk [vmem:[%s768_s5] sm:$0xf] %vm355_vm1, %v471_v11  ;;  %v282_v13 = vpop.f32.mrb[2].mxu0  ;;  %v301_v14 = vadd.f32 %v300_v12, %v179_v49  ;;  %v302_v15 = vpop.f32.mrb[1].mxu1 }
 0x214   :  { %v283_v16 = vadd.f32 %v282_v13, %v179_v49  ;;  %v284_v17 = vpop.f32.mrb[3].mxu0  ;;  %v303_v18 = vadd.f32 %v302_v15, %v183_v6  ;;  %388 = vrot.lane.b32.xlu0 %v479_v4, %s518_s4 }
 0x215   :  { %v475_v19 = vpack.c.bf16 %v301_v14, %v301_v14  ;;  %v285_v22 = vadd.f32 %v284_v17, %v183_v6 }
 0x216   :  { %v472_v23 = vpack.c.bf16 %v283_v16, %v283_v16  ;;  %v483_v24 = vpack.c.bf16 %v303_v18, %v301_v14  ;;  %v306_v25 = vpop.f32.mrb[2].mxu1 }
 0x217   :  { %360 = vst.msk [vmem:[%s768_s5 + $0x10] sm:$0xf] %vm355_vm1, %v475_v19  ;;  %v480_v26 = vpack.c.bf16 %v285_v22, %v283_v16  ;;  %v288_v27 = vpop.f32.mrb[4].mxu0  ;;  %v307_v30 = vadd.f32 %v306_v25, %v179_v49  ;;  %v308_v31 = vpop.f32.mrb[3].mxu1 }
 0x218   :  { %357 = vst.msk [vmem:[%s768_s5 + $0x4] sm:$0xf] %vm355_vm1, %v472_v23  ;;  %v289_v32 = vadd.f32 %v288_v27, %v179_v49  ;;  %v290_v33 = vpop.f32.mrb[5].mxu0  ;;  %v309_v34 = vadd.f32 %v308_v31, %v183_v6  ;;  %396 = vrot.lane.b32.xlu0 %v483_v24, %s518_s4 }
 0x219   :  { %v476_v35 = vpack.c.bf16 %v307_v30, %v307_v30  ;;  %v291_v36 = vadd.f32 %v290_v33, %v183_v6  ;;  %390 = vrot.lane.b32.xlu1 %v480_v26, %s518_s4 }
 0x21a   :  { %v473_v37 = vpack.c.bf16 %v289_v32, %v289_v32  ;;  %v484_v40 = vpack.c.bf16 %v309_v34, %v307_v30  ;;  %v312_v41 = vpop.f32.mrb[4].mxu1 }
 0x21b   :  { %361 = vst.msk [vmem:[%s768_s5 + $0x14] sm:$0xf] %vm355_vm1, %v476_v35  ;;  %v481_v42 = vpack.c.bf16 %v291_v36, %v289_v32  ;;  %v294_v43 = vpop.f32.mrb[6].mxu0  ;;  %v313_v44 = vadd.f32 %v312_v41, %v179_v49  ;;  %v314_v20 = vpop.f32.mrb[5].mxu1 }
 0x21c   :  { %358 = vst.msk [vmem:[%s768_s5 + $0x8] sm:$0xf] %vm355_vm1, %v473_v37  ;;  %v295_v45 = vadd.f32 %v294_v43, %v179_v49  ;;  %v296_v46 = vpop.f32.mrb[7].mxu0  ;;  %v315_v47 = vadd.f32 %v314_v20, %v183_v6 }
 0x21d   :  { %v477_v50 = vpack.c.bf16 %v313_v44, %v313_v44  ;;  %v297_v51 = vadd.f32 %v296_v46, %v183_v6  ;;  %398 = vrot.lane.b32.xlu1 %v484_v40, %s518_s4 }
 0x21e   :  { %v474_v52 = vpack.c.bf16 %v295_v45, %v295_v45  ;;  %v485_v53 = vpack.c.bf16 %v315_v47, %v313_v44  ;;  %v318_v28 = vpop.f32.mrb[6].mxu1 }
 0x21f   :  { %362 = vst.msk [vmem:[%s768_s5 + $0x18] sm:$0xf] %vm355_vm1, %v477_v50  ;;  %v482_v54 = vpack.c.bf16 %v297_v51, %v295_v45  ;;  %v319_v21 = vadd.f32 %v318_v28, %v179_v49  ;;  %v320_v55 = vpop.f32.mrb[7].mxu1 }
 0x220   :  { %359 = vst.msk [vmem:[%s768_s5 + $0xc] sm:$0xf] %vm355_vm1, %v474_v52  ;;  %v321_v56 = vadd.f32 %v320_v55, %v183_v6  ;;  %400 = vrot.lane.b32.xlu0 %v485_v53, %s518_s4 }
 0x221   :  { %v478_v57 = vpack.c.bf16 %v319_v21, %v319_v21  ;;  %392 = vrot.lane.b32.xlu1 %v481_v42, %s518_s4 }
 0x222   :  { %v486_v58 = vpack.c.bf16 %v321_v56, %v319_v21 }
 0x223   :  { %363 = vst.msk [vmem:[%s768_s5 + $0x1c] sm:$0xf] %vm355_vm1, %v478_v57 }
 0x225   :  { %394 = vrot.lane.b32.xlu1 %v482_v54, %s518_s4 }
 0x229   :  { %402 = vrot.lane.b32.xlu1 %v486_v58, %s518_s4 }
 0x286   :  { %v389_v29 = vpop.permute.xlu0 %388 }
 0x287   :  { %v404_v38 = vrot.slane %v389_v29, 4 }
 0x289   :  { %v413_v59 = vsel %vm30_vm0, %v389_v29, %v404_v38 }
 0x28a   :  { %429 = vst.msk [vmem:[%s769_s6] sm:$0xf] %vm355_vm1, %v413_v59  ;;  %v397_v60 = vpop.permute.xlu0 %396 }
 0x28b   :  { %v391_v61 = vpop.permute.xlu1 %390  ;;  %v408_v62 = vrot.slane %v397_v60, 4 }
 0x28c   :  { %v405_v63 = vrot.slane %v391_v61, 4 }
 0x28d   :  { %v417_v39 = vsel %vm30_vm0, %v397_v60, %v408_v62 }
 0x28e   :  { %v414_v48 = vsel %vm30_vm0, %v391_v61, %v405_v63  ;;  %433 = vst.msk [vmem:[%s769_s6 + $0x10] sm:$0xf] %vm355_vm1, %v417_v39 }
 0x28f   :  { %430 = vst.msk [vmem:[%s769_s6 + $0x4] sm:$0xf] %vm355_vm1, %v414_v48  ;;  %v399_v0 = vpop.permute.xlu1 %398 }
 0x290   :  { %v409_v1 = vrot.slane %v399_v0, 4 }
 0x292   :  { %v418_v2 = vsel %vm30_vm0, %v399_v0, %v409_v1  ;;  %v401_v3 = vpop.permute.xlu0 %400 }
 0x293   :  { %434 = vst.msk [vmem:[%s769_s6 + $0x14] sm:$0xf] %vm355_vm1, %v418_v2  ;;  %v393_v5 = vpop.permute.xlu1 %392  ;;  %v410_v49 = vrot.slane %v401_v3, 4 }
 0x294   :  { %v406_v6 = vrot.slane %v393_v5, 4 }
 0x295   :  { %v419_v7 = vsel %vm30_vm0, %v401_v3, %v410_v49 }
 0x296   :  { %v415_v8 = vsel %vm30_vm0, %v393_v5, %v406_v6  ;;  %435 = vst.msk [vmem:[%s769_s6 + $0x18] sm:$0xf] %vm355_vm1, %v419_v7 }
 0x297   :  { %431 = vst.msk [vmem:[%s769_s6 + $0x8] sm:$0xf] %vm355_vm1, %v415_v8  ;;  %v395_v9 = vpop.permute.xlu1 %394 }
 0x298   :  { %v407_v10 = vrot.slane %v395_v9, 4 }
 0x29a   :  { %v416_v11 = vsel %vm30_vm0, %v395_v9, %v407_v10 }
 0x29b   :  { %432 = vst.msk [vmem:[%s769_s6 + $0xc] sm:$0xf] %vm355_vm1, %v416_v11  ;;  %v403_v4 = vpop.permute.xlu1 %402 }
 0x29c   :  { %v411_v12 = vrot.slane %v403_v4, 4 }
 0x29e   :  { %v420_v13 = vsel %vm30_vm0, %v403_v4, %v411_v12 }
 0x29f   :  { %436 = vst.msk [vmem:[%s769_s6 + $0x1c] sm:$0xf] %vm355_vm1, %v420_v13 }

// kernel: text_encoder_forward.7
= control target key start
LH: loop header
LB: loop body
LE: loop exit
PB: predicated region body
PF: predicated region fallthrough
CT: control target
= control target key end

     0   :  { %v570_v3 = vmov 0   ;;  %vm75_vm0 = vcmask 261120   ;;  %v332_v33 = vlaneseq  ;;  %vm390_vm1 = vcmask 781312   ;;  %s790_s3 = inlined_call_operand.vmem [shape: f32[32,192], index: 3, kind: input, shape index: {}]   ;;  %s791_s2 = inlined_call_operand.vmem [shape: f32[32,192], index: 2, kind: input, shape index: {}]   ;;  %s792_s1 = inlined_call_operand.vmem [shape: bf16[64,32], index: 1, kind: input, shape index: {}]   ;;  %s793_s0 = inlined_call_operand.vmem [shape: bf16[64,32], index: 0, kind: input, shape index: {}]   ;;  %s794_s4 = inlined_call_operand.vmem [shape: f32[1,192], index: 4, kind: input, shape index: {}]   ;;  %s795_s5 = inlined_call_operand.vmem [shape: bf16[64,96], index: 5, kind: output, shape index: {0}]   ;;  %s796_s6 = inlined_call_operand.vmem [shape: bf16[64,96], index: 6, kind: output, shape index: {1}]  }
   0x1   :  { %v48_v0 = vld [vmem:[%s790_s3 + $0x8] sm:$0xff]  ;;  %v50_v1 = vld [vmem:[%s790_s3 + $0x18] sm:$0xff]  ;;  %152 = vmatprep.mubr.bf16.mxu1 %v570_v3  ;;  %289 = vmatprep.mubr.bf16.mxu0 %v570_v3  ;;  %v47_v6 = vld [vmem:[%s790_s3] sm:$0xff] }
   0x2   :  { %v32_v2 = vld [vmem:[%s791_s2 + $0x8] sm:$0xff]  ;;  %v528_v4 = vpack.c.bf16 %v50_v1, %v48_v0  ;;  %v34_v5 = vld [vmem:[%s791_s2 + $0x18] sm:$0xff]  ;;  %v49_v7 = vld [vmem:[%s790_s3 + $0x10] sm:$0xff]  ;;  %v333_v34 = vshrl.u32 %v332_v33, 7 }
   0x3   :  { %v536_v8 = vpack.c.bf16 %v34_v5, %v32_v2  ;;  %v530_v9 = vpack.c.bf16 %v49_v7, %v47_v6  ;;  %v31_v10 = vld [vmem:[%s791_s2] sm:$0xff]  ;;  %v33_v11 = vld [vmem:[%s791_s2 + $0x10] sm:$0xff]  ;;  %v52_v12 = vld [vmem:[%s790_s3 + $0x28] sm:$0xff] }
   0x4   :  { %529 = vmatprep.subr.bf16.mxu1 %v528_v4  ;;  %v538_v13 = vpack.c.bf16 %v33_v11, %v31_v10  ;;  %v54_v14 = vld [vmem:[%s790_s3 + $0x38] sm:$0xff]  ;;  %v36_v15 = vld [vmem:[%s791_s2 + $0x28] sm:$0xff]  ;;  %v51_v19 = vld [vmem:[%s790_s3 + $0x20] sm:$0xff]  ;;  %v334_v35 = vsub.s32 0, %v333_v34  ;;  %v338_v37 = vsub.s32 1, %v333_v34 }
   0x5   :  { %v38_v16 = vld [vmem:[%s791_s2 + $0x38] sm:$0xff]  ;;  %537 = vmatprep.subr.bf16.mxu0 %v536_v8  ;;  %531 = vmatpush1.bf16.msra.mxu1 %v530_v9  ;;  %v532_v17 = vpack.c.bf16 %v54_v14, %v52_v12  ;;  %v53_v20 = vld [vmem:[%s790_s3 + $0x30] sm:$0xff]  ;;  %v35_v21 = vld [vmem:[%s791_s2 + $0x20] sm:$0xff] }
   0x6   :  { %v540_v18 = vpack.c.bf16 %v38_v16, %v36_v15  ;;  %539 = vmatpush1.bf16.msra.mxu0 %v538_v13  ;;  %v534_v22 = vpack.c.bf16 %v53_v20, %v51_v19  ;;  %v37_v23 = vld [vmem:[%s791_s2 + $0x30] sm:$0xff]  ;;  %v562_v25 = vld [vmem:[%s792_s1] sm:$0xff]   ;;  %v564_v27 = vld [vmem:[%s792_s1 + $0x8] sm:$0xff]  }
   0x7   :  { %533 = vmatprep.subr.bf16.mxu1 %v532_v17  ;;  %v542_v24 = vpack.c.bf16 %v37_v23, %v35_v21  ;;  %v563_v26 = vld [vmem:[%s793_s0] sm:$0xff]   ;;  %v565_v28 = vld [vmem:[%s793_s0 + $0x8] sm:$0xff]   ;;  %v566_v29 = vld [vmem:[%s792_s1 + $0x10] sm:$0xff]  }
   0x8   :  { %541 = vmatprep.subr.bf16.mxu0 %v540_v18  ;;  %v567_v30 = vld [vmem:[%s793_s0 + $0x10] sm:$0xff]   ;;  %v568_v31 = vld [vmem:[%s792_s1 + $0x18] sm:$0xff]   ;;  %v330_v36 = vld [vmem:[%s794_s4] sm:$0x3]  ;;  %s571_s4 = smov 32  }
   0x9   :  { %535 = vmatpush1.bf16.msra.mxu1 %v534_v22  ;;  %v569_v32 = vld [vmem:[%s793_s0 + $0x18] sm:$0xff]   ;;  %v690_v39 = vrot.slane %v330_v36, %v334_v35  ;;  %v692_v42 = vrot.slane %v330_v36, %v338_v37 }
   0xa   :  { %543 = vmatpush1.bf16.msra.mxu0 %v542_v24 }
   0xc   :  { %484 = vmatmul.mubr.msk.bf16.vlgmr.msra.gmra.mrb[0].mxu1 %vm75_vm0, %v562_v25 }
   0xd   :  { %492 = vmatmul.mubr.msk.bf16.vlgmr.msra.gmra.mrb[0].mxu0 %vm75_vm0, %v563_v26  ;;  %162 = vmatprep.mubr.bf16.mxu1 %v570_v3 }
   0xe   :  { %299 = vmatprep.mubr.bf16.mxu0 %v570_v3 }
  0x14   :  { %485 = vmatmul.mubr.msk.bf16.gmra.mrb[4].mxu1 %vm75_vm0, %v564_v27 }
  0x15   :  { %493 = vmatmul.mubr.msk.bf16.gmra.mrb[4].mxu0 %vm75_vm0, %v565_v28  ;;  %172 = vmatprep.mubr.bf16.mxu1 %v570_v3 }
  0x16   :  { %309 = vmatprep.mubr.bf16.mxu0 %v570_v3 }
  0x1c   :  { %486 = vmatmul.mubr.msk.bf16.gmra.mrb[8].mxu1 %vm75_vm0, %v566_v29 }
  0x1d   :  { %494 = vmatmul.mubr.msk.bf16.gmra.mrb[8].mxu0 %vm75_vm0, %v567_v30  ;;  %182 = vmatprep.mubr.bf16.mxu1 %v570_v3 }
  0x1e   :  { %319 = vmatprep.mubr.bf16.mxu0 %v570_v3 }
  0x24   :  { %487 = vmatmul.mubr.msk.bf16.gmra.mrb[12].mxu1 %vm75_vm0, %v568_v31 }
  0x25   :  { %495 = vmatmul.mubr.msk.bf16.gmra.mrb[12].mxu0 %vm75_vm0, %v569_v32 }
  0xdf   :  { %v154_v38 = vpop.f32.mrb[0].mxu1 }
  0xe0   :  { %v291_v40 = vpop.f32.mrb[0].mxu0  ;;  %v156_v41 = vpop.f32.mrb[1].mxu1 }
  0xe1   :  { %v292_v43 = vadd.f32 %v291_v40, %v154_v38  ;;  %v293_v44 = vpop.f32.mrb[1].mxu0  ;;  %v158_v45 = vpop.f32.mrb[2].mxu1 }
  0xe2   :  { %v294_v46 = vadd.f32 %v293_v44, %v156_v41  ;;  %v295_v47 = vpop.f32.mrb[2].mxu0  ;;  %v160_v48 = vpop.f32.mrb[3].mxu1 }
  0xe3   :  { %v342_v49 = vadd.f32 %v690_v39, %v292_v43  ;;  %v296_v50 = vadd.f32 %v295_v47, %v158_v45  ;;  %v297_v51 = vpop.f32.mrb[3].mxu0 }
  0xe4   :  { %v343_v52 = vadd.f32 %v692_v42, %v294_v46  ;;  %v298_v53 = vadd.f32 %v297_v51, %v160_v48 }
  0xe5   :  { %v512_v54 = vpack.c.bf16 %v342_v49, %v342_v49  ;;  %v344_v55 = vadd.f32 %v690_v39, %v296_v50 }
  0xe6   :  { %v345_v56 = vadd.f32 %v692_v42, %v298_v53  ;;  %v520_v57 = vpack.c.bf16 %v343_v52, %v342_v49 }
  0xe7   :  { %391 = vst.msk [vmem:[%s795_s5] sm:$0xf] %vm390_vm1, %v512_v54  ;;  %v513_v58 = vpack.c.bf16 %v344_v55, %v344_v55  ;;  %v164_v59 = vpop.f32.mrb[4].mxu1 }
  0xe8   :  { %v301_v60 = vpop.f32.mrb[4].mxu0  ;;  %423 = vrot.lane.b32.xlu0 %v520_v57, %s571_s4  ;;  %v166_v61 = vpop.f32.mrb[5].mxu1  ;;  %v521_v62 = vpack.c.bf16 %v345_v56, %v344_v55 }
  0xe9   :  { %392 = vst.msk [vmem:[%s795_s5 + $0x4] sm:$0xf] %vm390_vm1, %v513_v58  ;;  %v302_v63 = vadd.f32 %v301_v60, %v164_v59  ;;  %v303_v0 = vpop.f32.mrb[5].mxu0  ;;  %v168_v1 = vpop.f32.mrb[6].mxu1 }
  0xea   :  { %v304_v2 = vadd.f32 %v303_v0, %v166_v61  ;;  %v305_v3 = vpop.f32.mrb[6].mxu0  ;;  %v170_v4 = vpop.f32.mrb[7].mxu1 }
  0xeb   :  { %v346_v5 = vadd.f32 %v690_v39, %v302_v63  ;;  %v306_v6 = vadd.f32 %v305_v3, %v168_v1  ;;  %v307_v7 = vpop.f32.mrb[7].mxu0 }
  0xec   :  { %v347_v8 = vadd.f32 %v692_v42, %v304_v2  ;;  %v308_v9 = vadd.f32 %v307_v7, %v170_v4  ;;  %425 = vrot.lane.b32.xlu0 %v521_v62, %s571_s4 }
  0xed   :  { %v514_v10 = vpack.c.bf16 %v346_v5, %v346_v5  ;;  %v348_v11 = vadd.f32 %v690_v39, %v306_v6 }
  0xee   :  { %v349_v12 = vadd.f32 %v692_v42, %v308_v9  ;;  %v522_v13 = vpack.c.bf16 %v347_v8, %v346_v5 }
  0xef   :  { %393 = vst.msk [vmem:[%s795_s5 + $0x8] sm:$0xf] %vm390_vm1, %v514_v10  ;;  %v515_v14 = vpack.c.bf16 %v348_v11, %v348_v11  ;;  %v174_v15 = vpop.f32.mrb[8].mxu1 }
  0xf0   :  { %v311_v16 = vpop.f32.mrb[8].mxu0  ;;  %427 = vrot.lane.b32.xlu1 %v522_v13, %s571_s4  ;;  %v176_v17 = vpop.f32.mrb[9].mxu1  ;;  %v523_v18 = vpack.c.bf16 %v349_v12, %v348_v11 }
  0xf1   :  { %394 = vst.msk [vmem:[%s795_s5 + $0xc] sm:$0xf] %vm390_vm1, %v515_v14  ;;  %v312_v19 = vadd.f32 %v311_v16, %v174_v15  ;;  %v313_v20 = vpop.f32.mrb[9].mxu0  ;;  %v178_v21 = vpop.f32.mrb[10].mxu1 }
  0xf2   :  { %v314_v22 = vadd.f32 %v313_v20, %v176_v17  ;;  %v315_v23 = vpop.f32.mrb[10].mxu0  ;;  %v180_v24 = vpop.f32.mrb[11].mxu1 }
  0xf3   :  { %v350_v25 = vadd.f32 %v690_v39, %v312_v19  ;;  %v316_v26 = vadd.f32 %v315_v23, %v178_v21  ;;  %v317_v27 = vpop.f32.mrb[11].mxu0 }
  0xf4   :  { %v351_v28 = vadd.f32 %v692_v42, %v314_v22  ;;  %v318_v29 = vadd.f32 %v317_v27, %v180_v24  ;;  %429 = vrot.lane.b32.xlu1 %v523_v18, %s571_s4 }
  0xf5   :  { %v516_v30 = vpack.c.bf16 %v350_v25, %v350_v25  ;;  %v352_v31 = vadd.f32 %v690_v39, %v316_v26 }
  0xf6   :  { %v353_v32 = vadd.f32 %v692_v42, %v318_v29  ;;  %v524_v33 = vpack.c.bf16 %v351_v28, %v350_v25 }
  0xf7   :  { %395 = vst.msk [vmem:[%s795_s5 + $0x10] sm:$0xf] %vm390_vm1, %v516_v30  ;;  %v517_v34 = vpack.c.bf16 %v352_v31, %v352_v31  ;;  %v184_v35 = vpop.f32.mrb[12].mxu1 }
  0xf8   :  { %v321_v36 = vpop.f32.mrb[12].mxu0  ;;  %431 = vrot.lane.b32.xlu0 %v524_v33, %s571_s4  ;;  %v186_v37 = vpop.f32.mrb[13].mxu1  ;;  %v525_v38 = vpack.c.bf16 %v353_v32, %v352_v31 }
  0xf9   :  { %396 = vst.msk [vmem:[%s795_s5 + $0x14] sm:$0xf] %vm390_vm1, %v517_v34  ;;  %v322_v40 = vadd.f32 %v321_v36, %v184_v35  ;;  %v323_v41 = vpop.f32.mrb[13].mxu0  ;;  %v188_v43 = vpop.f32.mrb[14].mxu1 }
  0xfa   :  { %v324_v44 = vadd.f32 %v323_v41, %v186_v37  ;;  %v325_v45 = vpop.f32.mrb[14].mxu0  ;;  %433 = vrot.lane.b32.xlu1 %v525_v38, %s571_s4  ;;  %v190_v46 = vpop.f32.mrb[15].mxu1 }
  0xfb   :  { %v354_v47 = vadd.f32 %v690_v39, %v322_v40  ;;  %v326_v48 = vadd.f32 %v325_v45, %v188_v43  ;;  %v327_v49 = vpop.f32.mrb[15].mxu0 }
  0xfc   :  { %v355_v50 = vadd.f32 %v692_v42, %v324_v44  ;;  %v328_v51 = vadd.f32 %v327_v49, %v190_v46 }
  0xfd   :  { %v518_v52 = vpack.c.bf16 %v354_v47, %v354_v47  ;;  %v356_v53 = vadd.f32 %v690_v39, %v326_v48 }
  0xfe   :  { %v357_v54 = vadd.f32 %v692_v42, %v328_v51  ;;  %v526_v55 = vpack.c.bf16 %v355_v50, %v354_v47 }
  0xff   :  { %397 = vst.msk [vmem:[%s795_s5 + $0x18] sm:$0xf] %vm390_vm1, %v518_v52  ;;  %v519_v56 = vpack.c.bf16 %v356_v53, %v356_v53 }
 0x100   :  { %435 = vrot.lane.b32.xlu0 %v526_v55, %s571_s4  ;;  %v527_v57 = vpack.c.bf16 %v357_v54, %v356_v53 }
 0x101   :  { %398 = vst.msk [vmem:[%s795_s5 + $0x1c] sm:$0xf] %vm390_vm1, %v519_v56 }
 0x102   :  { %437 = vrot.lane.b32.xlu1 %v527_v57, %s571_s4 }
 0x15a   :  { %v424_v39 = vpop.permute.xlu0 %423 }
 0x15b   :  { %v439_v58 = vrot.slane %v424_v39, 4 }
 0x15d   :  { %v448_v42 = vsel %vm75_vm0, %v424_v39, %v439_v58 }
 0x15e   :  { %464 = vst.msk [vmem:[%s796_s6] sm:$0xf] %vm390_vm1, %v448_v42  ;;  %v426_v59 = vpop.permute.xlu0 %425 }
 0x15f   :  { %v440_v60 = vrot.slane %v426_v59, 4 }
 0x161   :  { %v449_v61 = vsel %vm75_vm0, %v426_v59, %v440_v60 }
 0x162   :  { %465 = vst.msk [vmem:[%s796_s6 + $0x4] sm:$0xf] %vm390_vm1, %v449_v61  ;;  %v428_v62 = vpop.permute.xlu1 %427 }
 0x163   :  { %v441_v63 = vrot.slane %v428_v62, 4 }
 0x165   :  { %v450_v0 = vsel %vm75_vm0, %v428_v62, %v441_v63 }
 0x166   :  { %466 = vst.msk [vmem:[%s796_s6 + $0x8] sm:$0xf] %vm390_vm1, %v450_v0  ;;  %v430_v1 = vpop.permute.xlu1 %429 }
 0x167   :  { %v442_v2 = vrot.slane %v430_v1, 4 }
 0x169   :  { %v451_v3 = vsel %vm75_vm0, %v430_v1, %v442_v2 }
 0x16a   :  { %467 = vst.msk [vmem:[%s796_s6 + $0xc] sm:$0xf] %vm390_vm1, %v451_v3  ;;  %v432_v4 = vpop.permute.xlu0 %431 }
 0x16b   :  { %v443_v5 = vrot.slane %v432_v4, 4 }
 0x16c   :  { %v434_v6 = vpop.permute.xlu1 %433 }
 0x16d   :  { %v452_v7 = vsel %vm75_vm0, %v432_v4, %v443_v5  ;;  %v444_v8 = vrot.slane %v434_v6, 4 }
 0x16e   :  { %468 = vst.msk [vmem:[%s796_s6 + $0x10] sm:$0xf] %vm390_vm1, %v452_v7 }
 0x16f   :  { %v453_v9 = vsel %vm75_vm0, %v434_v6, %v444_v8 }
 0x170   :  { %469 = vst.msk [vmem:[%s796_s6 + $0x14] sm:$0xf] %vm390_vm1, %v453_v9 }
 0x172   :  { %v436_v10 = vpop.permute.xlu0 %435 }
 0x173   :  { %v445_v11 = vrot.slane %v436_v10, 4 }
 0x174   :  { %v438_v12 = vpop.permute.xlu1 %437 }
 0x175   :  { %v454_v13 = vsel %vm75_vm0, %v436_v10, %v445_v11  ;;  %v446_v14 = vrot.slane %v438_v12, 4 }
 0x176   :  { %470 = vst.msk [vmem:[%s796_s6 + $0x18] sm:$0xf] %vm390_vm1, %v454_v13 }
 0x177   :  { %v455_v15 = vsel %vm75_vm0, %v438_v12, %v446_v14 }
 0x178   :  { %471 = vst.msk [vmem:[%s796_s6 + $0x1c] sm:$0xf] %vm390_vm1, %v455_v15 }

// kernel: text_encoder_forward.6
= control target key start
LH: loop header
LB: loop body
LE: loop exit
PB: predicated region body
PF: predicated region fallthrough
CT: control target
= control target key end

     0   :  { %vm63_vm0 = vcmask 523264   ;;  %v2044_v3 = vmov 0.0   ;;  %v86_v26 = vlaneseq  ;;  %v2045_v31 = vmov 0   ;;  %s2046_s30 = smov 64   ;;  %s2048_s7 = smov 32   ;;  %s2648_s3 = inlined_call_operand.vmem [shape: f32[64,192], index: 3, kind: input, shape index: {}]   ;;  %s2649_s4 = inlined_call_operand.vmem [shape: f32[1,192], index: 4, kind: input, shape index: {}]   ;;  %s2650_s0 = inlined_call_operand.vmem [shape: bf16[8,8,96], index: 0, kind: input, shape index: {}]   ;;  %s2651_s1 = inlined_call_operand.vmem [shape: bf16[8,8,96], index: 1, kind: input, shape index: {}]   ;;  %s2652_s2 = inlined_call_operand.vmem [shape: s32[8,1], index: 2, kind: input, shape index: {}]   ;;  %s2653_s6 = inlined_call_operand.vmem [shape: bf16[8,8,32], index: 6, kind: output, shape index: {1}]   ;;  %s2654_s5 = inlined_call_operand.vmem [shape: bf16[8,8,32], index: 5, kind: output, shape index: {0}]  }
   0x1   :  { %v67_v0 = vld [vmem:[%s2648_s3 + $0x8] sm:$0xff]  ;;  %v69_v1 = vld [vmem:[%s2648_s3 + $0x18] sm:$0xff]  ;;  %v66_v2 = vld [vmem:[%s2648_s3] sm:$0xff]  ;;  %164 = vmatprep.mubr.f32.mxu0 %v2044_v3  ;;  %64 = vst.msk [vmem:[#allocation2] sm:$0xff] %vm63_vm0, %v2044_v3  ;;  %358 = vmatprep.mubr.f32.mxu1 %v2044_v3  ;;  %vm266_vm5 = vcmask 261120   ;;  %vm268_vm6 = vcmask 523520  }
   0x2   :  { %v2097_v4 = vpack.c.bf16 %v69_v1, %v67_v0  ;;  %v68_v5 = vld [vmem:[%s2648_s3 + $0x10] sm:$0xff]  ;;  %v71_v6 = vld [vmem:[%s2648_s3 + $0x28] sm:$0xff]  ;;  %v73_v7 = vld [vmem:[%s2648_s3 + $0x38] sm:$0xff]  ;;  %v87_v27 = vshrl.u32 %v86_v26, 7  ;;  %1914 = vset.pattern.permute.xlu1 %v2045_v31  ;;  %1915 = vset.pattern.permute.xlu0 %v2045_v31 }
   0x3   :  { %v2108_v8 = vpack.c.bf16 %v68_v5, %v66_v2  ;;  %v2110_v9 = vpack.c.bf16 %v73_v7, %v71_v6  ;;  %v70_v10 = vld [vmem:[%s2648_s3 + $0x20] sm:$0xff]  ;;  %v72_v11 = vld [vmem:[%s2648_s3 + $0x30] sm:$0xff]  ;;  %v75_v12 = vld [vmem:[%s2648_s3 + $0x48] sm:$0xff] }
   0x4   :  { %1782 = vmatprep.subr.bf16.mxu0 %v2097_v4  ;;  %v77_v13 = vld [vmem:[%s2648_s3 + $0x58] sm:$0xff]  ;;  %1798 = vmatprep.subr.bf16.mxu1 %v2097_v4  ;;  %v2127_v14 = vpack.c.bf16 %v72_v11, %v70_v10  ;;  %v74_v16 = vld [vmem:[%s2648_s3 + $0x40] sm:$0xff]  ;;  %v76_v17 = vld [vmem:[%s2648_s3 + $0x50] sm:$0xff]  ;;  %v88_v28 = vsub.s32 0, %v87_v27  ;;  %v92_v30 = vsub.s32 1, %v87_v27 }
   0x5   :  { %1784 = vmatpush1.bf16.msra.mxu0 %v2108_v8  ;;  %1800 = vmatpush1.bf16.msra.mxu1 %v2108_v8  ;;  %v2131_v15 = vpack.c.bf16 %v77_v13, %v75_v12  ;;  %v79_v18 = vld [vmem:[%s2648_s3 + $0x68] sm:$0xff]  ;;  %v81_v19 = vld [vmem:[%s2648_s3 + $0x78] sm:$0xff]  ;;  %v2147_v20 = vpack.c.bf16 %v76_v17, %v74_v16  ;;  %v78_v22 = vld [vmem:[%s2648_s3 + $0x60] sm:$0xff] }
   0x6   :  { %1786 = vmatprep.subr.bf16.mxu0 %v2110_v9  ;;  %1802 = vmatprep.subr.bf16.mxu1 %v2110_v9  ;;  %v2151_v21 = vpack.c.bf16 %v81_v19, %v79_v18  ;;  %v80_v23 = vld [vmem:[%s2648_s3 + $0x70] sm:$0xff]  ;;  %v82_v29 = vld [vmem:[%s2649_s4] sm:$0x3]  ;;  %s2047_s4 = smov 96   ;;  %v1674_v44 = vld [vmem:[%s2651_s1 + $0x1c] sm:$0xf] }
   0x7   :  { %v2161_v24 = vpack.c.bf16 %v80_v23, %v78_v22  ;;  %v2188_v32 = vrot.slane %v82_v29, %v88_v28  ;;  %v2190_v33 = vrot.slane %v82_v29, %v92_v30  ;;  %v171_v38 = vld [vmem:[%s2650_s0] sm:$0xf]  ;;  %v175_v49 = vunpack.c.l.bf16 %v1674_v44 }
   0x8   :  { %v2167_v25 = vld [vmem:[#allocation2] sm:$0xff]  ;;  %v172_v39 = vunpack.c.l.bf16 %v171_v38 }
   0x9   :  { %1788 = vmatpush1.bf16.msra.mxu0 %v2127_v14  ;;  %1804 = vmatpush1.bf16.msra.mxu1 %v2127_v14  ;;  %v2206_v45 = vld [vmem:[%s2652_s2] sm:$0xff] }
   0xa   :  { %1790 = vmatprep.subr.bf16.mxu0 %v2131_v15  ;;  %1806 = vmatprep.subr.bf16.mxu1 %v2131_v15  ;;  %vm1676_vm1 = vcmp.gt.s32.totalorder %v2206_v45, 0  ;;  %vm1679_vm2 = vcmp.gt.s32.totalorder %v2206_v45, 7  ;;  %vm1687_vm7 = vcmp.gt.s32.totalorder %v2206_v45, 1  ;;  %vm1690_vm8 = vcmp.gt.s32.totalorder %v2206_v45, 6 }
   0xb   :  { %v2211_v51 = vsel %vm1676_vm1, 1, %v2045_v31  ;;  %v2218_v54 = vsel %vm1679_vm2, 1, %v2045_v31  ;;  %vm1699_vm11 = vcmp.gt.s32.totalorder %v2206_v45, 2  ;;  %vm1702_vm12 = vcmp.gt.s32.totalorder %v2206_v45, 5 }
   0xc   :  { %vm1711_vm15 = vcmp.gt.s32.totalorder %v2206_v45, 3  ;;  %vm1714_vm1 = vcmp.gt.s32.totalorder %v2206_v45, 4 }
   0xd   :  { %1792 = vmatpush1.bf16.msra.mxu0 %v2147_v20  ;;  %1808 = vmatpush1.bf16.msra.mxu1 %v2147_v20 }
   0xe   :  { %1794 = vmatprep.subr.bf16.mxu0 %v2151_v21  ;;  %1810 = vmatprep.subr.bf16.mxu1 %v2151_v21 }
  0x11   :  { %1796 = vmatpush1.bf16.msra.mxu0 %v2161_v24  ;;  %1812 = vmatpush1.bf16.msra.mxu1 %v2161_v24 }
  0x12   :  { %1814 = vmatprep.subr.bf16.mxu0 %v2097_v4  ;;  %1830 = vmatprep.subr.bf16.mxu1 %v2097_v4 }
  0x14   :  { %1673 = vmatmul.mubr.msk.f32.vlgmr.msra.gmra.mrb[0].mxu0 %vm63_vm0, %v2167_v25 }
  0x15   :  { %1816 = vmatpush1.bf16.msra.mxu0 %v2108_v8  ;;  %551 = vmatprep.mubr.f32.mxu0 %v2044_v3 }
  0x16   :  { %1818 = vmatprep.subr.bf16.mxu0 %v2110_v9 }
  0x19   :  { %1820 = vmatpush1.bf16.msra.mxu0 %v2127_v14 }
  0x1a   :  { %1822 = vmatprep.subr.bf16.mxu0 %v2131_v15 }
  0x1d   :  { %1824 = vmatpush1.bf16.msra.mxu0 %v2147_v20 }
  0x1e   :  { %1826 = vmatprep.subr.bf16.mxu0 %v2151_v21 }
  0x21   :  { %1828 = vmatpush1.bf16.msra.mxu0 %v2161_v24 }
  0x22   :  { %1846 = vmatprep.subr.bf16.mxu0 %v2097_v4 }
  0xe7   :  { %v166_v34 = vpop.f32.mrb[0].mxu0 }
  0xe8   :  { %v167_v35 = vadd.f32 %v166_v34, %v2188_v32  ;;  %v168_v36 = vpop.f32.mrb[1].mxu0 }
  0xe9   :  { %v169_v37 = vadd.f32 %v168_v36, %v2190_v33 }
  0xea   :  { %184 = vrot.lane.b32.xlu0 %v167_v35, %s2046_s30  ;;  %v176_v40 = vadd.f32 %v172_v39, %v167_v35 }
  0xeb   :  { %235 = vrot.lane.b32.xlu1 %v169_v37, %s2047_s4 }
  0xec   :  { %v1675_v41 = vmul.f32 -1.442695, %v176_v40 }
  0xee   :  { %214 = vrot.lane.b32.xlu0 %v167_v35, %s2048_s7  ;;  %1916 = vpow2.f32 %v1675_v41 }
  0xf8   :  { %v1917_v42 = vpop.eup %1916 }
  0xf9   :  { %v180_v43 = vadd.f32 1.0, %v1917_v42 }
  0xfb   :  { %1918 = vrcp.f32 %v180_v43  ;;  %v2255_v43 = vld [vmem:[%s2650_s0 + $0x4] sm:$0xff]  }
  0xfc   :  { %v367_v44 = vunpack.c.l.bf16 %v2255_v43 }
 0x105   :  { %v1919_v46 = vpop.eup %1918 }
 0x106   :  { %v194_v6 = vsub.f32 1.0, %v1919_v46 }
 0x15c   :  { %v185_v47 = vpop.permute.xlu0 %184 }
 0x15d   :  { %v187_v48 = vmul.f32 %v1919_v46, %v185_v47  ;;  %v236_v58 = vpop.permute.xlu1 %235 }
 0x15f   :  { %189 = vrot.lane.b32.xlu1 %v187_v48, %s2046_s30 }
 0x160   :  { %v215_v50 = vpop.permute.xlu0 %214 }
 0x161   :  { %v217_v52 = vadd.f32 %v215_v50, %v175_v49  ;;  %v2261_v50 = vld [vmem:[%s2651_s1 + $0x14] sm:$0xff]  }
 0x163   :  { %v1677_v53 = vmul.f32 -1.442695, %v217_v52  ;;  %209 = vperm.xlu1 %1914, %v2211_v51   ;;  %v370_v52 = vunpack.c.h.bf16 %v2261_v50 }
 0x165   :  { %1920 = vpow2.f32 %v1677_v53 }
 0x167   :  { %200 = vrot.lane.b32.xlu1 %v2167_v25, %s2048_s7 }
 0x16b   :  { %257 = vperm.xlu1 %1914, %v2218_v54  }
 0x16f   :  { %v1921_v55 = vpop.eup %1920 }
 0x170   :  { %v221_v56 = vadd.f32 1.0, %v1921_v55 }
 0x172   :  { %1922 = vrcp.f32 %v221_v56 }
 0x17c   :  { %v1923_v57 = vpop.eup %1922 }
 0x17d   :  { %v238_v59 = vmul.f32 %v1923_v57, %v236_v58 }
 0x17f   :  { %240 = vrot.lane.b32.xlu0 %v238_v59, %s2046_s30 }
 0x1d1   :  { %v190_v60 = vpop.permute.xlu1 %189 }
 0x1d2   :  { %v192_v61 = vadd.f32 %v190_v60, %v172_v39  ;;  %v2267_v60 = vsel %vm1687_vm7, 1, %v2045_v31 }
 0x1d4   :  { %1924 = vtanh.f32 %v192_v61  ;;  %v2274_v61 = vsel %vm1690_vm8, 1, %v2045_v31 }
 0x1de   :  { %v1925_v62 = vpop.eup %1924 }
 0x1df   :  { %196 = vrot.lane.b32.xlu0 %v1925_v62, %s2047_s4 }
 0x1e2   :  { %v210_v2 = vpop.permute.xlu1 %209 }
 0x1e3   :  { %225 = vrot.lane.b32.xlu0 %v169_v37, %s2048_s7  ;;  %vm211_vm3 = vcmp.eq.s32.totalorder %v210_v2, 1 }
 0x1e6   :  { %v201_v5 = vpop.permute.xlu1 %200 }
 0x1e7   :  { %v203_v10 = vmul.f32 %v1919_v46, %v201_v5 }
 0x1ea   :  { %v258_v29 = vpop.permute.xlu1 %257 }
 0x1eb   :  { %vm259_vm4 = vcmp.eq.s32.totalorder %v258_v29, 1 }
 0x1f1   :  { %v241_v63 = vpop.permute.xlu0 %240 }
 0x1f2   :  { %v243_v0 = vadd.f32 %v241_v63, %v175_v49 }
 0x1f4   :  { %1926 = vtanh.f32 %v243_v0 }
 0x1fe   :  { %v1927_v1 = vpop.eup %1926 }
 0x1ff   :  { %247 = vrot.lane.b32.xlu0 %v1927_v1, %s2047_s4 }
 0x251   :  { %v197_v7 = vpop.permute.xlu0 %196 }
 0x252   :  { %v199_v11 = vmul.f32 %v197_v7, %v194_v6 }
 0x254   :  { %v204_v12 = vadd.f32 %v203_v10, %v199_v11 }
 0x255   :  { %v226_v13 = vpop.permute.xlu0 %225 }
 0x256   :  { %v228_v16 = vadd.f32 %v226_v13, %v175_v49  ;;  %v212_v17 = vsel %vm211_vm3, %v204_v12, %v201_v5  ;;  %v2225_v18 = vsel %vm211_vm3, %v204_v12, 0.0 }
 0x257   :  { %263 = vrot.lane.b32.xlu1 %v212_v17, %s2047_s4 }
 0x258   :  { %v1678_v19 = vmul.f32 -1.442695, %v228_v16 }
 0x25a   :  { %1928 = vpow2.f32 %v1678_v19 }
 0x264   :  { %v1929_v22 = vpop.eup %1928 }
 0x265   :  { %v232_v23 = vadd.f32 1.0, %v1929_v22 }
 0x267   :  { %1930 = vrcp.f32 %v232_v23 }
 0x271   :  { %v1931_v26 = vpop.eup %1930  ;;  %v248_v28 = vpop.permute.xlu0 %247 }
 0x272   :  { %v245_v27 = vsub.f32 1.0, %v1931_v26  ;;  %v251_v30 = vmul.f32 %v1931_v26, %v2167_v25 }
 0x274   :  { %v250_v34 = vmul.f32 %v248_v28, %v245_v27 }
 0x276   :  { %v252_v35 = vadd.f32 %v251_v30, %v250_v34 }
 0x278   :  { %v2229_v36 = vsel %vm259_vm4, %v252_v35, 0.0  ;;  %v260_v38 = vsel %vm259_vm4, %v252_v35, %v2167_v25 }
 0x2c9   :  { %v264_v37 = vpop.permute.xlu1 %263 }
 0x2ca   :  { %267 = vst.msk [vmem:[#allocation2] sm:$0xff] %vm266_vm5, %v264_v37 }
 0x2cb   :  { %269 = vst.msk [vmem:[#allocation2] sm:$0xff] %vm268_vm6, %v260_v38 }
 0x2d2   :  { %v2234_v39 = vld [vmem:[#allocation2] sm:$0xff] }
 0x2d3   :  { %1683 = vmatmul.mubr.msk.f32.vlgmr.msra.gmra.mrb[0].mxu1 %vm63_vm0, %v2234_v39 }
 0x2d4   :  { %1832 = vmatpush1.bf16.msra.mxu1 %v2108_v8  ;;  %744 = vmatprep.mubr.f32.mxu1 %v2044_v3 }
 0x2d5   :  { %1834 = vmatprep.subr.bf16.mxu1 %v2110_v9 }
 0x2d8   :  { %1836 = vmatpush1.bf16.msra.mxu1 %v2127_v14 }
 0x2d9   :  { %1838 = vmatprep.subr.bf16.mxu1 %v2131_v15 }
 0x2dc   :  { %1840 = vmatpush1.bf16.msra.mxu1 %v2147_v20 }
 0x2dd   :  { %1842 = vmatprep.subr.bf16.mxu1 %v2151_v21 }
 0x2e0   :  { %1844 = vmatpush1.bf16.msra.mxu1 %v2161_v24 }
 0x2e1   :  { %1862 = vmatprep.subr.bf16.mxu1 %v2097_v4 }
 0x3a6   :  { %v360_v25 = vpop.f32.mrb[0].mxu1 }
 0x3a7   :  { %v361_v40 = vadd.f32 %v360_v25, %v2188_v32  ;;  %v362_v41 = vpop.f32.mrb[1].mxu1 }
 0x3a8   :  { %v363_v42 = vadd.f32 %v362_v41, %v2190_v33 }
 0x3a9   :  { %409 = vrot.lane.b32.xlu1 %v361_v40, %s2048_s7  ;;  %379 = vrot.lane.b32.xlu0 %v361_v40, %s2046_s30  ;;  %v371_v46 = vadd.f32 %v367_v44, %v361_v40 }
 0x3ab   :  { %v1686_v47 = vmul.f32 -1.442695, %v371_v46 }
 0x3ad   :  { %430 = vrot.lane.b32.xlu0 %v363_v42, %s2047_s4  ;;  %1932 = vpow2.f32 %v1686_v47 }
 0x3b7   :  { %v1933_v48 = vpop.eup %1932 }
 0x3b8   :  { %v375_v49 = vadd.f32 1.0, %v1933_v48 }
 0x3ba   :  { %1934 = vrcp.f32 %v375_v49 }
 0x3c4   :  { %v1935_v53 = vpop.eup %1934 }
 0x3c5   :  { %v389_v17 = vsub.f32 1.0, %v1935_v53 }
 0x41b   :  { %v410_v55 = vpop.permute.xlu1 %409  ;;  %v380_v56 = vpop.permute.xlu0 %379 }
 0x41c   :  { %v412_v57 = vadd.f32 %v410_v55, %v370_v52  ;;  %v382_v58 = vmul.f32 %v1935_v53, %v380_v56 }
 0x41e   :  { %v1688_v59 = vmul.f32 -1.442695, %v412_v57  ;;  %384 = vrot.lane.b32.xlu1 %v382_v58, %s2046_s30  ;;  %v560_v57 = vunpack.c.h.bf16 %v2255_v43  ;;  %v2313_v43 = vsel %vm1699_vm11, 1, %v2045_v31 }
 0x41f   :  { %v431_v1 = vpop.permute.xlu0 %430 }
 0x420   :  { %1936 = vpow2.f32 %v1688_v59 }
 0x422   :  { %404 = vperm.xlu1 %1914, %v2267_v60  }
 0x426   :  { %395 = vrot.lane.b32.xlu1 %v2234_v39, %s2048_s7 }
 0x42a   :  { %v1937_v62 = vpop.eup %1936  ;;  %452 = vperm.xlu1 %1914, %v2274_v61  }
 0x42b   :  { %v416_v63 = vadd.f32 1.0, %v1937_v62 }
 0x42d   :  { %1938 = vrcp.f32 %v416_v63 }
 0x437   :  { %v1939_v0 = vpop.eup %1938 }
 0x438   :  { %v433_v2 = vmul.f32 %v1939_v0, %v431_v1  ;;  %v563_v0 = vunpack.c.l.bf16 %v2261_v50  ;;  %v2320_v50 = vsel %vm1702_vm12, 1, %v2045_v31 }
 0x43a   :  { %435 = vrot.lane.b32.xlu0 %v433_v2, %s2046_s30 }
 0x490   :  { %v385_v5 = vpop.permute.xlu1 %384 }
 0x491   :  { %v387_v6 = vadd.f32 %v385_v5, %v367_v44 }
 0x493   :  { %1940 = vtanh.f32 %v387_v6 }
 0x49d   :  { %v1941_v7 = vpop.eup %1940 }
 0x49e   :  { %391 = vrot.lane.b32.xlu0 %v1941_v7, %s2047_s4 }
 0x4a1   :  { %v405_v13 = vpop.permute.xlu1 %404 }
 0x4a2   :  { %420 = vrot.lane.b32.xlu0 %v363_v42, %s2048_s7  ;;  %vm406_vm9 = vcmp.eq.s32.totalorder %v405_v13, 1 }
 0x4a5   :  { %v396_v16 = vpop.permute.xlu1 %395 }
 0x4a6   :  { %v398_v22 = vmul.f32 %v1935_v53, %v396_v16 }
 0x4a9   :  { %v453_v41 = vpop.permute.xlu1 %452 }
 0x4aa   :  { %vm454_vm10 = vcmp.eq.s32.totalorder %v453_v41, 1 }
 0x4ac   :  { %v436_v10 = vpop.permute.xlu0 %435 }
 0x4ad   :  { %v438_v11 = vadd.f32 %v436_v10, %v370_v52 }
 0x4af   :  { %1942 = vtanh.f32 %v438_v11 }
 0x4b9   :  { %v1943_v12 = vpop.eup %1942 }
 0x4ba   :  { %442 = vrot.lane.b32.xlu0 %v1943_v12, %s2047_s4 }
 0x510   :  { %v392_v19 = vpop.permute.xlu0 %391 }
 0x511   :  { %v394_v23 = vmul.f32 %v392_v19, %v389_v17 }
 0x513   :  { %v399_v26 = vadd.f32 %v398_v22, %v394_v23 }
 0x514   :  { %v421_v27 = vpop.permute.xlu0 %420 }
 0x515   :  { %v2281_v28 = vsel %vm406_vm9, %v399_v26, 0.0  ;;  %v423_v29 = vadd.f32 %v421_v27, %v370_v52  ;;  %v407_v30 = vsel %vm406_vm9, %v399_v26, %v396_v16 }
 0x516   :  { %458 = vrot.lane.b32.xlu1 %v407_v30, %s2047_s4 }
 0x517   :  { %v1689_v34 = vmul.f32 -1.442695, %v423_v29 }
 0x519   :  { %1944 = vpow2.f32 %v1689_v34 }
 0x523   :  { %v1945_v35 = vpop.eup %1944 }
 0x524   :  { %v427_v37 = vadd.f32 1.0, %v1945_v35 }
 0x526   :  { %1946 = vrcp.f32 %v427_v37 }
 0x52c   :  { %v443_v40 = vpop.permute.xlu0 %442 }
 0x530   :  { %v1947_v38 = vpop.eup %1946 }
 0x531   :  { %v440_v25 = vsub.f32 1.0, %v1947_v38  ;;  %v446_v42 = vmul.f32 %v1947_v38, %v2234_v39 }
 0x533   :  { %v445_v44 = vmul.f32 %v443_v40, %v440_v25 }
 0x535   :  { %v447_v46 = vadd.f32 %v446_v42, %v445_v44 }
 0x537   :  { %v2285_v47 = vsel %vm454_vm10, %v447_v46, 0.0  ;;  %v455_v49 = vsel %vm454_vm10, %v447_v46, %v2234_v39 }
 0x588   :  { %v459_v48 = vpop.permute.xlu1 %458 }
 0x589   :  { %461 = vst.msk [vmem:[#allocation2] sm:$0xff] %vm266_vm5, %v459_v48 }
 0x58a   :  { %462 = vst.msk [vmem:[#allocation2] sm:$0xff] %vm268_vm6, %v455_v49 }
 0x591   :  { %v2290_v52 = vld [vmem:[#allocation2] sm:$0xff] }
 0x592   :  { %1695 = vmatmul.mubr.msk.f32.vlgmr.msra.gmra.mrb[2].mxu0 %vm63_vm0, %v2290_v52 }
 0x593   :  { %1848 = vmatpush1.bf16.msra.mxu0 %v2108_v8  ;;  %937 = vmatprep.mubr.f32.mxu0 %v2044_v3 }
 0x594   :  { %1850 = vmatprep.subr.bf16.mxu0 %v2110_v9 }
 0x597   :  { %1852 = vmatpush1.bf16.msra.mxu0 %v2127_v14 }
 0x598   :  { %1854 = vmatprep.subr.bf16.mxu0 %v2131_v15 }
 0x59b   :  { %1856 = vmatpush1.bf16.msra.mxu0 %v2147_v20 }
 0x59c   :  { %1858 = vmatprep.subr.bf16.mxu0 %v2151_v21 }
 0x59f   :  { %1860 = vmatpush1.bf16.msra.mxu0 %v2161_v24 }
 0x5a0   :  { %1878 = vmatprep.subr.bf16.mxu0 %v2097_v4 }
 0x665   :  { %v553_v39 = vpop.f32.mrb[2].mxu0 }
 0x666   :  { %v554_v53 = vadd.f32 %v553_v39, %v2188_v32  ;;  %v555_v55 = vpop.f32.mrb[3].mxu0 }
 0x667   :  { %v556_v56 = vadd.f32 %v555_v55, %v2190_v33 }
 0x668   :  { %602 = vrot.lane.b32.xlu1 %v554_v53, %s2048_s7  ;;  %572 = vrot.lane.b32.xlu0 %v554_v53, %s2046_s30  ;;  %v564_v58 = vadd.f32 %v560_v57, %v554_v53 }
 0x66a   :  { %v1698_v59 = vmul.f32 -1.442695, %v564_v58 }
 0x66c   :  { %623 = vrot.lane.b32.xlu0 %v556_v56, %s2047_s4  ;;  %1948 = vpow2.f32 %v1698_v59 }
 0x676   :  { %v1949_v62 = vpop.eup %1948 }
 0x677   :  { %v568_v63 = vadd.f32 1.0, %v1949_v62 }
 0x679   :  { %1950 = vrcp.f32 %v568_v63 }
 0x683   :  { %v1951_v1 = vpop.eup %1950 }
 0x684   :  { %v582_v35 = vsub.f32 1.0, %v1951_v1 }
 0x6da   :  { %v603_v2 = vpop.permute.xlu1 %602  ;;  %v573_v5 = vpop.permute.xlu0 %572 }
 0x6db   :  { %v605_v6 = vadd.f32 %v603_v2, %v563_v0  ;;  %v575_v7 = vmul.f32 %v1951_v1, %v573_v5 }
 0x6dd   :  { %v1700_v10 = vmul.f32 -1.442695, %v605_v6  ;;  %577 = vrot.lane.b32.xlu1 %v575_v7, %s2046_s30 }
 0x6de   :  { %v624_v16 = vpop.permute.xlu0 %623 }
 0x6df   :  { %1952 = vpow2.f32 %v1700_v10  ;;  %v2357_v10 = vld [vmem:[%s2650_s0 + $0xc] sm:$0xff]  }
 0x6e1   :  { %597 = vperm.xlu1 %1914, %v2313_v43  }
 0x6e5   :  { %588 = vrot.lane.b32.xlu1 %v2290_v52, %s2048_s7 }
 0x6e9   :  { %v1953_v11 = vpop.eup %1952  ;;  %645 = vperm.xlu1 %1914, %v2320_v50  }
 0x6ea   :  { %v609_v12 = vadd.f32 1.0, %v1953_v11  ;;  %v753_v11 = vunpack.c.l.bf16 %v2357_v10 }
 0x6ec   :  { %1954 = vrcp.f32 %v609_v12 }
 0x6f6   :  { %v1955_v13 = vpop.eup %1954 }
 0x6f7   :  { %v626_v17 = vmul.f32 %v1955_v13, %v624_v16 }
 0x6f9   :  { %628 = vrot.lane.b32.xlu0 %v626_v17, %s2046_s30  ;;  %v2363_v17 = vld [vmem:[%s2651_s1 + $0xc] sm:$0xff]  }
 0x74f   :  { %v578_v19 = vpop.permute.xlu1 %577 }
 0x750   :  { %v580_v22 = vadd.f32 %v578_v19, %v560_v57  ;;  %v756_v19 = vunpack.c.h.bf16 %v2363_v17 }
 0x752   :  { %1956 = vtanh.f32 %v580_v22 }
 0x75c   :  { %v1957_v23 = vpop.eup %1956 }
 0x75d   :  { %584 = vrot.lane.b32.xlu0 %v1957_v23, %s2047_s4 }
 0x760   :  { %v598_v30 = vpop.permute.xlu1 %597 }
 0x761   :  { %613 = vrot.lane.b32.xlu0 %v556_v56, %s2048_s7  ;;  %vm599_vm13 = vcmp.eq.s32.totalorder %v598_v30, 1 }
 0x764   :  { %v589_v34 = vpop.permute.xlu1 %588 }
 0x765   :  { %v591_v38 = vmul.f32 %v1951_v1, %v589_v34 }
 0x768   :  { %v646_v57 = vpop.permute.xlu1 %645 }
 0x769   :  { %vm647_vm14 = vcmp.eq.s32.totalorder %v646_v57, 1 }
 0x76b   :  { %v629_v26 = vpop.permute.xlu0 %628 }
 0x76c   :  { %v631_v27 = vadd.f32 %v629_v26, %v563_v0 }
 0x76e   :  { %1958 = vtanh.f32 %v631_v27 }
 0x778   :  { %v1959_v29 = vpop.eup %1958 }
 0x779   :  { %635 = vrot.lane.b32.xlu0 %v1959_v29, %s2047_s4 }
 0x7cf   :  { %v585_v37 = vpop.permute.xlu0 %584 }
 0x7d0   :  { %v587_v25 = vmul.f32 %v585_v37, %v582_v35  ;;  %v2376_v35 = vsel %vm1714_vm1, 1, %v2045_v31 }
 0x7d2   :  { %v592_v40 = vadd.f32 %v591_v38, %v587_v25 }
 0x7d3   :  { %v614_v41 = vpop.permute.xlu0 %613 }
 0x7d4   :  { %v2327_v42 = vsel %vm599_vm13, %v592_v40, 0.0  ;;  %v616_v44 = vadd.f32 %v614_v41, %v563_v0  ;;  %v600_v46 = vsel %vm599_vm13, %v592_v40, %v589_v34  ;;  %v2369_v34 = vsel %vm1711_vm15, 1, %v2045_v31 }
 0x7d5   :  { %651 = vrot.lane.b32.xlu1 %v600_v46, %s2047_s4 }
 0x7d6   :  { %v1701_v48 = vmul.f32 -1.442695, %v616_v44 }
 0x7d8   :  { %1960 = vpow2.f32 %v1701_v48 }
 0x7e2   :  { %v1961_v49 = vpop.eup %1960 }
 0x7e3   :  { %v620_v39 = vadd.f32 1.0, %v1961_v49 }
 0x7e5   :  { %1962 = vrcp.f32 %v620_v39 }
 0x7eb   :  { %v636_v56 = vpop.permute.xlu0 %635 }
 0x7ef   :  { %v1963_v53 = vpop.eup %1962 }
 0x7f0   :  { %v633_v55 = vsub.f32 1.0, %v1963_v53  ;;  %v639_v58 = vmul.f32 %v1963_v53, %v2290_v52 }
 0x7f2   :  { %v638_v59 = vmul.f32 %v636_v56, %v633_v55 }
 0x7f4   :  { %v640_v62 = vadd.f32 %v639_v58, %v638_v59 }
 0x7f6   :  { %v2331_v63 = vsel %vm647_vm14, %v640_v62, 0.0  ;;  %v648_v1 = vsel %vm647_vm14, %v640_v62, %v2290_v52 }
 0x847   :  { %v652_v0 = vpop.permute.xlu1 %651 }
 0x848   :  { %654 = vst.msk [vmem:[#allocation2] sm:$0xff] %vm266_vm5, %v652_v0 }
 0x849   :  { %655 = vst.msk [vmem:[#allocation2] sm:$0xff] %vm268_vm6, %v648_v1 }
 0x850   :  { %v2336_v2 = vld [vmem:[#allocation2] sm:$0xff] }
 0x851   :  { %1707 = vmatmul.mubr.msk.f32.vlgmr.msra.gmra.mrb[2].mxu1 %vm63_vm0, %v2336_v2 }
 0x852   :  { %1864 = vmatpush1.bf16.msra.mxu1 %v2108_v8  ;;  %1130 = vmatprep.mubr.f32.mxu1 %v2044_v3 }
 0x853   :  { %1866 = vmatprep.subr.bf16.mxu1 %v2110_v9 }
 0x856   :  { %1868 = vmatpush1.bf16.msra.mxu1 %v2127_v14 }
 0x857   :  { %1870 = vmatprep.subr.bf16.mxu1 %v2131_v15 }
 0x85a   :  { %1872 = vmatpush1.bf16.msra.mxu1 %v2147_v20 }
 0x85b   :  { %1874 = vmatprep.subr.bf16.mxu1 %v2151_v21 }
 0x85e   :  { %1876 = vmatpush1.bf16.msra.mxu1 %v2161_v24 }
 0x85f   :  { %1894 = vmatprep.subr.bf16.mxu1 %v2097_v4 }
 0x924   :  { %v746_v52 = vpop.f32.mrb[2].mxu1 }
 0x925   :  { %v747_v5 = vadd.f32 %v746_v52, %v2188_v32  ;;  %v748_v6 = vpop.f32.mrb[3].mxu1 }
 0x926   :  { %v749_v7 = vadd.f32 %v748_v6, %v2190_v33 }
 0x927   :  { %795 = vrot.lane.b32.xlu1 %v747_v5, %s2048_s7  ;;  %765 = vrot.lane.b32.xlu0 %v747_v5, %s2046_s30  ;;  %v757_v4 = vadd.f32 %v753_v11, %v747_v5 }
 0x929   :  { %v1710_v12 = vmul.f32 -1.442695, %v757_v4 }
 0x92b   :  { %816 = vrot.lane.b32.xlu0 %v749_v7, %s2047_s4  ;;  %1964 = vpow2.f32 %v1710_v12 }
 0x935   :  { %v1965_v13 = vpop.eup %1964 }
 0x936   :  { %v761_v16 = vadd.f32 1.0, %v1965_v13 }
 0x938   :  { %1966 = vrcp.f32 %v761_v16 }
 0x942   :  { %v1967_v22 = vpop.eup %1966 }
 0x943   :  { %v775_v55 = vsub.f32 1.0, %v1967_v22 }
 0x999   :  { %v796_v23 = vpop.permute.xlu1 %795  ;;  %v766_v26 = vpop.permute.xlu0 %765 }
 0x99a   :  { %v798_v27 = vadd.f32 %v796_v23, %v756_v19  ;;  %v768_v29 = vmul.f32 %v1967_v22, %v766_v26 }
 0x99c   :  { %v1712_v30 = vmul.f32 -1.442695, %v798_v27  ;;  %770 = vrot.lane.b32.xlu1 %v768_v29, %s2046_s30 }
 0x99d   :  { %v817_v40 = vpop.permute.xlu0 %816 }
 0x99e   :  { %1968 = vpow2.f32 %v1712_v30 }
 0x9a0   :  { %790 = vperm.xlu1 %1914, %v2369_v34  }
 0x9a4   :  { %781 = vrot.lane.b32.xlu1 %v2336_v2, %s2048_s7 }
 0x9a8   :  { %v1969_v37 = vpop.eup %1968  ;;  %838 = vperm.xlu1 %1914, %v2376_v35  }
 0x9a9   :  { %v802_v38 = vadd.f32 1.0, %v1969_v37 }
 0x9ab   :  { %1970 = vrcp.f32 %v802_v38 }
 0x9b5   :  { %v1971_v25 = vpop.eup %1970 }
 0x9b6   :  { %v819_v41 = vmul.f32 %v1971_v25, %v817_v40  ;;  %v946_v25 = vunpack.c.h.bf16 %v2357_v10 }
 0x9b8   :  { %821 = vrot.lane.b32.xlu0 %v819_v41, %s2046_s30 }
 0xa0e   :  { %v771_v44 = vpop.permute.xlu1 %770 }
 0xa0f   :  { %v773_v46 = vadd.f32 %v771_v44, %v753_v11 }
 0xa11   :  { %1972 = vtanh.f32 %v773_v46 }
 0xa1b   :  { %v1973_v45 = vpop.eup %1972 }
 0xa1c   :  { %777 = vrot.lane.b32.xlu0 %v1973_v45, %s2047_s4  ;;  %v949_v45 = vunpack.c.l.bf16 %v2363_v17 }
 0xa1f   :  { %v791_v39 = vpop.permute.xlu1 %790 }
 0xa20   :  { %806 = vrot.lane.b32.xlu0 %v749_v7, %s2048_s7  ;;  %vm792_vm2 = vcmp.eq.s32.totalorder %v791_v39, 1 }
 0xa23   :  { %v782_v53 = vpop.permute.xlu1 %781 }
 0xa24   :  { %v784_v57 = vmul.f32 %v1967_v22, %v782_v53 }
 0xa27   :  { %v839_v13 = vpop.permute.xlu1 %838 }
 0xa28   :  { %vm840_vm3 = vcmp.eq.s32.totalorder %v839_v13, 1 }
 0xa2a   :  { %v822_v31 = vpop.permute.xlu0 %821 }
 0xa2b   :  { %v824_v48 = vadd.f32 %v822_v31, %v756_v19 }
 0xa2d   :  { %1974 = vtanh.f32 %v824_v48 }
 0xa37   :  { %v1975_v49 = vpop.eup %1974 }
 0xa38   :  { %828 = vrot.lane.b32.xlu0 %v1975_v49, %s2047_s4 }
 0xa8e   :  { %v778_v56 = vpop.permute.xlu0 %777 }
 0xa8f   :  { %v780_v58 = vmul.f32 %v778_v56, %v775_v55 }
 0xa91   :  { %v785_v59 = vadd.f32 %v784_v57, %v780_v58 }
 0xa92   :  { %v807_v62 = vpop.permute.xlu0 %806 }
 0xa93   :  { %v2383_v0 = vsel %vm792_vm2, %v785_v59, 0.0  ;;  %v809_v1 = vadd.f32 %v807_v62, %v756_v19  ;;  %v793_v52 = vsel %vm792_vm2, %v785_v59, %v782_v53 }
 0xa94   :  { %844 = vrot.lane.b32.xlu1 %v793_v52, %s2047_s4 }
 0xa95   :  { %v1713_v5 = vmul.f32 -1.442695, %v809_v1 }
 0xa97   :  { %1976 = vpow2.f32 %v1713_v5 }
 0xaa1   :  { %v1977_v6 = vpop.eup %1976 }
 0xaa2   :  { %v813_v7 = vadd.f32 1.0, %v1977_v6 }
 0xaa4   :  { %1978 = vrcp.f32 %v813_v7 }
 0xaaa   :  { %v829_v12 = vpop.permute.xlu0 %828 }
 0xaae   :  { %v1979_v11 = vpop.eup %1978 }
 0xaaf   :  { %v826_v4 = vsub.f32 1.0, %v1979_v11  ;;  %v832_v16 = vmul.f32 %v1979_v11, %v2336_v2 }
 0xab1   :  { %v831_v22 = vmul.f32 %v829_v12, %v826_v4 }
 0xab3   :  { %v833_v23 = vadd.f32 %v832_v16, %v831_v22 }
 0xab5   :  { %v2387_v26 = vsel %vm840_vm3, %v833_v23, 0.0  ;;  %v841_v27 = vsel %vm840_vm3, %v833_v23, %v2336_v2 }
 0xb06   :  { %v845_v19 = vpop.permute.xlu1 %844 }
 0xb07   :  { %847 = vst.msk [vmem:[#allocation2] sm:$0xff] %vm266_vm5, %v845_v19 }
 0xb08   :  { %848 = vst.msk [vmem:[#allocation2] sm:$0xff] %vm268_vm6, %v841_v27 }
 0xb0f   :  { %v2392_v29 = vld [vmem:[#allocation2] sm:$0xff] }
 0xb10   :  { %1719 = vmatmul.mubr.msk.f32.vlgmr.msra.gmra.mrb[4].mxu0 %vm63_vm0, %v2392_v29 }
 0xb11   :  { %1880 = vmatpush1.bf16.msra.mxu0 %v2108_v8  ;;  %1323 = vmatprep.mubr.f32.mxu0 %v2044_v3 }
 0xb12   :  { %1882 = vmatprep.subr.bf16.mxu0 %v2110_v9 }
 0xb15   :  { %1884 = vmatpush1.bf16.msra.mxu0 %v2127_v14 }
 0xb16   :  { %1886 = vmatprep.subr.bf16.mxu0 %v2131_v15 }
 0xb19   :  { %1888 = vmatpush1.bf16.msra.mxu0 %v2147_v20 }
 0xb1a   :  { %1890 = vmatprep.subr.bf16.mxu0 %v2151_v21 }
 0xb1d   :  { %1892 = vmatpush1.bf16.msra.mxu0 %v2161_v24 }
 0xbe3   :  { %v939_v2 = vpop.f32.mrb[4].mxu0 }
 0xbe4   :  { %v940_v30 = vadd.f32 %v939_v2, %v2188_v32  ;;  %v941_v37 = vpop.f32.mrb[5].mxu0 }
 0xbe5   :  { %v942_v38 = vadd.f32 %v941_v37, %v2190_v33 }
 0xbe6   :  { %988 = vrot.lane.b32.xlu1 %v940_v30, %s2048_s7  ;;  %958 = vrot.lane.b32.xlu0 %v940_v30, %s2046_s30  ;;  %v950_v40 = vadd.f32 %v946_v25, %v940_v30 }
 0xbe8   :  { %v1722_v41 = vmul.f32 -1.442695, %v950_v40 }
 0xbea   :  { %1009 = vrot.lane.b32.xlu0 %v942_v38, %s2047_s4  ;;  %1980 = vpow2.f32 %v1722_v41 }
 0xbf4   :  { %v1981_v44 = vpop.eup %1980 }
 0xbf5   :  { %v954_v46 = vadd.f32 1.0, %v1981_v44 }
 0xbf7   :  { %1982 = vrcp.f32 %v954_v46 }
 0xc01   :  { %v1983_v31 = vpop.eup %1982 }
 0xc02   :  { %v968_v7 = vsub.f32 1.0, %v1983_v31 }
 0xc58   :  { %v989_v48 = vpop.permute.xlu1 %988  ;;  %v959_v49 = vpop.permute.xlu0 %958 }
 0xc59   :  { %v991_v39 = vadd.f32 %v989_v48, %v949_v45  ;;  %v961_v53 = vmul.f32 %v1983_v31, %v959_v49 }
 0xc5b   :  { %v1724_v55 = vmul.f32 -1.442695, %v991_v39  ;;  %963 = vrot.lane.b32.xlu1 %v961_v53, %s2046_s30 }
 0xc5c   :  { %v1010_v57 = vpop.permute.xlu0 %1009 }
 0xc5d   :  { %1984 = vpow2.f32 %v1724_v55 }
 0xc5f   :  { %983 = vperm.xlu1 %1914, %v2376_v35  }
 0xc63   :  { %974 = vrot.lane.b32.xlu1 %v2392_v29, %s2048_s7 }
 0xc67   :  { %v1985_v10 = vpop.eup %1984  ;;  %1031 = vperm.xlu1 %1914, %v2369_v34  }
 0xc68   :  { %v995_v56 = vadd.f32 1.0, %v1985_v10 }
 0xc6a   :  { %1986 = vrcp.f32 %v995_v56 }
 0xc74   :  { %v1987_v17 = vpop.eup %1986 }
 0xc75   :  { %v1012_v58 = vmul.f32 %v1987_v17, %v1010_v57 }
 0xc77   :  { %1014 = vrot.lane.b32.xlu0 %v1012_v58, %s2046_s30 }
 0xccd   :  { %v964_v59 = vpop.permute.xlu1 %963 }
 0xcce   :  { %v966_v62 = vadd.f32 %v964_v59, %v946_v25 }
 0xcd0   :  { %1988 = vtanh.f32 %v966_v62 }
 0xcda   :  { %v1989_v1 = vpop.eup %1988 }
 0xcdb   :  { %970 = vrot.lane.b32.xlu0 %v1989_v1, %s2047_s4 }
 0xcde   :  { %v984_v34 = vpop.permute.xlu1 %983 }
 0xcdf   :  { %999 = vrot.lane.b32.xlu0 %v942_v38, %s2048_s7  ;;  %vm985_vm4 = vcmp.eq.s32.totalorder %v984_v34, 1 }
 0xce2   :  { %v975_v6 = vpop.permute.xlu1 %974 }
 0xce3   :  { %v977_v4 = vmul.f32 %v1983_v31, %v975_v6 }
 0xce6   :  { %v1032_v40 = vpop.permute.xlu1 %1031 }
 0xce7   :  { %vm1033_vm7 = vcmp.eq.s32.totalorder %v1032_v40, 1 }
 0xce9   :  { %v1015_v35 = vpop.permute.xlu0 %1014 }
 0xcea   :  { %v1017_v52 = vadd.f32 %v1015_v35, %v949_v45 }
 0xcec   :  { %1990 = vtanh.f32 %v1017_v52 }
 0xcf6   :  { %v1991_v5 = vpop.eup %1990 }
 0xcf7   :  { %1021 = vrot.lane.b32.xlu0 %v1991_v5, %s2047_s4 }
 0xd4d   :  { %v971_v11 = vpop.permute.xlu0 %970 }
 0xd4e   :  { %v973_v12 = vmul.f32 %v971_v11, %v968_v7 }
 0xd50   :  { %v978_v13 = vadd.f32 %v977_v4, %v973_v12 }
 0xd51   :  { %v1000_v16 = vpop.permute.xlu0 %999 }
 0xd52   :  { %v2420_v22 = vsel %vm985_vm4, %v978_v13, 0.0  ;;  %v1002_v23 = vadd.f32 %v1000_v16, %v949_v45  ;;  %v986_v19 = vsel %vm985_vm4, %v978_v13, %v975_v6 }
 0xd53   :  { %1037 = vrot.lane.b32.xlu1 %v986_v19, %s2047_s4 }
 0xd54   :  { %v1725_v27 = vmul.f32 -1.442695, %v1002_v23 }
 0xd56   :  { %1992 = vpow2.f32 %v1725_v27 }
 0xd60   :  { %v1993_v2 = vpop.eup %1992 }
 0xd61   :  { %v1006_v30 = vadd.f32 1.0, %v1993_v2 }
 0xd63   :  { %1994 = vrcp.f32 %v1006_v30 }
 0xd69   :  { %v1022_v25 = vpop.permute.xlu0 %1021 }
 0xd6d   :  { %v1995_v37 = vpop.eup %1994 }
 0xd6e   :  { %v1019_v38 = vsub.f32 1.0, %v1995_v37  ;;  %v1025_v41 = vmul.f32 %v1995_v37, %v2392_v29 }
 0xd70   :  { %v1024_v44 = vmul.f32 %v1022_v25, %v1019_v38 }
 0xd72   :  { %v1026_v46 = vadd.f32 %v1025_v41, %v1024_v44 }
 0xd74   :  { %v2424_v31 = vsel %vm1033_vm7, %v1026_v46, 0.0  ;;  %v1034_v48 = vsel %vm1033_vm7, %v1026_v46, %v2392_v29 }
 0xdc5   :  { %v1038_v45 = vpop.permute.xlu1 %1037 }
 0xdc6   :  { %1040 = vst.msk [vmem:[#allocation2] sm:$0xff] %vm266_vm5, %v1038_v45 }
 0xdc7   :  { %1041 = vst.msk [vmem:[#allocation2] sm:$0xff] %vm268_vm6, %v1034_v48 }
 0xdce   :  { %v2429_v49 = vld [vmem:[#allocation2] sm:$0xff] }
 0xdcf   :  { %1731 = vmatmul.mubr.msk.f32.vlgmr.msra.gmra.mrb[4].mxu1 %vm63_vm0, %v2429_v49 }
 0xdd0   :  { %1896 = vmatpush1.bf16.msra.mxu1 %v2108_v8  ;;  %1516 = vmatprep.mubr.f32.mxu1 %v2044_v3  ;;  %v2449_v8 = vld [vmem:[%s2650_s0 + $0x14] sm:$0xff]  }
 0xdd1   :  { %1898 = vmatprep.subr.bf16.mxu1 %v2110_v9  ;;  %v1139_v9 = vunpack.c.l.bf16 %v2449_v8 }
 0xdd4   :  { %1900 = vmatpush1.bf16.msra.mxu1 %v2127_v14 }
 0xdd5   :  { %1902 = vmatprep.subr.bf16.mxu1 %v2131_v15 }
 0xdd8   :  { %1904 = vmatpush1.bf16.msra.mxu1 %v2147_v20 }
 0xdd9   :  { %1906 = vmatprep.subr.bf16.mxu1 %v2151_v21 }
 0xddc   :  { %1908 = vmatpush1.bf16.msra.mxu1 %v2161_v24  ;;  %v2455_v24 = vld [vmem:[%s2651_s1 + $0x4] sm:$0xff]  }
 0xddd   :  { %v1142_v55 = vunpack.c.h.bf16 %v2455_v24 }
 0xea2   :  { %v1132_v29 = vpop.f32.mrb[4].mxu1 }
 0xea3   :  { %v1133_v39 = vadd.f32 %v1132_v29, %v2188_v32  ;;  %v1134_v53 = vpop.f32.mrb[5].mxu1 }
 0xea4   :  { %v1135_v3 = vadd.f32 %v1134_v53, %v2190_v33 }
 0xea5   :  { %1181 = vrot.lane.b32.xlu1 %v1133_v39, %s2048_s7  ;;  %1151 = vrot.lane.b32.xlu0 %v1133_v39, %s2046_s30  ;;  %v1143_v14 = vadd.f32 %v1139_v9, %v1133_v39 }
 0xea7   :  { %v1734_v15 = vmul.f32 -1.442695, %v1143_v14 }
 0xea9   :  { %1202 = vrot.lane.b32.xlu0 %v1135_v3, %s2047_s4  ;;  %1996 = vpow2.f32 %v1734_v15 }
 0xeb3   :  { %v1997_v20 = vpop.eup %1996 }
 0xeb4   :  { %v1147_v21 = vadd.f32 1.0, %v1997_v20 }
 0xeb6   :  { %1998 = vrcp.f32 %v1147_v21 }
 0xec0   :  { %v1999_v10 = vpop.eup %1998 }
 0xec1   :  { %v1161_v13 = vsub.f32 1.0, %v1999_v10 }
 0xf17   :  { %v1182_v56 = vpop.permute.xlu1 %1181  ;;  %v1152_v17 = vpop.permute.xlu0 %1151 }
 0xf18   :  { %v1184_v57 = vadd.f32 %v1182_v56, %v1142_v55  ;;  %v1154_v58 = vmul.f32 %v1999_v10, %v1152_v17 }
 0xf1a   :  { %v1736_v59 = vmul.f32 -1.442695, %v1184_v57  ;;  %1156 = vrot.lane.b32.xlu1 %v1154_v58, %s2046_s30 }
 0xf1b   :  { %v1203_v52 = vpop.permute.xlu0 %1202 }
 0xf1c   :  { %2000 = vpow2.f32 %v1736_v59  ;;  %v1335_v59 = vunpack.c.l.bf16 %v2455_v24 }
 0xf1e   :  { %1176 = vperm.xlu1 %1914, %v2320_v50  }
 0xf22   :  { %1167 = vrot.lane.b32.xlu1 %v2429_v49, %s2048_s7 }
 0xf26   :  { %v2001_v62 = vpop.eup %2000  ;;  %1224 = vperm.xlu1 %1914, %v2313_v43  }
 0xf27   :  { %v1188_v1 = vadd.f32 1.0, %v2001_v62 }
 0xf29   :  { %2002 = vrcp.f32 %v1188_v1 }
 0xf33   :  { %v2003_v35 = vpop.eup %2002 }
 0xf34   :  { %v1205_v5 = vmul.f32 %v2003_v35, %v1203_v52 }
 0xf36   :  { %1207 = vrot.lane.b32.xlu0 %v1205_v5, %s2046_s30 }
 0xf8c   :  { %v1157_v34 = vpop.permute.xlu1 %1156 }
 0xf8d   :  { %v1159_v6 = vadd.f32 %v1157_v34, %v1139_v9 }
 0xf8f   :  { %2004 = vtanh.f32 %v1159_v6 }
 0xf99   :  { %v2005_v7 = vpop.eup %2004 }
 0xf9a   :  { %1163 = vrot.lane.b32.xlu0 %v2005_v7, %s2047_s4 }
 0xf9d   :  { %v1177_v43 = vpop.permute.xlu1 %1176 }
 0xf9e   :  { %1192 = vrot.lane.b32.xlu0 %v1135_v3, %s2048_s7  ;;  %vm1178_vm8 = vcmp.eq.s32.totalorder %v1177_v43, 1 }
 0xfa1   :  { %v1168_v12 = vpop.permute.xlu1 %1167 }
 0xfa2   :  { %v1170_v23 = vmul.f32 %v1999_v10, %v1168_v12 }
 0xfa5   :  { %v1225_v48 = vpop.permute.xlu1 %1224 }
 0xfa6   :  { %vm1226_vm9 = vcmp.eq.s32.totalorder %v1225_v48, 1 }
 0xfa8   :  { %v1208_v50 = vpop.permute.xlu0 %1207 }
 0xfa9   :  { %v1210_v11 = vadd.f32 %v1208_v50, %v1142_v55 }
 0xfab   :  { %2006 = vtanh.f32 %v1210_v11 }
 0xfb5   :  { %v2007_v4 = vpop.eup %2006 }
 0xfb6   :  { %1214 = vrot.lane.b32.xlu0 %v2007_v4, %s2047_s4 }
0x100c   :  { %v1164_v16 = vpop.permute.xlu0 %1163 }
0x100d   :  { %v1166_v19 = vmul.f32 %v1164_v16, %v1161_v13 }
0x100f   :  { %v1171_v27 = vadd.f32 %v1170_v23, %v1166_v19 }
0x1010   :  { %v1193_v2 = vpop.permute.xlu0 %1192 }
0x1011   :  { %v2467_v30 = vsel %vm1178_vm8, %v1171_v27, 0.0  ;;  %v1195_v37 = vadd.f32 %v1193_v2, %v1142_v55  ;;  %v1179_v38 = vsel %vm1178_vm8, %v1171_v27, %v1168_v12 }
0x1012   :  { %1230 = vrot.lane.b32.xlu1 %v1179_v38, %s2047_s4 }
0x1013   :  { %v1737_v25 = vmul.f32 -1.442695, %v1195_v37 }
0x1015   :  { %2008 = vpow2.f32 %v1737_v25 }
0x101f   :  { %v2009_v40 = vpop.eup %2008 }
0x1020   :  { %v1199_v41 = vadd.f32 1.0, %v2009_v40 }
0x1022   :  { %2010 = vrcp.f32 %v1199_v41 }
0x1028   :  { %v1215_v45 = vpop.permute.xlu0 %1214 }
0x102c   :  { %v2011_v44 = vpop.eup %2010 }
0x102d   :  { %v1212_v46 = vsub.f32 1.0, %v2011_v44  ;;  %v1218_v29 = vmul.f32 %v2011_v44, %v2429_v49 }
0x102f   :  { %v1217_v39 = vmul.f32 %v1215_v45, %v1212_v46 }
0x1031   :  { %v1219_v53 = vadd.f32 %v1218_v29, %v1217_v39 }
0x1033   :  { %v2471_v3 = vsel %vm1226_vm9, %v1219_v53, 0.0  ;;  %v1227_v14 = vsel %vm1226_vm9, %v1219_v53, %v2429_v49  ;;  %v1332_v49 = vunpack.c.h.bf16 %v2449_v8 }
0x1084   :  { %v1231_v9 = vpop.permute.xlu1 %1230 }
0x1085   :  { %1233 = vst.msk [vmem:[#allocation2] sm:$0xff] %vm266_vm5, %v1231_v9 }
0x1086   :  { %1234 = vst.msk [vmem:[#allocation2] sm:$0xff] %vm268_vm6, %v1227_v14 }
0x108d   :  { %v2476_v15 = vld [vmem:[#allocation2] sm:$0xff] }
0x108e   :  { %1743 = vmatmul.mubr.msk.f32.vlgmr.msra.gmra.mrb[6].mxu0 %vm63_vm0, %v2476_v15 }
0x1161   :  { %v1325_v20 = vpop.f32.mrb[6].mxu0 }
0x1162   :  { %v1326_v21 = vadd.f32 %v1325_v20, %v2188_v32  ;;  %v1327_v55 = vpop.f32.mrb[7].mxu0 }
0x1163   :  { %v1328_v10 = vadd.f32 %v1327_v55, %v2190_v33 }
0x1164   :  { %1374 = vrot.lane.b32.xlu1 %v1326_v21, %s2048_s7  ;;  %1344 = vrot.lane.b32.xlu0 %v1326_v21, %s2046_s30  ;;  %v1336_v56 = vadd.f32 %v1332_v49, %v1326_v21 }
0x1166   :  { %v1746_v17 = vmul.f32 -1.442695, %v1336_v56 }
0x1168   :  { %1395 = vrot.lane.b32.xlu0 %v1328_v10, %s2047_s4  ;;  %2012 = vpow2.f32 %v1746_v17 }
0x1172   :  { %v2013_v57 = vpop.eup %2012 }
0x1173   :  { %v1340_v58 = vadd.f32 1.0, %v2013_v57 }
0x1175   :  { %2014 = vrcp.f32 %v1340_v58 }
0x117f   :  { %v2015_v62 = vpop.eup %2014 }
0x1180   :  { %v1354_v23 = vsub.f32 1.0, %v2015_v62 }
0x11d6   :  { %v1375_v1 = vpop.permute.xlu1 %1374  ;;  %v1345_v35 = vpop.permute.xlu0 %1344 }
0x11d7   :  { %v1377_v52 = vadd.f32 %v1375_v1, %v1335_v59  ;;  %v1347_v5 = vmul.f32 %v2015_v62, %v1345_v35 }
0x11d9   :  { %v1748_v34 = vmul.f32 -1.442695, %v1377_v52  ;;  %1349 = vrot.lane.b32.xlu1 %v1347_v5, %s2046_s30 }
0x11da   :  { %v1396_v7 = vpop.permute.xlu0 %1395 }
0x11db   :  { %2016 = vpow2.f32 %v1748_v34 }
0x11dd   :  { %1369 = vperm.xlu1 %1914, %v2274_v61  }
0x11e1   :  { %1360 = vrot.lane.b32.xlu1 %v2476_v15, %s2048_s7 }
0x11e5   :  { %v2017_v8 = vpop.eup %2016  ;;  %1417 = vperm.xlu1 %1914, %v2267_v60  }
0x11e6   :  { %v1381_v6 = vadd.f32 1.0, %v2017_v8 }
0x11e8   :  { %2018 = vrcp.f32 %v1381_v6 }
0x11f2   :  { %v2019_v24 = vpop.eup %2018 }
0x11f3   :  { %v1398_v50 = vmul.f32 %v2019_v24, %v1396_v7 }
0x11f5   :  { %1400 = vrot.lane.b32.xlu0 %v1398_v50, %s2046_s30 }
0x124b   :  { %v1350_v11 = vpop.permute.xlu1 %1349 }
0x124c   :  { %v1352_v4 = vadd.f32 %v1350_v11, %v1332_v49 }
0x124e   :  { %2020 = vtanh.f32 %v1352_v4 }
0x1258   :  { %v2021_v43 = vpop.eup %2020 }
0x1259   :  { %1356 = vrot.lane.b32.xlu0 %v2021_v43, %s2047_s4 }
0x125c   :  { %v1370_v60 = vpop.permute.xlu1 %1369 }
0x125d   :  { %1385 = vrot.lane.b32.xlu0 %v1328_v10, %s2048_s7  ;;  %vm1371_vm10 = vcmp.eq.s32.totalorder %v1370_v60, 1 }
0x1260   :  { %v1361_v16 = vpop.permute.xlu1 %1360 }
0x1261   :  { %v1363_v27 = vmul.f32 %v2015_v62, %v1361_v16 }
0x1264   :  { %v1418_v53 = vpop.permute.xlu1 %1417 }
0x1265   :  { %vm1419_vm11 = vcmp.eq.s32.totalorder %v1418_v53, 1 }
0x1267   :  { %v1401_v61 = vpop.permute.xlu0 %1400 }
0x1268   :  { %v1403_v12 = vadd.f32 %v1401_v61, %v1335_v59 }
0x126a   :  { %2022 = vtanh.f32 %v1403_v12  ;;  %v1766_v12 = vpack.c.bf16 %v2229_v36, %v2229_v36  ;;  %v1774_v36 = vpack.c.bf16 %v2424_v31, %v2424_v31 }
0x1274   :  { %v2023_v13 = vpop.eup %2022 }
0x1275   :  { %1407 = vrot.lane.b32.xlu0 %v2023_v13, %s2047_s4  ;;  %v1770_v13 = vpack.c.bf16 %v2331_v63, %v2331_v63 }
0x12cb   :  { %v1357_v19 = vpop.permute.xlu0 %1356 }
0x12cc   :  { %v1359_v2 = vmul.f32 %v1357_v19, %v1354_v23 }
0x12ce   :  { %v1364_v37 = vadd.f32 %v1363_v27, %v1359_v2  ;;  %v1767_v2 = vpack.c.bf16 %v2281_v28, %v2281_v28  ;;  %v1773_v28 = vpack.c.bf16 %v2420_v22, %v2420_v22 }
0x12cf   :  { %v1386_v38 = vpop.permute.xlu0 %1385 }
0x12d0   :  { %v2496_v25 = vsel %vm1371_vm10, %v1364_v37, 0.0  ;;  %v1388_v40 = vadd.f32 %v1386_v38, %v1335_v59  ;;  %v1372_v41 = vsel %vm1371_vm10, %v1364_v37, %v1361_v16  ;;  %v1769_v38 = vpack.c.bf16 %v2327_v42, %v2327_v42 }
0x12d1   :  { %1423 = vrot.lane.b32.xlu1 %v1372_v41, %s2047_s4  ;;  %v1777_v22 = vpack.c.bf16 %v2496_v25, %v2496_v25 }
0x12d2   :  { %v1749_v44 = vmul.f32 -1.442695, %v1388_v40 }
0x12d4   :  { %2024 = vpow2.f32 %v1749_v44 }
0x12de   :  { %v2025_v46 = vpop.eup %2024 }
0x12df   :  { %v1392_v45 = vadd.f32 1.0, %v2025_v46 }
0x12e1   :  { %2026 = vrcp.f32 %v1392_v45 }
0x12e7   :  { %v1408_v39 = vpop.permute.xlu0 %1407 }
0x12eb   :  { %v2027_v48 = vpop.eup %2026 }
0x12ec   :  { %v1405_v29 = vsub.f32 1.0, %v2027_v48  ;;  %v1411_v9 = vmul.f32 %v2027_v48, %v2476_v15 }
0x12ee   :  { %v1410_v14 = vmul.f32 %v1408_v39, %v1405_v29 }
0x12f0   :  { %v1412_v20 = vadd.f32 %v1411_v9, %v1410_v14 }
0x12f2   :  { %v1421_v21 = vsel %vm1419_vm11, %v1412_v20, 0.0  ;;  %v1420_v10 = vsel %vm1419_vm11, %v1412_v20, %v2476_v15  ;;  %v1756_v15 = vld [vmem:[%s2650_s0 + $0x1c] sm:$0xf] }
0x12f3   :  { %v1525_v59 = vunpack.c.l.bf16 %v1756_v15  ;;  %v1778_v60 = vpack.c.bf16 %v1421_v21, %v1421_v21 }
0x1343   :  { %v1424_v55 = vpop.permute.xlu1 %1423 }
0x1344   :  { %1426 = vst.msk [vmem:[#allocation2] sm:$0xff] %vm266_vm5, %v1424_v55 }
0x1345   :  { %1427 = vst.msk [vmem:[#allocation2] sm:$0xff] %vm268_vm6, %v1420_v10 }
0x134c   :  { %v2503_v49 = vld [vmem:[#allocation2] sm:$0xff] }
0x134d   :  { %1755 = vmatmul.mubr.msk.f32.vlgmr.msra.gmra.mrb[6].mxu1 %vm63_vm0, %v2503_v49  ;;  %vm277_vm0 = vcmask 257024  }
0x1420   :  { %v1518_v56 = vpop.f32.mrb[6].mxu1 }
0x1421   :  { %v1519_v17 = vadd.f32 %v1518_v56, %v2188_v32  ;;  %v1520_v57 = vpop.f32.mrb[7].mxu1  ;;  %v1526_v32 = vld [vmem:[%s2651_s1] sm:$0xf] }
0x1422   :  { %v1521_v58 = vadd.f32 %v1520_v57, %v2190_v33  ;;  %v2518_v5 = vunpack.c.l.bf16 %v1526_v32 }
0x1423   :  { %1536 = vrot.lane.b32.xlu1 %v1519_v17, %s2046_s30  ;;  %1566 = vrot.lane.b32.xlu0 %v1519_v17, %s2048_s7  ;;  %v1528_v62 = vadd.f32 %v1525_v59, %v1519_v17 }
0x1425   :  { %v1757_v1 = vmul.f32 -1.442695, %v1528_v62 }
0x1427   :  { %1587 = vrot.lane.b32.xlu0 %v1521_v58, %s2047_s4  ;;  %2028 = vpow2.f32 %v1757_v1 }
0x1431   :  { %v2029_v35 = vpop.eup %2028 }
0x1432   :  { %v1532_v52 = vadd.f32 1.0, %v2029_v35 }
0x1434   :  { %2030 = vrcp.f32 %v1532_v52 }
0x143e   :  { %v2520_v33 = vpop.eup %2030 }
0x143f   :  { %v1546_v53 = vsub.f32 1.0, %v2520_v33 }
0x1495   :  { %v1537_v34 = vpop.permute.xlu1 %1536  ;;  %v1567_v8 = vpop.permute.xlu0 %1566 }
0x1496   :  { %v1539_v6 = vmul.f32 %v2520_v33, %v1537_v34  ;;  %v1569_v24 = vadd.f32 %v1567_v8, %v2518_v5 }
0x1498   :  { %v1759_v7 = vmul.f32 -1.442695, %v1569_v24  ;;  %1541 = vrot.lane.b32.xlu1 %v1539_v6, %s2046_s30 }
0x1499   :  { %v1588_v43 = vpop.permute.xlu0 %1587 }
0x149a   :  { %2032 = vpow2.f32 %v1759_v7 }
0x149c   :  { %1577 = vrot.lane.b32.xlu1 %v1521_v58, %s2048_s7 }
0x14a0   :  { %1609 = vperm.xlu1 %1914, %v2211_v51   ;;  %v1768_v51 = vpack.c.bf16 %v2285_v47, %v2285_v47  ;;  %v1776_v47 = vpack.c.bf16 %v2471_v3, %v2471_v3  ;;  %v1765_v3 = vpack.c.bf16 %v2225_v18, %v2225_v18  ;;  %v1771_v18 = vpack.c.bf16 %v2383_v0, %v2383_v0 }
0x14a1   :  { %v1775_v0 = vpack.c.bf16 %v2467_v30, %v2467_v30 }
0x14a4   :  { %v2033_v50 = vpop.eup %2032 }
0x14a5   :  { %v1573_v11 = vadd.f32 1.0, %v2033_v50 }
0x14a7   :  { %2034 = vrcp.f32 %v1573_v11 }
0x14b1   :  { %v2035_v4 = vpop.eup %2034 }
0x14b2   :  { %v1590_v61 = vmul.f32 %v2035_v4, %v1588_v43 }
0x14b4   :  { %1592 = vrot.lane.b32.xlu0 %v1590_v61, %s2046_s30 }
0x14b8   :  { %1561 = vperm.xlu0 %1915, %v2218_v54   ;;  %v1772_v54 = vpack.c.bf16 %v2387_v26, %v2387_v26 }
0x14bc   :  { %1552 = vrot.lane.b32.xlu0 %v2503_v49, %s2048_s7 }
0x14c0   :  { %283 = vrot.lane.b32.xlu0 %v1766_v12, %s2047_s4 }
0x14c4   :  { %476 = vrot.lane.b32.xlu0 %v1768_v51, %s2047_s4 }
0x14c8   :  { %669 = vrot.lane.b32.xlu0 %v1770_v13, %s2047_s4 }
0x14cc   :  { %862 = vrot.lane.b32.xlu0 %v1772_v54, %s2047_s4 }
0x14d0   :  { %1055 = vrot.lane.b32.xlu0 %v1774_v36, %s2047_s4 }
0x14d4   :  { %1248 = vrot.lane.b32.xlu0 %v1776_v47, %s2047_s4 }
0x14d8   :  { %1441 = vrot.lane.b32.xlu0 %v1778_v60, %s2047_s4 }
0x150a   :  { %v1542_v63 = vpop.permute.xlu1 %1541 }
0x150b   :  { %v1544_v16 = vadd.f32 %v1542_v63, %v1525_v59 }
0x150d   :  { %2036 = vtanh.f32 %v1544_v16 }
0x150e   :  { %v1578_v25 = vpop.permute.xlu1 %1577 }
0x150f   :  { %v1580_v48 = vadd.f32 %v1578_v25, %v2518_v5 }
0x1511   :  { %v1760_v29 = vmul.f32 -1.442695, %v1580_v48 }
0x1517   :  { %v2037_v23 = vpop.eup %2036 }
0x1518   :  { %1548 = vrot.lane.b32.xlu1 %v2037_v23, %s2047_s4 }
0x151f   :  { %v1610_v39 = vpop.permute.xlu1 %1609 }
0x1520   :  { %vm1611_vm13 = vcmp.eq.s32.totalorder %v1610_v39, 1 }
0x1526   :  { %v1593_v26 = vpop.permute.xlu0 %1592 }
0x1527   :  { %v1595_v19 = vadd.f32 %v1593_v26, %v2518_v5 }
0x1529   :  { %2038 = vtanh.f32 %v1595_v19 }
0x152a   :  { %2040 = vpow2.f32 %v1760_v29 }
0x1533   :  { %v2039_v31 = vpop.eup %2038 }
0x1534   :  { %1599 = vrot.lane.b32.xlu1 %v2039_v31, %s2047_s4  ;;  %v2041_v17 = vpop.eup %2040 }
0x1535   :  { %v1584_v57 = vadd.f32 1.0, %v2041_v17 }
0x1537   :  { %v1562_v27 = vpop.permute.xlu0 %1561  ;;  %2042 = vrcp.f32 %v1584_v57 }
0x1538   :  { %274 = vrot.lane.b32.xlu1 %v1765_v3, %s2047_s4  ;;  %vm1563_vm12 = vcmp.eq.s32.totalorder %v1562_v27, 1 }
0x153b   :  { %v1553_v37 = vpop.permute.xlu0 %1552 }
0x153c   :  { %467 = vrot.lane.b32.xlu1 %v1767_v2, %s2047_s4  ;;  %v1555_v14 = vmul.f32 %v2520_v33, %v1553_v37 }
0x153f   :  { %v284_v40 = vpop.permute.xlu0 %283 }
0x1540   :  { %1682 = vst.msk [vmem:[%s2653_s6 + $0x1c] sm:$0xf] %vm277_vm0, %v284_v40  ;;  %660 = vrot.lane.b32.xlu1 %v1769_v38, %s2047_s4 }
0x1541   :  { %v2043_v58 = vpop.eup %2042 }
0x1542   :  { %v1597_v15 = vsub.f32 1.0, %v2043_v58  ;;  %v1603_v62 = vmul.f32 %v2043_v58, %v2503_v49 }
0x1543   :  { %v477_v41 = vpop.permute.xlu0 %476 }
0x1544   :  { %1694 = vst.msk [vmem:[%s2653_s6 + $0x18] sm:$0xf] %vm277_vm0, %v477_v41  ;;  %853 = vrot.lane.b32.xlu1 %v1771_v18, %s2047_s4 }
0x1547   :  { %v670_v42 = vpop.permute.xlu0 %669 }
0x1548   :  { %1706 = vst.msk [vmem:[%s2653_s6 + $0x14] sm:$0xf] %vm277_vm0, %v670_v42  ;;  %1046 = vrot.lane.b32.xlu1 %v1773_v28, %s2047_s4 }
0x154b   :  { %v863_v44 = vpop.permute.xlu0 %862 }
0x154c   :  { %1718 = vst.msk [vmem:[%s2653_s6 + $0x10] sm:$0xf] %vm277_vm0, %v863_v44  ;;  %1239 = vrot.lane.b32.xlu1 %v1775_v0, %s2047_s4 }
0x154f   :  { %v1056_v46 = vpop.permute.xlu0 %1055 }
0x1550   :  { %1730 = vst.msk [vmem:[%s2653_s6 + $0xc] sm:$0xf] %vm277_vm0, %v1056_v46  ;;  %1432 = vrot.lane.b32.xlu1 %v1777_v22, %s2047_s4 }
0x1553   :  { %v1249_v30 = vpop.permute.xlu0 %1248 }
0x1554   :  { %1742 = vst.msk [vmem:[%s2653_s6 + $0x8] sm:$0xf] %vm277_vm0, %v1249_v30 }
0x1557   :  { %v1442_v45 = vpop.permute.xlu0 %1441 }
0x1558   :  { %1754 = vst.msk [vmem:[%s2653_s6 + $0x4] sm:$0xf] %vm277_vm0, %v1442_v45 }
0x158a   :  { %v1549_v9 = vpop.permute.xlu1 %1548 }
0x158b   :  { %v1551_v20 = vmul.f32 %v1549_v9, %v1546_v53 }
0x158d   :  { %v1556_v21 = vadd.f32 %v1555_v14, %v1551_v20 }
0x158f   :  { %v1565_v55 = vsel %vm1563_vm12, %v1556_v21, 0.0  ;;  %v1564_v10 = vsel %vm1563_vm12, %v1556_v21, %v1553_v37 }
0x1590   :  { %v1779_v56 = vpack.c.bf16 %v1565_v55, %v1565_v55  ;;  %1615 = vrot.lane.b32.xlu0 %v1564_v10, %s2047_s4 }
0x1592   :  { %1624 = vrot.lane.b32.xlu1 %v1779_v56, %s2047_s4 }
0x15a6   :  { %v1600_v59 = vpop.permute.xlu1 %1599 }
0x15a7   :  { %v1602_v1 = vmul.f32 %v1600_v59, %v1597_v15 }
0x15a9   :  { %v1604_v35 = vadd.f32 %v1603_v62, %v1602_v1 }
0x15aa   :  { %v275_v52 = vpop.permute.xlu1 %274 }
0x15ab   :  { %v1612_v32 = vsel %vm1611_vm13, %v1604_v35, %v2503_v49  ;;  %v1613_v5 = vsel %vm1611_vm13, %v1604_v35, 0.0  ;;  %278 = vst.msk [vmem:[%s2654_s5] sm:$0xf] %vm277_vm0, %v275_v52 }
0x15ac   :  { %v1780_v33 = vpack.c.bf16 %v1613_v5, %v1613_v5 }
0x15ae   :  { %1633 = vrot.lane.b32.xlu0 %v1780_v33, %s2047_s4  ;;  %v468_v34 = vpop.permute.xlu1 %467 }
0x15af   :  { %1692 = vst.msk [vmem:[%s2654_s5 + $0x4] sm:$0xf] %vm277_vm0, %v468_v34 }
0x15b2   :  { %v661_v8 = vpop.permute.xlu1 %660 }
0x15b3   :  { %1704 = vst.msk [vmem:[%s2654_s5 + $0x8] sm:$0xf] %vm277_vm0, %v661_v8 }
0x15b6   :  { %v854_v49 = vpop.permute.xlu1 %853 }
0x15b7   :  { %1716 = vst.msk [vmem:[%s2654_s5 + $0xc] sm:$0xf] %vm277_vm0, %v854_v49 }
0x15ba   :  { %v1047_v6 = vpop.permute.xlu1 %1046 }
0x15bb   :  { %1728 = vst.msk [vmem:[%s2654_s5 + $0x10] sm:$0xf] %vm277_vm0, %v1047_v6 }
0x15be   :  { %v1240_v24 = vpop.permute.xlu1 %1239 }
0x15bf   :  { %1740 = vst.msk [vmem:[%s2654_s5 + $0x14] sm:$0xf] %vm277_vm0, %v1240_v24 }
0x15c2   :  { %v1433_v7 = vpop.permute.xlu1 %1432 }
0x15c3   :  { %1752 = vst.msk [vmem:[%s2654_s5 + $0x18] sm:$0xf] %vm277_vm0, %v1433_v7 }
0x1602   :  { %v1616_v50 = vpop.permute.xlu0 %1615 }
0x1603   :  { %1618 = vst.msk [vmem:[#allocation2] sm:$0xff] %vm266_vm5, %v1616_v50 }
0x1604   :  { %1619 = vst.msk [vmem:[#allocation2] sm:$0xff] %vm268_vm6, %v1612_v32  ;;  %v1625_v11 = vpop.permute.xlu1 %1624 }
0x1605   :  { %1763 = vst.msk [vmem:[%s2654_s5 + $0x1c] sm:$0xf] %vm277_vm0, %v1625_v11 }
0x1620   :  { %v1634_v4 = vpop.permute.xlu0 %1633 }
0x1621   :  { %1636 = vst.msk [vmem:[%s2653_s6] sm:$0xf] %vm277_vm0, %v1634_v4 }

</bundles_post_ra>
